<compile_context>
chip_gen: v5e
topology: v5e:2x2
jax: 0.10.0
libtpu: 0.0.40
codegen_flags: <defaults>
</compile_context>

<pallas_src>
import jax
import jax.numpy as jnp
from jax import lax
from jax.experimental import pallas as pl
from jax.experimental.pallas import tpu as pltpu

SUBLANE = 8  # pad batch to a multiple of this


# ---------------------------------------------------------------------------
# Fused kernel: embed/conv/relu -> bi-LSTM -> uni-LSTM -> max -> linear -> sigmoid
# ---------------------------------------------------------------------------

def fused_forward_kernel(tok_ref, foldw_ref, convb_ref,
                         wbif_ref, wbib_ref, bbi_ref, whhbi_ref,
                         wuni_ref, whhuni_ref, buni_ref,
                         lw_ref, lb_ref,
                         out_ref,
                         x_scr, xp_scr, hbi_scr):
    # tok_ref:  (L_in, B) int32
    # foldw_ref:(F, Vp, H) f32   (embedding folded into conv taps, V padded)
    # convb_ref:(1, H) f32
    # wbif/wbib:(H, 4H) bf16     (bi-LSTM input proj, per-direction gate cols
    #                             placed at packed positions, zeros elsewhere)
    # bbi_ref:  (1, 4H) f32      whhbi_ref: (H, 4H) bf16 (block-diagonal)
    # wuni_ref/whhuni_ref: (H, 4H) bf16   buni_ref: (1, 4H) f32
    # lw_ref: (1, H) f32   lb_ref: (1, 1) f32   out_ref: (B, 1) f32
    # x_scr: (L, B, H) f32   xp_scr: (L, B, 4H) f32   hbi_scr: (L, B, H) f32
    L_in, B = tok_ref.shape
    F, Vp, H = foldw_ref.shape
    L, _, G = xp_scr.shape                     # L = L_in - F + 1, G = 4*H
    Hh = H // 2

    # ---- Stage 1: embedding (one-hot, folded into conv) + conv1d + ReLU ----
    tok = tok_ref[...]
    onehot = (tok[:, :, None] ==
              lax.broadcasted_iota(jnp.int32, (L_in, B, Vp), 2)
              ).astype(jnp.float32).reshape(L_in * B, Vp)
    acc = jnp.zeros((L * B, H), jnp.float32)
    for f in range(F):                                        # F static & tiny
        acc = acc + jnp.dot(onehot[f * B:(f + L) * B], foldw_ref[f],
                            preferred_element_type=jnp.float32)
    x = jnp.maximum(acc + convb_ref[...], 0.0)                # (L*B, H)
    x_scr[...] = x.reshape(L, B, H)                           # residual

    # ---- Stage 2: bi-LSTM, fwd+bwd interleaved, 128-lane packed gates ------
    # Packed gate columns: [i_f i_b | f_f f_b | o_f o_b | g_f g_b] (Hh each).
    x_bf = x.astype(jnp.bfloat16)
    xp_f = (jnp.dot(x_bf, wbif_ref[...], preferred_element_type=jnp.float32)
            + bbi_ref[...]).reshape(L, B, G)
    xp_b = jnp.dot(x_bf, wbib_ref[...],
                   preferred_element_type=jnp.float32).reshape(L, B, G)
    for s in range(L):                       # static: time-reverse bwd slab
        xp_scr[s] = xp_f[s] + xp_b[L - 1 - s]

    whh_bi = whhbi_ref[...]                  # loop-invariant (H, 4H) bf16
    h = jnp.zeros((B, H), jnp.float32)       # [h_fwd | h_bwd]
    c = jnp.zeros((B, H), jnp.float32)       # [c_fwd | c_bwd]
    for s in range(L):
        gates = xp_scr[s] + jnp.dot(h.astype(jnp.bfloat16), whh_bi,
                                    preferred_element_type=jnp.float32)
        sig = jax.nn.sigmoid(gates[:, 0:3 * H])               # [i | f | o]
        i_g, f_g, o_g = sig[:, 0:H], sig[:, H:2 * H], sig[:, 2 * H:3 * H]
        g_g = jnp.tanh(gates[:, 3 * H:4 * H])
        c = f_g * c + i_g * g_g
        h = o_g * jnp.tanh(c)
        hbi_scr[s, :, 0:Hh] = h[:, 0:Hh]          # fwd hidden at time s
        hbi_scr[L - 1 - s, :, Hh:H] = h[:, Hh:H]  # bwd hidden at time L-1-s

    # ---- Stage 3: uni-LSTM on (hbi + x_res); gate order [i, f, o, g] -------
    x2 = (hbi_scr[...] + x_scr[...]).reshape(L * B, H).astype(jnp.bfloat16)
    xp_scr[...] = (jnp.dot(x2, wuni_ref[...],
                           preferred_element_type=jnp.float32)
                   + buni_ref[...]).reshape(L, B, G)

    whh_u = whhuni_ref[...]
    hu = jnp.zeros((B, H), jnp.float32)
    cu = jnp.zeros((B, H), jnp.float32)
    mx = jnp.full((B, H), -jnp.inf, jnp.float32)
    for t in range(L):
        gates = xp_scr[t] + jnp.dot(hu.astype(jnp.bfloat16), whh_u,
                                    preferred_element_type=jnp.float32)
        sig = jax.nn.sigmoid(gates[:, 0:3 * H])
        i_g, f_g, o_g = sig[:, 0:H], sig[:, H:2 * H], sig[:, 2 * H:3 * H]
        g_g = jnp.tanh(gates[:, 3 * H:4 * H])
        cu = f_g * cu + i_g * g_g
        hu = o_g * jnp.tanh(cu)
        mx = jnp.maximum(mx, hu)                              # max over time

    # ---- Stage 4: linear(H -> 1) + sigmoid (VPU mul + lane reduction) ------
    logits = jnp.sum(mx * lw_ref[...], axis=1, keepdims=True) + lb_ref[...]
    out_ref[...] = jax.nn.sigmoid(logits)


def cnn_rnn_fused_call(tok, packed):
    L_in, B = tok.shape
    F, _, H = packed["folded_w"].shape
    L = L_in - F + 1
    G = 4 * H
    return pl.pallas_call(
        fused_forward_kernel,
        out_shape=jax.ShapeDtypeStruct((B, 1), jnp.float32),
        scratch_shapes=[
            pltpu.VMEM((L, B, H), jnp.float32),   # conv output / residual
            pltpu.VMEM((L, B, G), jnp.float32),   # packed gate slab (bi, then uni)
            pltpu.VMEM((L, B, H), jnp.float32),   # bi-LSTM hidden concat
        ],
    )(tok,
      packed["folded_w"], packed["conv_b"],
      packed["bi_wih_f"], packed["bi_wih_b"], packed["bi_b"], packed["bi_whh"],
      packed["uni_wih"], packed["uni_whh"], packed["uni_b"],
      packed["lin_w"], packed["lin_b"])


# ---------------------------------------------------------------------------
# Forward pass
# ---------------------------------------------------------------------------

@jax.jit
def cnn_rnn_binary_forward(token_ids, packed):
    L_in, B = token_ids.shape
    F = packed["folded_w"].shape[0]
    assert L_in >= F, "sequence shorter than conv filter"
    B_pad = max(SUBLANE, ((B + SUBLANE - 1) // SUBLANE) * SUBLANE)
    if B_pad != B:  # pad with token id 0 (padding row); padded rows discarded
        token_ids = jnp.pad(token_ids, ((0, 0), (0, B_pad - B)))
    out = cnn_rnn_fused_call(token_ids.astype(jnp.int32), packed)
    return out[:B, 0]                                        # .squeeze()
# TODO(synk): training-mode dropout and the `pastmodel` branch (drop()) are not
# implemented (eval-mode identity semantics used instead).


# ---------------------------------------------------------------------------
# Parameter construction (transposed-PyTorch layouts) + packing for the kernel
# ---------------------------------------------------------------------------

def make_params(key, vocab_size, embedding_dim, hidden_dim, filter_size):
    ks = jax.random.split(key, 16)
    s = 0.1

    def rnd(k, shape):
        return (s * jax.random.normal(k, shape)).astype(jnp.float32)

    emb = rnd(ks[0], (vocab_size, embedding_dim)).at[0].set(0.0)  # padding_idx=0
    H, Hh = hidden_dim, hidden_dim // 2

    def lstm(k0, k1, k2, in_dim, h_dim):
        # Transposed PyTorch layout: W_ih^T (in,4h), W_hh^T (h,4h); bias=b_ih+b_hh.
        return (rnd(k0, (in_dim, 4 * h_dim)),
                rnd(k1, (h_dim, 4 * h_dim)),
                rnd(k2, (4 * h_dim,)))

    return {
        "embedding": emb,
        # taps-major conv weight: conv_w[f] = W_pytorch[:, :, f].T  (E, H)
        "conv_w": rnd(ks[1], (filter_size, embedding_dim, H)),
        "conv_b": rnd(ks[2], (H,)),
        "bi_fwd": lstm(ks[3], ks[4], ks[5], H, Hh),
        "bi_bwd": lstm(ks[6], ks[7], ks[8], H, Hh),
        "uni": lstm(ks[9], ks[10], ks[11], H, H),
        "lin_w": rnd(ks[12], (1, H)),                          # PyTorch (1, H)
        "lin_b": rnd(ks[13], (1,)),
    }


_IFOG = (0, 1, 3, 2)   # PyTorch gate order [i, f, g, o] -> packed [i, f, o, g]


def _place_dir(m, h, direction):
    """Place one direction's gates (PyTorch order, width h each) into the packed
    [i_f i_b | f_f f_b | o_f o_b | g_f g_b] layout (zeros in the other slots)."""
    gates = [m[..., k * h:(k + 1) * h] for k in range(4)]      # i, f, g, o
    z = jnp.zeros_like(gates[0])
    blocks = []
    for k in _IFOG:
        blocks.extend([gates[k], z] if direction == 0 else [z, gates[k]])
    return jnp.concatenate(blocks, axis=-1)


def _reorder_ifog(m, h):
    gates = [m[..., k * h:(k + 1) * h] for k in range(4)]
    return jnp.concatenate([gates[k] for k in _IFOG], axis=-1)


def pack_params(p):
    V, _ = p["embedding"].shape
    F, _, H = p["conv_w"].shape
    Hh = H // 2
    bf16 = jnp.bfloat16

    # Fold embedding into the conv taps: folded[f] = emb @ conv_w[f]  (V, H).
    folded = jnp.einsum("ve,feh->fvh", p["embedding"], p["conv_w"])
    Vp = ((V + 127) // 128) * 128
    folded = jnp.pad(folded, ((0, 0), (0, Vp - V), (0, 0)))

    wih_f, whh_f, b_f = p["bi_fwd"]
    wih_b, whh_b, b_b = p["bi_bwd"]
    wih_u, whh_u, b_u = p["uni"]

    return {
        "folded_w": folded.astype(jnp.float32),                     # (F, Vp, H)
        "conv_b": p["conv_b"].reshape(1, H).astype(jnp.float32),
        "bi_wih_f": _place_dir(wih_f, Hh, 0).astype(bf16),          # (H, 4H)
        "bi_wih_b": _place_dir(wih_b, Hh, 1).astype(bf16),          # (H, 4H)
        "bi_b": (_place_dir(b_f.reshape(1, -1), Hh, 0)
                 + _place_dir(b_b.reshape(1, -1), Hh, 1)).astype(jnp.float32),
        "bi_whh": jnp.concatenate(
            [_place_dir(whh_f, Hh, 0), _place_dir(whh_b, Hh, 1)],
            axis=0).astype(bf16),                                   # (H, 4H)
        "uni_wih": _reorder_ifog(wih_u, H).astype(bf16),            # (H, 4H)
        "uni_whh": _reorder_ifog(whh_u, H).astype(bf16),            # (H, 4H)
        "uni_b": _reorder_ifog(b_u.reshape(1, -1), H).astype(jnp.float32),
        "lin_w": p["lin_w"].reshape(1, H).astype(jnp.float32),
        "lin_b": p["lin_b"].reshape(1, 1).astype(jnp.float32),
    }


# ---------------------------------------------------------------------------
# Pure-JAX reference (eval-mode semantics of the PyTorch forward)
# ---------------------------------------------------------------------------

def reference_forward(token_ids, params):
    L_in, B = token_ids.shape
    emb = params["embedding"][token_ids]                       # (L_in, B, E)
    F, _, H = params["conv_w"].shape
    L = L_in - F + 1
    x = jnp.zeros((L, B, H), jnp.float32)
    for f in range(F):
        x = x + jnp.einsum("lbe,eh->lbh", emb[f:f + L], params["conv_w"][f])
    x = jnp.maximum(x + params["conv_b"], 0.0)
    x_res = x

    def lstm(xs, wih, whh, b, h_dim, reverse=False):
        if reverse:
            xs = xs[::-1]

        def step(carry, xt):
            h, c = carry
            g = xt @ wih + h @ whh + b
            i = jax.nn.sigmoid(g[:, 0:h_dim])
            f_ = jax.nn.sigmoid(g[:, h_dim:2 * h_dim])
            gg = jnp.tanh(g[:, 2 * h_dim:3 * h_dim])
            o = jax.nn.sigmoid(g[:, 3 * h_dim:4 * h_dim])
            c = f_ * c + i * gg
            h = o * jnp.tanh(c)
            return (h, c), h

        init = (jnp.zeros((B, h_dim), jnp.float32),
                jnp.zeros((B, h_dim), jnp.float32))
        _, hs = lax.scan(step, init, xs)
        return hs[::-1] if reverse else hs

    Hh = H // 2
    hf = lstm(x, *params["bi_fwd"], Hh)
    hb = lstm(x, *params["bi_bwd"], Hh, reverse=True)
    hbi = jnp.concatenate([hf, hb], axis=-1)
    hu = lstm(hbi + x_res, *params["uni"], H)
    mx = jnp.max(hu, axis=0)
    logits = mx @ params["lin_w"].T + params["lin_b"]
    return jax.nn.sigmoid(logits)[:, 0]


# ---------------------------------------------------------------------------

if __name__ == "__main__":
    hidden_dim = 32
    filter_size = 3
    vocab_size = 50
    embedding_dim = 16
    batch = 2
    seq_len = 12      # conv output length = 10

    key = jax.random.PRNGKey(0)
    k_par, k_tok = jax.random.split(key)
    params = make_params(k_par, vocab_size, embedding_dim, hidden_dim, filter_size)
    packed = pack_params(params)

    # token ids, time-major (L_in, B)
    token_ids = jax.random.randint(k_tok, (seq_len, batch), 0, vocab_size)

    out = cnn_rnn_binary_forward(token_ids, packed)
    out = jax.block_until_ready(out)

    assert out.shape == (batch,), out.shape
    assert bool(jnp.all(jnp.isfinite(out)))

    ref = reference_forward(token_ids, params)
    err = float(jnp.max(jnp.abs(out - ref)))
    assert err < 2e-2, f"mismatch vs pure-JAX reference: {err}"

    print("KERNEL_OK")
</pallas_src>

<mosaic_0001>
module attributes {stable_mosaic.version = 11 : i64} {
  func.func @fused_forward_kernel(%arg0: memref<12x8xi32, #tpu.memory_space<vmem>>, %arg1: memref<3x128x32xf32, #tpu.memory_space<vmem>>, %arg2: memref<1x32xf32, #tpu.memory_space<vmem>>, %arg3: memref<32x128xbf16, #tpu.memory_space<vmem>>, %arg4: memref<32x128xbf16, #tpu.memory_space<vmem>>, %arg5: memref<1x128xf32, #tpu.memory_space<vmem>>, %arg6: memref<32x128xbf16, #tpu.memory_space<vmem>>, %arg7: memref<32x128xbf16, #tpu.memory_space<vmem>>, %arg8: memref<32x128xbf16, #tpu.memory_space<vmem>>, %arg9: memref<1x128xf32, #tpu.memory_space<vmem>>, %arg10: memref<1x32xf32, #tpu.memory_space<vmem>>, %arg11: memref<1x1xf32, #tpu.memory_space<vmem>>, %arg12: memref<8x1xf32, #tpu.memory_space<vmem>>, %arg13: memref<10x8x32xf32, #tpu.memory_space<vmem>>, %arg14: memref<10x8x128xf32, #tpu.memory_space<vmem>>, %arg15: memref<10x8x32xf32, #tpu.memory_space<vmem>>) attributes {dimension_semantics = [], scalar_prefetch = 0 : i64, scratch_operands = 3 : i64, tpu.core_type = #tpu.core_type<tc>} {
    %c0 = arith.constant 0 : index
    %c0_0 = arith.constant 0 : index
    %0 = vector.load %arg0[%c0, %c0_0] : memref<12x8xi32, #tpu.memory_space<vmem>>, vector<12x8xi32>
    %1 = vector.shape_cast %0 : vector<12x8xi32> to vector<12x8x1xi32>
    %2 = tpu.iota {dimensions = array<i32: 2>} : vector<12x8x128xi32>
    %3 = vector.broadcast %1 : vector<12x8x1xi32> to vector<12x8x128xi32>
    %4 = arith.cmpi eq, %3, %2 : vector<12x8x128xi32>
    %5 = arith.extui %4 : vector<12x8x128xi1> to vector<12x8x128xi32>
    %6 = arith.sitofp %5 : vector<12x8x128xi32> to vector<12x8x128xf32>
    %7 = vector.shape_cast %6 : vector<12x8x128xf32> to vector<96x128xf32>
    %cst = arith.constant 0.000000e+00 : f32
    %8 = vector.broadcast %cst : f32 to vector<80x32xf32>
    %9 = vector.extract_strided_slice %7 {offsets = [0, 0], sizes = [80, 128], strides = [1, 1]} : vector<96x128xf32> to vector<80x128xf32>
    %c0_1 = arith.constant 0 : index
    %c0_2 = arith.constant 0 : index
    %c0_3 = arith.constant 0 : index
    %10 = vector.load %arg1[%c0_1, %c0_2, %c0_3] : memref<3x128x32xf32, #tpu.memory_space<vmem>>, vector<1x128x32xf32>
    %11 = vector.shape_cast %10 : vector<1x128x32xf32> to vector<128x32xf32>
    %cst_4 = arith.constant dense<0.000000e+00> : vector<80x32xf32>
    %12 = tpu.matmul %9, %11, %cst_4 {dimension_numbers = #tpu.dot_dimension_numbers<[1], [0], [0], [1], [0, 0, 1, 1], [], []>} : vector<80x128xf32>, vector<128x32xf32>, vector<80x32xf32> -> vector<80x32xf32>
    %13 = arith.addf %8, %12 : vector<80x32xf32>
    %14 = vector.extract_strided_slice %7 {offsets = [8, 0], sizes = [80, 128], strides = [1, 1]} : vector<96x128xf32> to vector<80x128xf32>
    %c1 = arith.constant 1 : index
    %c0_5 = arith.constant 0 : index
    %c0_6 = arith.constant 0 : index
    %15 = vector.load %arg1[%c1, %c0_5, %c0_6] : memref<3x128x32xf32, #tpu.memory_space<vmem>>, vector<1x128x32xf32>
    %16 = vector.shape_cast %15 : vector<1x128x32xf32> to vector<128x32xf32>
    %cst_7 = arith.constant dense<0.000000e+00> : vector<80x32xf32>
    %17 = tpu.matmul %14, %16, %cst_7 {dimension_numbers = #tpu.dot_dimension_numbers<[1], [0], [0], [1], [0, 0, 1, 1], [], []>} : vector<80x128xf32>, vector<128x32xf32>, vector<80x32xf32> -> vector<80x32xf32>
    %18 = arith.addf %13, %17 : vector<80x32xf32>
    %19 = vector.extract_strided_slice %7 {offsets = [16, 0], sizes = [80, 128], strides = [1, 1]} : vector<96x128xf32> to vector<80x128xf32>
    %c2 = arith.constant 2 : index
    %c0_8 = arith.constant 0 : index
    %c0_9 = arith.constant 0 : index
    %20 = vector.load %arg1[%c2, %c0_8, %c0_9] : memref<3x128x32xf32, #tpu.memory_space<vmem>>, vector<1x128x32xf32>
    %21 = vector.shape_cast %20 : vector<1x128x32xf32> to vector<128x32xf32>
    %cst_10 = arith.constant dense<0.000000e+00> : vector<80x32xf32>
    %22 = tpu.matmul %19, %21, %cst_10 {dimension_numbers = #tpu.dot_dimension_numbers<[1], [0], [0], [1], [0, 0, 1, 1], [], []>} : vector<80x128xf32>, vector<128x32xf32>, vector<80x32xf32> -> vector<80x32xf32>
    %23 = arith.addf %18, %22 : vector<80x32xf32>
    %c0_11 = arith.constant 0 : index
    %c0_12 = arith.constant 0 : index
    %24 = vector.load %arg2[%c0_11, %c0_12] : memref<1x32xf32, #tpu.memory_space<vmem>>, vector<1x32xf32>
    %25 = vector.broadcast %24 : vector<1x32xf32> to vector<80x32xf32>
    %26 = arith.addf %23, %25 : vector<80x32xf32>
    %cst_13 = arith.constant 0.000000e+00 : f32
    %27 = vector.broadcast %cst_13 : f32 to vector<80x32xf32>
    %28 = arith.maximumf %26, %27 : vector<80x32xf32>
    %29 = vector.shape_cast %28 : vector<80x32xf32> to vector<10x8x32xf32>
    %c0_14 = arith.constant 0 : index
    %c0_15 = arith.constant 0 : index
    %c0_16 = arith.constant 0 : index
    %30 = vector.load %arg13[%c0_14, %c0_15, %c0_16] : memref<10x8x32xf32, #tpu.memory_space<vmem>>, vector<10x8x32xf32>
    tpu.vector_store %arg13[%c0_14, %c0_15, %c0_16], %29 {strides = array<i32>} : memref<10x8x32xf32, #tpu.memory_space<vmem>>, vector<10x8x32xf32>,
    %31 = arith.truncf %28 : vector<80x32xf32> to vector<80x32xbf16>
    %c0_17 = arith.constant 0 : index
    %c0_18 = arith.constant 0 : index
    %32 = vector.load %arg3[%c0_17, %c0_18] : memref<32x128xbf16, #tpu.memory_space<vmem>>, vector<32x128xbf16>
    %cst_19 = arith.constant dense<0.000000e+00> : vector<80x128xf32>
    %33 = tpu.matmul %31, %32, %cst_19 {dimension_numbers = #tpu.dot_dimension_numbers<[1], [0], [0], [1], [0, 0, 1, 1], [], []>} : vector<80x32xbf16>, vector<32x128xbf16>, vector<80x128xf32> -> vector<80x128xf32>
    %c0_20 = arith.constant 0 : index
    %c0_21 = arith.constant 0 : index
    %34 = vector.load %arg5[%c0_20, %c0_21] : memref<1x128xf32, #tpu.memory_space<vmem>>, vector<1x128xf32>
    %35 = vector.broadcast %34 : vector<1x128xf32> to vector<80x128xf32>
    %36 = arith.addf %33, %35 : vector<80x128xf32>
    %37 = vector.shape_cast %36 : vector<80x128xf32> to vector<10x8x128xf32>
    %c0_22 = arith.constant 0 : index
    %c0_23 = arith.constant 0 : index
    %38 = vector.load %arg4[%c0_22, %c0_23] : memref<32x128xbf16, #tpu.memory_space<vmem>>, vector<32x128xbf16>
    %cst_24 = arith.constant dense<0.000000e+00> : vector<80x128xf32>
    %39 = tpu.matmul %31, %38, %cst_24 {dimension_numbers = #tpu.dot_dimension_numbers<[1], [0], [0], [1], [0, 0, 1, 1], [], []>} : vector<80x32xbf16>, vector<32x128xbf16>, vector<80x128xf32> -> vector<80x128xf32>
    %40 = vector.shape_cast %39 : vector<80x128xf32> to vector<10x8x128xf32>
    %41 = vector.extract_strided_slice %37 {offsets = [0, 0, 0], sizes = [1, 8, 128], strides = [1, 1, 1]} : vector<10x8x128xf32> to vector<1x8x128xf32>
    %42 = vector.shape_cast %41 : vector<1x8x128xf32> to vector<8x128xf32>
    %43 = vector.extract_strided_slice %40 {offsets = [9, 0, 0], sizes = [1, 8, 128], strides = [1, 1, 1]} : vector<10x8x128xf32> to vector<1x8x128xf32>
    %44 = vector.shape_cast %43 : vector<1x8x128xf32> to vector<8x128xf32>
    %45 = arith.addf %42, %44 : vector<8x128xf32>
    %c0_25 = arith.constant 0 : index
    %c0_26 = arith.constant 0 : index
    %c0_27 = arith.constant 0 : index
    %46 = vector.load %arg14[%c0_25, %c0_26, %c0_27] : memref<10x8x128xf32, #tpu.memory_space<vmem>>, vector<1x8x128xf32>
    %47 = vector.shape_cast %46 : vector<1x8x128xf32> to vector<8x128xf32>
    %48 = vector.shape_cast %45 : vector<8x128xf32> to vector<1x8x128xf32>
    tpu.vector_store %arg14[%c0_25, %c0_26, %c0_27], %48 {strides = array<i32>} : memref<10x8x128xf32, #tpu.memory_space<vmem>>, vector<1x8x128xf32>,
    %49 = vector.extract_strided_slice %37 {offsets = [1, 0, 0], sizes = [1, 8, 128], strides = [1, 1, 1]} : vector<10x8x128xf32> to vector<1x8x128xf32>
    %50 = vector.shape_cast %49 : vector<1x8x128xf32> to vector<8x128xf32>
    %51 = vector.extract_strided_slice %40 {offsets = [8, 0, 0], sizes = [1, 8, 128], strides = [1, 1, 1]} : vector<10x8x128xf32> to vector<1x8x128xf32>
    %52 = vector.shape_cast %51 : vector<1x8x128xf32> to vector<8x128xf32>
    %53 = arith.addf %50, %52 : vector<8x128xf32>
    %c1_28 = arith.constant 1 : index
    %c0_29 = arith.constant 0 : index
    %c0_30 = arith.constant 0 : index
    %54 = vector.load %arg14[%c1_28, %c0_29, %c0_30] : memref<10x8x128xf32, #tpu.memory_space<vmem>>, vector<1x8x128xf32>
    %55 = vector.shape_cast %54 : vector<1x8x128xf32> to vector<8x128xf32>
    %56 = vector.shape_cast %53 : vector<8x128xf32> to vector<1x8x128xf32>
    tpu.vector_store %arg14[%c1_28, %c0_29, %c0_30], %56 {strides = array<i32>} : memref<10x8x128xf32, #tpu.memory_space<vmem>>, vector<1x8x128xf32>,
    %57 = vector.extract_strided_slice %37 {offsets = [2, 0, 0], sizes = [1, 8, 128], strides = [1, 1, 1]} : vector<10x8x128xf32> to vector<1x8x128xf32>
    %58 = vector.shape_cast %57 : vector<1x8x128xf32> to vector<8x128xf32>
    %59 = vector.extract_strided_slice %40 {offsets = [7, 0, 0], sizes = [1, 8, 128], strides = [1, 1, 1]} : vector<10x8x128xf32> to vector<1x8x128xf32>
    %60 = vector.shape_cast %59 : vector<1x8x128xf32> to vector<8x128xf32>
    %61 = arith.addf %58, %60 : vector<8x128xf32>
    %c2_31 = arith.constant 2 : index
    %c0_32 = arith.constant 0 : index
    %c0_33 = arith.constant 0 : index
    %62 = vector.load %arg14[%c2_31, %c0_32, %c0_33] : memref<10x8x128xf32, #tpu.memory_space<vmem>>, vector<1x8x128xf32>
    %63 = vector.shape_cast %62 : vector<1x8x128xf32> to vector<8x128xf32>
    %64 = vector.shape_cast %61 : vector<8x128xf32> to vector<1x8x128xf32>
    tpu.vector_store %arg14[%c2_31, %c0_32, %c0_33], %64 {strides = array<i32>} : memref<10x8x128xf32, #tpu.memory_space<vmem>>, vector<1x8x128xf32>,
    %65 = vector.extract_strided_slice %37 {offsets = [3, 0, 0], sizes = [1, 8, 128], strides = [1, 1, 1]} : vector<10x8x128xf32> to vector<1x8x128xf32>
    %66 = vector.shape_cast %65 : vector<1x8x128xf32> to vector<8x128xf32>
    %67 = vector.extract_strided_slice %40 {offsets = [6, 0, 0], sizes = [1, 8, 128], strides = [1, 1, 1]} : vector<10x8x128xf32> to vector<1x8x128xf32>
    %68 = vector.shape_cast %67 : vector<1x8x128xf32> to vector<8x128xf32>
    %69 = arith.addf %66, %68 : vector<8x128xf32>
    %c3 = arith.constant 3 : index
    %c0_34 = arith.constant 0 : index
    %c0_35 = arith.constant 0 : index
    %70 = vector.load %arg14[%c3, %c0_34, %c0_35] : memref<10x8x128xf32, #tpu.memory_space<vmem>>, vector<1x8x128xf32>
    %71 = vector.shape_cast %70 : vector<1x8x128xf32> to vector<8x128xf32>
    %72 = vector.shape_cast %69 : vector<8x128xf32> to vector<1x8x128xf32>
    tpu.vector_store %arg14[%c3, %c0_34, %c0_35], %72 {strides = array<i32>} : memref<10x8x128xf32, #tpu.memory_space<vmem>>, vector<1x8x128xf32>,
    %73 = vector.extract_strided_slice %37 {offsets = [4, 0, 0], sizes = [1, 8, 128], strides = [1, 1, 1]} : vector<10x8x128xf32> to vector<1x8x128xf32>
    %74 = vector.shape_cast %73 : vector<1x8x128xf32> to vector<8x128xf32>
    %75 = vector.extract_strided_slice %40 {offsets = [5, 0, 0], sizes = [1, 8, 128], strides = [1, 1, 1]} : vector<10x8x128xf32> to vector<1x8x128xf32>
    %76 = vector.shape_cast %75 : vector<1x8x128xf32> to vector<8x128xf32>
    %77 = arith.addf %74, %76 : vector<8x128xf32>
    %c4 = arith.constant 4 : index
    %c0_36 = arith.constant 0 : index
    %c0_37 = arith.constant 0 : index
    %78 = vector.load %arg14[%c4, %c0_36, %c0_37] : memref<10x8x128xf32, #tpu.memory_space<vmem>>, vector<1x8x128xf32>
    %79 = vector.shape_cast %78 : vector<1x8x128xf32> to vector<8x128xf32>
    %80 = vector.shape_cast %77 : vector<8x128xf32> to vector<1x8x128xf32>
    tpu.vector_store %arg14[%c4, %c0_36, %c0_37], %80 {strides = array<i32>} : memref<10x8x128xf32, #tpu.memory_space<vmem>>, vector<1x8x128xf32>,
    %81 = vector.extract_strided_slice %37 {offsets = [5, 0, 0], sizes = [1, 8, 128], strides = [1, 1, 1]} : vector<10x8x128xf32> to vector<1x8x128xf32>
    %82 = vector.shape_cast %81 : vector<1x8x128xf32> to vector<8x128xf32>
    %83 = vector.extract_strided_slice %40 {offsets = [4, 0, 0], sizes = [1, 8, 128], strides = [1, 1, 1]} : vector<10x8x128xf32> to vector<1x8x128xf32>
    %84 = vector.shape_cast %83 : vector<1x8x128xf32> to vector<8x128xf32>
    %85 = arith.addf %82, %84 : vector<8x128xf32>
    %c5 = arith.constant 5 : index
    %c0_38 = arith.constant 0 : index
    %c0_39 = arith.constant 0 : index
    %86 = vector.load %arg14[%c5, %c0_38, %c0_39] : memref<10x8x128xf32, #tpu.memory_space<vmem>>, vector<1x8x128xf32>
    %87 = vector.shape_cast %86 : vector<1x8x128xf32> to vector<8x128xf32>
    %88 = vector.shape_cast %85 : vector<8x128xf32> to vector<1x8x128xf32>
    tpu.vector_store %arg14[%c5, %c0_38, %c0_39], %88 {strides = array<i32>} : memref<10x8x128xf32, #tpu.memory_space<vmem>>, vector<1x8x128xf32>,
    %89 = vector.extract_strided_slice %37 {offsets = [6, 0, 0], sizes = [1, 8, 128], strides = [1, 1, 1]} : vector<10x8x128xf32> to vector<1x8x128xf32>
    %90 = vector.shape_cast %89 : vector<1x8x128xf32> to vector<8x128xf32>
    %91 = vector.extract_strided_slice %40 {offsets = [3, 0, 0], sizes = [1, 8, 128], strides = [1, 1, 1]} : vector<10x8x128xf32> to vector<1x8x128xf32>
    %92 = vector.shape_cast %91 : vector<1x8x128xf32> to vector<8x128xf32>
    %93 = arith.addf %90, %92 : vector<8x128xf32>
    %c6 = arith.constant 6 : index
    %c0_40 = arith.constant 0 : index
    %c0_41 = arith.constant 0 : index
    %94 = vector.load %arg14[%c6, %c0_40, %c0_41] : memref<10x8x128xf32, #tpu.memory_space<vmem>>, vector<1x8x128xf32>
    %95 = vector.shape_cast %94 : vector<1x8x128xf32> to vector<8x128xf32>
    %96 = vector.shape_cast %93 : vector<8x128xf32> to vector<1x8x128xf32>
    tpu.vector_store %arg14[%c6, %c0_40, %c0_41], %96 {strides = array<i32>} : memref<10x8x128xf32, #tpu.memory_space<vmem>>, vector<1x8x128xf32>,
    %97 = vector.extract_strided_slice %37 {offsets = [7, 0, 0], sizes = [1, 8, 128], strides = [1, 1, 1]} : vector<10x8x128xf32> to vector<1x8x128xf32>
    %98 = vector.shape_cast %97 : vector<1x8x128xf32> to vector<8x128xf32>
    %99 = vector.extract_strided_slice %40 {offsets = [2, 0, 0], sizes = [1, 8, 128], strides = [1, 1, 1]} : vector<10x8x128xf32> to vector<1x8x128xf32>
    %100 = vector.shape_cast %99 : vector<1x8x128xf32> to vector<8x128xf32>
    %101 = arith.addf %98, %100 : vector<8x128xf32>
    %c7 = arith.constant 7 : index
    %c0_42 = arith.constant 0 : index
    %c0_43 = arith.constant 0 : index
    %102 = vector.load %arg14[%c7, %c0_42, %c0_43] : memref<10x8x128xf32, #tpu.memory_space<vmem>>, vector<1x8x128xf32>
    %103 = vector.shape_cast %102 : vector<1x8x128xf32> to vector<8x128xf32>
    %104 = vector.shape_cast %101 : vector<8x128xf32> to vector<1x8x128xf32>
    tpu.vector_store %arg14[%c7, %c0_42, %c0_43], %104 {strides = array<i32>} : memref<10x8x128xf32, #tpu.memory_space<vmem>>, vector<1x8x128xf32>,
    %105 = vector.extract_strided_slice %37 {offsets = [8, 0, 0], sizes = [1, 8, 128], strides = [1, 1, 1]} : vector<10x8x128xf32> to vector<1x8x128xf32>
    %106 = vector.shape_cast %105 : vector<1x8x128xf32> to vector<8x128xf32>
    %107 = vector.extract_strided_slice %40 {offsets = [1, 0, 0], sizes = [1, 8, 128], strides = [1, 1, 1]} : vector<10x8x128xf32> to vector<1x8x128xf32>
    %108 = vector.shape_cast %107 : vector<1x8x128xf32> to vector<8x128xf32>
    %109 = arith.addf %106, %108 : vector<8x128xf32>
    %c8 = arith.constant 8 : index
    %c0_44 = arith.constant 0 : index
    %c0_45 = arith.constant 0 : index
    %110 = vector.load %arg14[%c8, %c0_44, %c0_45] : memref<10x8x128xf32, #tpu.memory_space<vmem>>, vector<1x8x128xf32>
    %111 = vector.shape_cast %110 : vector<1x8x128xf32> to vector<8x128xf32>
    %112 = vector.shape_cast %109 : vector<8x128xf32> to vector<1x8x128xf32>
    tpu.vector_store %arg14[%c8, %c0_44, %c0_45], %112 {strides = array<i32>} : memref<10x8x128xf32, #tpu.memory_space<vmem>>, vector<1x8x128xf32>,
    %113 = vector.extract_strided_slice %37 {offsets = [9, 0, 0], sizes = [1, 8, 128], strides = [1, 1, 1]} : vector<10x8x128xf32> to vector<1x8x128xf32>
    %114 = vector.shape_cast %113 : vector<1x8x128xf32> to vector<8x128xf32>
    %115 = vector.extract_strided_slice %40 {offsets = [0, 0, 0], sizes = [1, 8, 128], strides = [1, 1, 1]} : vector<10x8x128xf32> to vector<1x8x128xf32>
    %116 = vector.shape_cast %115 : vector<1x8x128xf32> to vector<8x128xf32>
    %117 = arith.addf %114, %116 : vector<8x128xf32>
    %c9 = arith.constant 9 : index
    %c0_46 = arith.constant 0 : index
    %c0_47 = arith.constant 0 : index
    %118 = vector.load %arg14[%c9, %c0_46, %c0_47] : memref<10x8x128xf32, #tpu.memory_space<vmem>>, vector<1x8x128xf32>
    %119 = vector.shape_cast %118 : vector<1x8x128xf32> to vector<8x128xf32>
    %120 = vector.shape_cast %117 : vector<8x128xf32> to vector<1x8x128xf32>
    tpu.vector_store %arg14[%c9, %c0_46, %c0_47], %120 {strides = array<i32>} : memref<10x8x128xf32, #tpu.memory_space<vmem>>, vector<1x8x128xf32>,
    %c0_48 = arith.constant 0 : index
    %c0_49 = arith.constant 0 : index
    %121 = vector.load %arg6[%c0_48, %c0_49] : memref<32x128xbf16, #tpu.memory_space<vmem>>, vector<32x128xbf16>
    %cst_50 = arith.constant 0.000000e+00 : f32
    %122 = vector.broadcast %cst_50 : f32 to vector<8x32xf32>
    %cst_51 = arith.constant 0.000000e+00 : f32
    %123 = vector.broadcast %cst_51 : f32 to vector<8x32xf32>
    %c0_52 = arith.constant 0 : index
    %c0_53 = arith.constant 0 : index
    %c0_54 = arith.constant 0 : index
    %124 = vector.load %arg14[%c0_52, %c0_53, %c0_54] : memref<10x8x128xf32, #tpu.memory_space<vmem>>, vector<1x8x128xf32>
    %125 = vector.shape_cast %124 : vector<1x8x128xf32> to vector<8x128xf32>
    %126 = arith.truncf %122 : vector<8x32xf32> to vector<8x32xbf16>
    %cst_55 = arith.constant dense<0.000000e+00> : vector<8x128xf32>
    %127 = tpu.matmul %126, %121, %cst_55 {dimension_numbers = #tpu.dot_dimension_numbers<[1], [0], [0], [1], [0, 0, 1, 1], [], []>} : vector<8x32xbf16>, vector<32x128xbf16>, vector<8x128xf32> -> vector<8x128xf32>
    %128 = arith.addf %125, %127 : vector<8x128xf32>
    %129 = vector.extract_strided_slice %128 {offsets = [0, 0], sizes = [8, 96], strides = [1, 1]} : vector<8x128xf32> to vector<8x96xf32>
    %130 = arith.negf %129 : vector<8x96xf32>
    %131 = math.exp %130 : vector<8x96xf32>
    %cst_56 = arith.constant 1.000000e+00 : f32
    %132 = vector.broadcast %cst_56 : f32 to vector<8x96xf32>
    %133 = arith.addf %132, %131 : vector<8x96xf32>
    %134 = arith.divf %132, %133 : vector<8x96xf32>
    %135 = vector.extract_strided_slice %134 {offsets = [0, 0], sizes = [8, 32], strides = [1, 1]} : vector<8x96xf32> to vector<8x32xf32>
    %136 = vector.extract_strided_slice %134 {offsets = [0, 32], sizes = [8, 32], strides = [1, 1]} : vector<8x96xf32> to vector<8x32xf32>
    %137 = vector.extract_strided_slice %134 {offsets = [0, 64], sizes = [8, 32], strides = [1, 1]} : vector<8x96xf32> to vector<8x32xf32>
    %138 = vector.extract_strided_slice %128 {offsets = [0, 96], sizes = [8, 32], strides = [1, 1]} : vector<8x128xf32> to vector<8x32xf32>
    %139 = math.tanh %138 : vector<8x32xf32>
    %140 = arith.mulf %136, %123 : vector<8x32xf32>
    %141 = arith.mulf %135, %139 : vector<8x32xf32>
    %142 = arith.addf %140, %141 : vector<8x32xf32>
    %143 = math.tanh %142 : vector<8x32xf32>
    %144 = arith.mulf %137, %143 : vector<8x32xf32>
    %145 = vector.extract_strided_slice %144 {offsets = [0, 0], sizes = [8, 16], strides = [1, 1]} : vector<8x32xf32> to vector<8x16xf32>
    %c0_57 = arith.constant 0 : index
    %c0_58 = arith.constant 0 : index
    %c0_59 = arith.constant 0 : index
    %146 = vector.load %arg15[%c0_57, %c0_58, %c0_59] : memref<10x8x32xf32, #tpu.memory_space<vmem>>, vector<1x8x16xf32>
    %147 = vector.shape_cast %146 : vector<1x8x16xf32> to vector<8x16xf32>
    %148 = vector.shape_cast %145 : vector<8x16xf32> to vector<1x8x16xf32>
    tpu.vector_store %arg15[%c0_57, %c0_58, %c0_59], %148 {strides = array<i32>} : memref<10x8x32xf32, #tpu.memory_space<vmem>>, vector<1x8x16xf32>,
    %149 = vector.extract_strided_slice %144 {offsets = [0, 16], sizes = [8, 16], strides = [1, 1]} : vector<8x32xf32> to vector<8x16xf32>
    %c9_60 = arith.constant 9 : index
    %c0_61 = arith.constant 0 : index
    %c16 = arith.constant 16 : index
    %150 = vector.load %arg15[%c9_60, %c0_61, %c16] : memref<10x8x32xf32, #tpu.memory_space<vmem>>, vector<1x8x16xf32>
    %151 = vector.shape_cast %150 : vector<1x8x16xf32> to vector<8x16xf32>
    %152 = vector.shape_cast %149 : vector<8x16xf32> to vector<1x8x16xf32>
    tpu.vector_store %arg15[%c9_60, %c0_61, %c16], %152 {strides = array<i32>} : memref<10x8x32xf32, #tpu.memory_space<vmem>>, vector<1x8x16xf32>,
    %c1_62 = arith.constant 1 : index
    %c0_63 = arith.constant 0 : index
    %c0_64 = arith.constant 0 : index
    %153 = vector.load %arg14[%c1_62, %c0_63, %c0_64] : memref<10x8x128xf32, #tpu.memory_space<vmem>>, vector<1x8x128xf32>
    %154 = vector.shape_cast %153 : vector<1x8x128xf32> to vector<8x128xf32>
    %155 = arith.truncf %144 : vector<8x32xf32> to vector<8x32xbf16>
    %cst_65 = arith.constant dense<0.000000e+00> : vector<8x128xf32>
    %156 = tpu.matmul %155, %121, %cst_65 {dimension_numbers = #tpu.dot_dimension_numbers<[1], [0], [0], [1], [0, 0, 1, 1], [], []>} : vector<8x32xbf16>, vector<32x128xbf16>, vector<8x128xf32> -> vector<8x128xf32>
    %157 = arith.addf %154, %156 : vector<8x128xf32>
    %158 = vector.extract_strided_slice %157 {offsets = [0, 0], sizes = [8, 96], strides = [1, 1]} : vector<8x128xf32> to vector<8x96xf32>
    %159 = arith.negf %158 : vector<8x96xf32>
    %160 = math.exp %159 : vector<8x96xf32>
    %cst_66 = arith.constant 1.000000e+00 : f32
    %161 = vector.broadcast %cst_66 : f32 to vector<8x96xf32>
    %162 = arith.addf %161, %160 : vector<8x96xf32>
    %163 = arith.divf %161, %162 : vector<8x96xf32>
    %164 = vector.extract_strided_slice %163 {offsets = [0, 0], sizes = [8, 32], strides = [1, 1]} : vector<8x96xf32> to vector<8x32xf32>
    %165 = vector.extract_strided_slice %163 {offsets = [0, 32], sizes = [8, 32], strides = [1, 1]} : vector<8x96xf32> to vector<8x32xf32>
    %166 = vector.extract_strided_slice %163 {offsets = [0, 64], sizes = [8, 32], strides = [1, 1]} : vector<8x96xf32> to vector<8x32xf32>
    %167 = vector.extract_strided_slice %157 {offsets = [0, 96], sizes = [8, 32], strides = [1, 1]} : vector<8x128xf32> to vector<8x32xf32>
    %168 = math.tanh %167 : vector<8x32xf32>
    %169 = arith.mulf %165, %142 : vector<8x32xf32>
    %170 = arith.mulf %164, %168 : vector<8x32xf32>
    %171 = arith.addf %169, %170 : vector<8x32xf32>
    %172 = math.tanh %171 : vector<8x32xf32>
    %173 = arith.mulf %166, %172 : vector<8x32xf32>
    %174 = vector.extract_strided_slice %173 {offsets = [0, 0], sizes = [8, 16], strides = [1, 1]} : vector<8x32xf32> to vector<8x16xf32>
    %c1_67 = arith.constant 1 : index
    %c0_68 = arith.constant 0 : index
    %c0_69 = arith.constant 0 : index
    %175 = vector.load %arg15[%c1_67, %c0_68, %c0_69] : memref<10x8x32xf32, #tpu.memory_space<vmem>>, vector<1x8x16xf32>
    %176 = vector.shape_cast %175 : vector<1x8x16xf32> to vector<8x16xf32>
    %177 = vector.shape_cast %174 : vector<8x16xf32> to vector<1x8x16xf32>
    tpu.vector_store %arg15[%c1_67, %c0_68, %c0_69], %177 {strides = array<i32>} : memref<10x8x32xf32, #tpu.memory_space<vmem>>, vector<1x8x16xf32>,
    %178 = vector.extract_strided_slice %173 {offsets = [0, 16], sizes = [8, 16], strides = [1, 1]} : vector<8x32xf32> to vector<8x16xf32>
    %c8_70 = arith.constant 8 : index
    %c0_71 = arith.constant 0 : index
    %c16_72 = arith.constant 16 : index
    %179 = vector.load %arg15[%c8_70, %c0_71, %c16_72] : memref<10x8x32xf32, #tpu.memory_space<vmem>>, vector<1x8x16xf32>
    %180 = vector.shape_cast %179 : vector<1x8x16xf32> to vector<8x16xf32>
    %181 = vector.shape_cast %178 : vector<8x16xf32> to vector<1x8x16xf32>
    tpu.vector_store %arg15[%c8_70, %c0_71, %c16_72], %181 {strides = array<i32>} : memref<10x8x32xf32, #tpu.memory_space<vmem>>, vector<1x8x16xf32>,
    %c2_73 = arith.constant 2 : index
    %c0_74 = arith.constant 0 : index
    %c0_75 = arith.constant 0 : index
    %182 = vector.load %arg14[%c2_73, %c0_74, %c0_75] : memref<10x8x128xf32, #tpu.memory_space<vmem>>, vector<1x8x128xf32>
    %183 = vector.shape_cast %182 : vector<1x8x128xf32> to vector<8x128xf32>
    %184 = arith.truncf %173 : vector<8x32xf32> to vector<8x32xbf16>
    %cst_76 = arith.constant dense<0.000000e+00> : vector<8x128xf32>
    %185 = tpu.matmul %184, %121, %cst_76 {dimension_numbers = #tpu.dot_dimension_numbers<[1], [0], [0], [1], [0, 0, 1, 1], [], []>} : vector<8x32xbf16>, vector<32x128xbf16>, vector<8x128xf32> -> vector<8x128xf32>
    %186 = arith.addf %183, %185 : vector<8x128xf32>
    %187 = vector.extract_strided_slice %186 {offsets = [0, 0], sizes = [8, 96], strides = [1, 1]} : vector<8x128xf32> to vector<8x96xf32>
    %188 = arith.negf %187 : vector<8x96xf32>
    %189 = math.exp %188 : vector<8x96xf32>
    %cst_77 = arith.constant 1.000000e+00 : f32
    %190 = vector.broadcast %cst_77 : f32 to vector<8x96xf32>
    %191 = arith.addf %190, %189 : vector<8x96xf32>
    %192 = arith.divf %190, %191 : vector<8x96xf32>
    %193 = vector.extract_strided_slice %192 {offsets = [0, 0], sizes = [8, 32], strides = [1, 1]} : vector<8x96xf32> to vector<8x32xf32>
    %194 = vector.extract_strided_slice %192 {offsets = [0, 32], sizes = [8, 32], strides = [1, 1]} : vector<8x96xf32> to vector<8x32xf32>
    %195 = vector.extract_strided_slice %192 {offsets = [0, 64], sizes = [8, 32], strides = [1, 1]} : vector<8x96xf32> to vector<8x32xf32>
    %196 = vector.extract_strided_slice %186 {offsets = [0, 96], sizes = [8, 32], strides = [1, 1]} : vector<8x128xf32> to vector<8x32xf32>
    %197 = math.tanh %196 : vector<8x32xf32>
    %198 = arith.mulf %194, %171 : vector<8x32xf32>
    %199 = arith.mulf %193, %197 : vector<8x32xf32>
    %200 = arith.addf %198, %199 : vector<8x32xf32>
    %201 = math.tanh %200 : vector<8x32xf32>
    %202 = arith.mulf %195, %201 : vector<8x32xf32>
    %203 = vector.extract_strided_slice %202 {offsets = [0, 0], sizes = [8, 16], strides = [1, 1]} : vector<8x32xf32> to vector<8x16xf32>
    %c2_78 = arith.constant 2 : index
    %c0_79 = arith.constant 0 : index
    %c0_80 = arith.constant 0 : index
    %204 = vector.load %arg15[%c2_78, %c0_79, %c0_80] : memref<10x8x32xf32, #tpu.memory_space<vmem>>, vector<1x8x16xf32>
    %205 = vector.shape_cast %204 : vector<1x8x16xf32> to vector<8x16xf32>
    %206 = vector.shape_cast %203 : vector<8x16xf32> to vector<1x8x16xf32>
    tpu.vector_store %arg15[%c2_78, %c0_79, %c0_80], %206 {strides = array<i32>} : memref<10x8x32xf32, #tpu.memory_space<vmem>>, vector<1x8x16xf32>,
    %207 = vector.extract_strided_slice %202 {offsets = [0, 16], sizes = [8, 16], strides = [1, 1]} : vector<8x32xf32> to vector<8x16xf32>
    %c7_81 = arith.constant 7 : index
    %c0_82 = arith.constant 0 : index
    %c16_83 = arith.constant 16 : index
    %208 = vector.load %arg15[%c7_81, %c0_82, %c16_83] : memref<10x8x32xf32, #tpu.memory_space<vmem>>, vector<1x8x16xf32>
    %209 = vector.shape_cast %208 : vector<1x8x16xf32> to vector<8x16xf32>
    %210 = vector.shape_cast %207 : vector<8x16xf32> to vector<1x8x16xf32>
    tpu.vector_store %arg15[%c7_81, %c0_82, %c16_83], %210 {strides = array<i32>} : memref<10x8x32xf32, #tpu.memory_space<vmem>>, vector<1x8x16xf32>,
    %c3_84 = arith.constant 3 : index
    %c0_85 = arith.constant 0 : index
    %c0_86 = arith.constant 0 : index
    %211 = vector.load %arg14[%c3_84, %c0_85, %c0_86] : memref<10x8x128xf32, #tpu.memory_space<vmem>>, vector<1x8x128xf32>
    %212 = vector.shape_cast %211 : vector<1x8x128xf32> to vector<8x128xf32>
    %213 = arith.truncf %202 : vector<8x32xf32> to vector<8x32xbf16>
    %cst_87 = arith.constant dense<0.000000e+00> : vector<8x128xf32>
    %214 = tpu.matmul %213, %121, %cst_87 {dimension_numbers = #tpu.dot_dimension_numbers<[1], [0], [0], [1], [0, 0, 1, 1], [], []>} : vector<8x32xbf16>, vector<32x128xbf16>, vector<8x128xf32> -> vector<8x128xf32>
    %215 = arith.addf %212, %214 : vector<8x128xf32>
    %216 = vector.extract_strided_slice %215 {offsets = [0, 0], sizes = [8, 96], strides = [1, 1]} : vector<8x128xf32> to vector<8x96xf32>
    %217 = arith.negf %216 : vector<8x96xf32>
    %218 = math.exp %217 : vector<8x96xf32>
    %cst_88 = arith.constant 1.000000e+00 : f32
    %219 = vector.broadcast %cst_88 : f32 to vector<8x96xf32>
    %220 = arith.addf %219, %218 : vector<8x96xf32>
    %221 = arith.divf %219, %220 : vector<8x96xf32>
    %222 = vector.extract_strided_slice %221 {offsets = [0, 0], sizes = [8, 32], strides = [1, 1]} : vector<8x96xf32> to vector<8x32xf32>
    %223 = vector.extract_strided_slice %221 {offsets = [0, 32], sizes = [8, 32], strides = [1, 1]} : vector<8x96xf32> to vector<8x32xf32>
    %224 = vector.extract_strided_slice %221 {offsets = [0, 64], sizes = [8, 32], strides = [1, 1]} : vector<8x96xf32> to vector<8x32xf32>
    %225 = vector.extract_strided_slice %215 {offsets = [0, 96], sizes = [8, 32], strides = [1, 1]} : vector<8x128xf32> to vector<8x32xf32>
    %226 = math.tanh %225 : vector<8x32xf32>
    %227 = arith.mulf %223, %200 : vector<8x32xf32>
    %228 = arith.mulf %222, %226 : vector<8x32xf32>
    %229 = arith.addf %227, %228 : vector<8x32xf32>
    %230 = math.tanh %229 : vector<8x32xf32>
    %231 = arith.mulf %224, %230 : vector<8x32xf32>
    %232 = vector.extract_strided_slice %231 {offsets = [0, 0], sizes = [8, 16], strides = [1, 1]} : vector<8x32xf32> to vector<8x16xf32>
    %c3_89 = arith.constant 3 : index
    %c0_90 = arith.constant 0 : index
    %c0_91 = arith.constant 0 : index
    %233 = vector.load %arg15[%c3_89, %c0_90, %c0_91] : memref<10x8x32xf32, #tpu.memory_space<vmem>>, vector<1x8x16xf32>
    %234 = vector.shape_cast %233 : vector<1x8x16xf32> to vector<8x16xf32>
    %235 = vector.shape_cast %232 : vector<8x16xf32> to vector<1x8x16xf32>
    tpu.vector_store %arg15[%c3_89, %c0_90, %c0_91], %235 {strides = array<i32>} : memref<10x8x32xf32, #tpu.memory_space<vmem>>, vector<1x8x16xf32>,
    %236 = vector.extract_strided_slice %231 {offsets = [0, 16], sizes = [8, 16], strides = [1, 1]} : vector<8x32xf32> to vector<8x16xf32>
    %c6_92 = arith.constant 6 : index
    %c0_93 = arith.constant 0 : index
    %c16_94 = arith.constant 16 : index
    %237 = vector.load %arg15[%c6_92, %c0_93, %c16_94] : memref<10x8x32xf32, #tpu.memory_space<vmem>>, vector<1x8x16xf32>
    %238 = vector.shape_cast %237 : vector<1x8x16xf32> to vector<8x16xf32>
    %239 = vector.shape_cast %236 : vector<8x16xf32> to vector<1x8x16xf32>
    tpu.vector_store %arg15[%c6_92, %c0_93, %c16_94], %239 {strides = array<i32>} : memref<10x8x32xf32, #tpu.memory_space<vmem>>, vector<1x8x16xf32>,
    %c4_95 = arith.constant 4 : index
    %c0_96 = arith.constant 0 : index
    %c0_97 = arith.constant 0 : index
    %240 = vector.load %arg14[%c4_95, %c0_96, %c0_97] : memref<10x8x128xf32, #tpu.memory_space<vmem>>, vector<1x8x128xf32>
    %241 = vector.shape_cast %240 : vector<1x8x128xf32> to vector<8x128xf32>
    %242 = arith.truncf %231 : vector<8x32xf32> to vector<8x32xbf16>
    %cst_98 = arith.constant dense<0.000000e+00> : vector<8x128xf32>
    %243 = tpu.matmul %242, %121, %cst_98 {dimension_numbers = #tpu.dot_dimension_numbers<[1], [0], [0], [1], [0, 0, 1, 1], [], []>} : vector<8x32xbf16>, vector<32x128xbf16>, vector<8x128xf32> -> vector<8x128xf32>
    %244 = arith.addf %241, %243 : vector<8x128xf32>
    %245 = vector.extract_strided_slice %244 {offsets = [0, 0], sizes = [8, 96], strides = [1, 1]} : vector<8x128xf32> to vector<8x96xf32>
    %246 = arith.negf %245 : vector<8x96xf32>
    %247 = math.exp %246 : vector<8x96xf32>
    %cst_99 = arith.constant 1.000000e+00 : f32
    %248 = vector.broadcast %cst_99 : f32 to vector<8x96xf32>
    %249 = arith.addf %248, %247 : vector<8x96xf32>
    %250 = arith.divf %248, %249 : vector<8x96xf32>
    %251 = vector.extract_strided_slice %250 {offsets = [0, 0], sizes = [8, 32], strides = [1, 1]} : vector<8x96xf32> to vector<8x32xf32>
    %252 = vector.extract_strided_slice %250 {offsets = [0, 32], sizes = [8, 32], strides = [1, 1]} : vector<8x96xf32> to vector<8x32xf32>
    %253 = vector.extract_strided_slice %250 {offsets = [0, 64], sizes = [8, 32], strides = [1, 1]} : vector<8x96xf32> to vector<8x32xf32>
    %254 = vector.extract_strided_slice %244 {offsets = [0, 96], sizes = [8, 32], strides = [1, 1]} : vector<8x128xf32> to vector<8x32xf32>
    %255 = math.tanh %254 : vector<8x32xf32>
    %256 = arith.mulf %252, %229 : vector<8x32xf32>
    %257 = arith.mulf %251, %255 : vector<8x32xf32>
    %258 = arith.addf %256, %257 : vector<8x32xf32>
    %259 = math.tanh %258 : vector<8x32xf32>
    %260 = arith.mulf %253, %259 : vector<8x32xf32>
    %261 = vector.extract_strided_slice %260 {offsets = [0, 0], sizes = [8, 16], strides = [1, 1]} : vector<8x32xf32> to vector<8x16xf32>
    %c4_100 = arith.constant 4 : index
    %c0_101 = arith.constant 0 : index
    %c0_102 = arith.constant 0 : index
    %262 = vector.load %arg15[%c4_100, %c0_101, %c0_102] : memref<10x8x32xf32, #tpu.memory_space<vmem>>, vector<1x8x16xf32>
    %263 = vector.shape_cast %262 : vector<1x8x16xf32> to vector<8x16xf32>
    %264 = vector.shape_cast %261 : vector<8x16xf32> to vector<1x8x16xf32>
    tpu.vector_store %arg15[%c4_100, %c0_101, %c0_102], %264 {strides = array<i32>} : memref<10x8x32xf32, #tpu.memory_space<vmem>>, vector<1x8x16xf32>,
    %265 = vector.extract_strided_slice %260 {offsets = [0, 16], sizes = [8, 16], strides = [1, 1]} : vector<8x32xf32> to vector<8x16xf32>
    %c5_103 = arith.constant 5 : index
    %c0_104 = arith.constant 0 : index
    %c16_105 = arith.constant 16 : index
    %266 = vector.load %arg15[%c5_103, %c0_104, %c16_105] : memref<10x8x32xf32, #tpu.memory_space<vmem>>, vector<1x8x16xf32>
    %267 = vector.shape_cast %266 : vector<1x8x16xf32> to vector<8x16xf32>
    %268 = vector.shape_cast %265 : vector<8x16xf32> to vector<1x8x16xf32>
    tpu.vector_store %arg15[%c5_103, %c0_104, %c16_105], %268 {strides = array<i32>} : memref<10x8x32xf32, #tpu.memory_space<vmem>>, vector<1x8x16xf32>,
    %c5_106 = arith.constant 5 : index
    %c0_107 = arith.constant 0 : index
    %c0_108 = arith.constant 0 : index
    %269 = vector.load %arg14[%c5_106, %c0_107, %c0_108] : memref<10x8x128xf32, #tpu.memory_space<vmem>>, vector<1x8x128xf32>
    %270 = vector.shape_cast %269 : vector<1x8x128xf32> to vector<8x128xf32>
    %271 = arith.truncf %260 : vector<8x32xf32> to vector<8x32xbf16>
    %cst_109 = arith.constant dense<0.000000e+00> : vector<8x128xf32>
    %272 = tpu.matmul %271, %121, %cst_109 {dimension_numbers = #tpu.dot_dimension_numbers<[1], [0], [0], [1], [0, 0, 1, 1], [], []>} : vector<8x32xbf16>, vector<32x128xbf16>, vector<8x128xf32> -> vector<8x128xf32>
    %273 = arith.addf %270, %272 : vector<8x128xf32>
    %274 = vector.extract_strided_slice %273 {offsets = [0, 0], sizes = [8, 96], strides = [1, 1]} : vector<8x128xf32> to vector<8x96xf32>
    %275 = arith.negf %274 : vector<8x96xf32>
    %276 = math.exp %275 : vector<8x96xf32>
    %cst_110 = arith.constant 1.000000e+00 : f32
    %277 = vector.broadcast %cst_110 : f32 to vector<8x96xf32>
    %278 = arith.addf %277, %276 : vector<8x96xf32>
    %279 = arith.divf %277, %278 : vector<8x96xf32>
    %280 = vector.extract_strided_slice %279 {offsets = [0, 0], sizes = [8, 32], strides = [1, 1]} : vector<8x96xf32> to vector<8x32xf32>
    %281 = vector.extract_strided_slice %279 {offsets = [0, 32], sizes = [8, 32], strides = [1, 1]} : vector<8x96xf32> to vector<8x32xf32>
    %282 = vector.extract_strided_slice %279 {offsets = [0, 64], sizes = [8, 32], strides = [1, 1]} : vector<8x96xf32> to vector<8x32xf32>
    %283 = vector.extract_strided_slice %273 {offsets = [0, 96], sizes = [8, 32], strides = [1, 1]} : vector<8x128xf32> to vector<8x32xf32>
    %284 = math.tanh %283 : vector<8x32xf32>
    %285 = arith.mulf %281, %258 : vector<8x32xf32>
    %286 = arith.mulf %280, %284 : vector<8x32xf32>
    %287 = arith.addf %285, %286 : vector<8x32xf32>
    %288 = math.tanh %287 : vector<8x32xf32>
    %289 = arith.mulf %282, %288 : vector<8x32xf32>
    %290 = vector.extract_strided_slice %289 {offsets = [0, 0], sizes = [8, 16], strides = [1, 1]} : vector<8x32xf32> to vector<8x16xf32>
    %c5_111 = arith.constant 5 : index
    %c0_112 = arith.constant 0 : index
    %c0_113 = arith.constant 0 : index
    %291 = vector.load %arg15[%c5_111, %c0_112, %c0_113] : memref<10x8x32xf32, #tpu.memory_space<vmem>>, vector<1x8x16xf32>
    %292 = vector.shape_cast %291 : vector<1x8x16xf32> to vector<8x16xf32>
    %293 = vector.shape_cast %290 : vector<8x16xf32> to vector<1x8x16xf32>
    tpu.vector_store %arg15[%c5_111, %c0_112, %c0_113], %293 {strides = array<i32>} : memref<10x8x32xf32, #tpu.memory_space<vmem>>, vector<1x8x16xf32>,
    %294 = vector.extract_strided_slice %289 {offsets = [0, 16], sizes = [8, 16], strides = [1, 1]} : vector<8x32xf32> to vector<8x16xf32>
    %c4_114 = arith.constant 4 : index
    %c0_115 = arith.constant 0 : index
    %c16_116 = arith.constant 16 : index
    %295 = vector.load %arg15[%c4_114, %c0_115, %c16_116] : memref<10x8x32xf32, #tpu.memory_space<vmem>>, vector<1x8x16xf32>
    %296 = vector.shape_cast %295 : vector<1x8x16xf32> to vector<8x16xf32>
    %297 = vector.shape_cast %294 : vector<8x16xf32> to vector<1x8x16xf32>
    tpu.vector_store %arg15[%c4_114, %c0_115, %c16_116], %297 {strides = array<i32>} : memref<10x8x32xf32, #tpu.memory_space<vmem>>, vector<1x8x16xf32>,
    %c6_117 = arith.constant 6 : index
    %c0_118 = arith.constant 0 : index
    %c0_119 = arith.constant 0 : index
    %298 = vector.load %arg14[%c6_117, %c0_118, %c0_119] : memref<10x8x128xf32, #tpu.memory_space<vmem>>, vector<1x8x128xf32>
    %299 = vector.shape_cast %298 : vector<1x8x128xf32> to vector<8x128xf32>
    %300 = arith.truncf %289 : vector<8x32xf32> to vector<8x32xbf16>
    %cst_120 = arith.constant dense<0.000000e+00> : vector<8x128xf32>
    %301 = tpu.matmul %300, %121, %cst_120 {dimension_numbers = #tpu.dot_dimension_numbers<[1], [0], [0], [1], [0, 0, 1, 1], [], []>} : vector<8x32xbf16>, vector<32x128xbf16>, vector<8x128xf32> -> vector<8x128xf32>
    %302 = arith.addf %299, %301 : vector<8x128xf32>
    %303 = vector.extract_strided_slice %302 {offsets = [0, 0], sizes = [8, 96], strides = [1, 1]} : vector<8x128xf32> to vector<8x96xf32>
    %304 = arith.negf %303 : vector<8x96xf32>
    %305 = math.exp %304 : vector<8x96xf32>
    %cst_121 = arith.constant 1.000000e+00 : f32
    %306 = vector.broadcast %cst_121 : f32 to vector<8x96xf32>
    %307 = arith.addf %306, %305 : vector<8x96xf32>
    %308 = arith.divf %306, %307 : vector<8x96xf32>
    %309 = vector.extract_strided_slice %308 {offsets = [0, 0], sizes = [8, 32], strides = [1, 1]} : vector<8x96xf32> to vector<8x32xf32>
    %310 = vector.extract_strided_slice %308 {offsets = [0, 32], sizes = [8, 32], strides = [1, 1]} : vector<8x96xf32> to vector<8x32xf32>
    %311 = vector.extract_strided_slice %308 {offsets = [0, 64], sizes = [8, 32], strides = [1, 1]} : vector<8x96xf32> to vector<8x32xf32>
    %312 = vector.extract_strided_slice %302 {offsets = [0, 96], sizes = [8, 32], strides = [1, 1]} : vector<8x128xf32> to vector<8x32xf32>
    %313 = math.tanh %312 : vector<8x32xf32>
    %314 = arith.mulf %310, %287 : vector<8x32xf32>
    %315 = arith.mulf %309, %313 : vector<8x32xf32>
    %316 = arith.addf %314, %315 : vector<8x32xf32>
    %317 = math.tanh %316 : vector<8x32xf32>
    %318 = arith.mulf %311, %317 : vector<8x32xf32>
    %319 = vector.extract_strided_slice %318 {offsets = [0, 0], sizes = [8, 16], strides = [1, 1]} : vector<8x32xf32> to vector<8x16xf32>
    %c6_122 = arith.constant 6 : index
    %c0_123 = arith.constant 0 : index
    %c0_124 = arith.constant 0 : index
    %320 = vector.load %arg15[%c6_122, %c0_123, %c0_124] : memref<10x8x32xf32, #tpu.memory_space<vmem>>, vector<1x8x16xf32>
    %321 = vector.shape_cast %320 : vector<1x8x16xf32> to vector<8x16xf32>
    %322 = vector.shape_cast %319 : vector<8x16xf32> to vector<1x8x16xf32>
    tpu.vector_store %arg15[%c6_122, %c0_123, %c0_124], %322 {strides = array<i32>} : memref<10x8x32xf32, #tpu.memory_space<vmem>>, vector<1x8x16xf32>,
    %323 = vector.extract_strided_slice %318 {offsets = [0, 16], sizes = [8, 16], strides = [1, 1]} : vector<8x32xf32> to vector<8x16xf32>
    %c3_125 = arith.constant 3 : index
    %c0_126 = arith.constant 0 : index
    %c16_127 = arith.constant 16 : index
    %324 = vector.load %arg15[%c3_125, %c0_126, %c16_127] : memref<10x8x32xf32, #tpu.memory_space<vmem>>, vector<1x8x16xf32>
    %325 = vector.shape_cast %324 : vector<1x8x16xf32> to vector<8x16xf32>
    %326 = vector.shape_cast %323 : vector<8x16xf32> to vector<1x8x16xf32>
    tpu.vector_store %arg15[%c3_125, %c0_126, %c16_127], %326 {strides = array<i32>} : memref<10x8x32xf32, #tpu.memory_space<vmem>>, vector<1x8x16xf32>,
    %c7_128 = arith.constant 7 : index
    %c0_129 = arith.constant 0 : index
    %c0_130 = arith.constant 0 : index
    %327 = vector.load %arg14[%c7_128, %c0_129, %c0_130] : memref<10x8x128xf32, #tpu.memory_space<vmem>>, vector<1x8x128xf32>
    %328 = vector.shape_cast %327 : vector<1x8x128xf32> to vector<8x128xf32>
    %329 = arith.truncf %318 : vector<8x32xf32> to vector<8x32xbf16>
    %cst_131 = arith.constant dense<0.000000e+00> : vector<8x128xf32>
    %330 = tpu.matmul %329, %121, %cst_131 {dimension_numbers = #tpu.dot_dimension_numbers<[1], [0], [0], [1], [0, 0, 1, 1], [], []>} : vector<8x32xbf16>, vector<32x128xbf16>, vector<8x128xf32> -> vector<8x128xf32>
    %331 = arith.addf %328, %330 : vector<8x128xf32>
    %332 = vector.extract_strided_slice %331 {offsets = [0, 0], sizes = [8, 96], strides = [1, 1]} : vector<8x128xf32> to vector<8x96xf32>
    %333 = arith.negf %332 : vector<8x96xf32>
    %334 = math.exp %333 : vector<8x96xf32>
    %cst_132 = arith.constant 1.000000e+00 : f32
    %335 = vector.broadcast %cst_132 : f32 to vector<8x96xf32>
    %336 = arith.addf %335, %334 : vector<8x96xf32>
    %337 = arith.divf %335, %336 : vector<8x96xf32>
    %338 = vector.extract_strided_slice %337 {offsets = [0, 0], sizes = [8, 32], strides = [1, 1]} : vector<8x96xf32> to vector<8x32xf32>
    %339 = vector.extract_strided_slice %337 {offsets = [0, 32], sizes = [8, 32], strides = [1, 1]} : vector<8x96xf32> to vector<8x32xf32>
    %340 = vector.extract_strided_slice %337 {offsets = [0, 64], sizes = [8, 32], strides = [1, 1]} : vector<8x96xf32> to vector<8x32xf32>
    %341 = vector.extract_strided_slice %331 {offsets = [0, 96], sizes = [8, 32], strides = [1, 1]} : vector<8x128xf32> to vector<8x32xf32>
    %342 = math.tanh %341 : vector<8x32xf32>
    %343 = arith.mulf %339, %316 : vector<8x32xf32>
    %344 = arith.mulf %338, %342 : vector<8x32xf32>
    %345 = arith.addf %343, %344 : vector<8x32xf32>
    %346 = math.tanh %345 : vector<8x32xf32>
    %347 = arith.mulf %340, %346 : vector<8x32xf32>
    %348 = vector.extract_strided_slice %347 {offsets = [0, 0], sizes = [8, 16], strides = [1, 1]} : vector<8x32xf32> to vector<8x16xf32>
    %c7_133 = arith.constant 7 : index
    %c0_134 = arith.constant 0 : index
    %c0_135 = arith.constant 0 : index
    %349 = vector.load %arg15[%c7_133, %c0_134, %c0_135] : memref<10x8x32xf32, #tpu.memory_space<vmem>>, vector<1x8x16xf32>
    %350 = vector.shape_cast %349 : vector<1x8x16xf32> to vector<8x16xf32>
    %351 = vector.shape_cast %348 : vector<8x16xf32> to vector<1x8x16xf32>
    tpu.vector_store %arg15[%c7_133, %c0_134, %c0_135], %351 {strides = array<i32>} : memref<10x8x32xf32, #tpu.memory_space<vmem>>, vector<1x8x16xf32>,
    %352 = vector.extract_strided_slice %347 {offsets = [0, 16], sizes = [8, 16], strides = [1, 1]} : vector<8x32xf32> to vector<8x16xf32>
    %c2_136 = arith.constant 2 : index
    %c0_137 = arith.constant 0 : index
    %c16_138 = arith.constant 16 : index
    %353 = vector.load %arg15[%c2_136, %c0_137, %c16_138] : memref<10x8x32xf32, #tpu.memory_space<vmem>>, vector<1x8x16xf32>
    %354 = vector.shape_cast %353 : vector<1x8x16xf32> to vector<8x16xf32>
    %355 = vector.shape_cast %352 : vector<8x16xf32> to vector<1x8x16xf32>
    tpu.vector_store %arg15[%c2_136, %c0_137, %c16_138], %355 {strides = array<i32>} : memref<10x8x32xf32, #tpu.memory_space<vmem>>, vector<1x8x16xf32>,
    %c8_139 = arith.constant 8 : index
    %c0_140 = arith.constant 0 : index
    %c0_141 = arith.constant 0 : index
    %356 = vector.load %arg14[%c8_139, %c0_140, %c0_141] : memref<10x8x128xf32, #tpu.memory_space<vmem>>, vector<1x8x128xf32>
    %357 = vector.shape_cast %356 : vector<1x8x128xf32> to vector<8x128xf32>
    %358 = arith.truncf %347 : vector<8x32xf32> to vector<8x32xbf16>
    %cst_142 = arith.constant dense<0.000000e+00> : vector<8x128xf32>
    %359 = tpu.matmul %358, %121, %cst_142 {dimension_numbers = #tpu.dot_dimension_numbers<[1], [0], [0], [1], [0, 0, 1, 1], [], []>} : vector<8x32xbf16>, vector<32x128xbf16>, vector<8x128xf32> -> vector<8x128xf32>
    %360 = arith.addf %357, %359 : vector<8x128xf32>
    %361 = vector.extract_strided_slice %360 {offsets = [0, 0], sizes = [8, 96], strides = [1, 1]} : vector<8x128xf32> to vector<8x96xf32>
    %362 = arith.negf %361 : vector<8x96xf32>
    %363 = math.exp %362 : vector<8x96xf32>
    %cst_143 = arith.constant 1.000000e+00 : f32
    %364 = vector.broadcast %cst_143 : f32 to vector<8x96xf32>
    %365 = arith.addf %364, %363 : vector<8x96xf32>
    %366 = arith.divf %364, %365 : vector<8x96xf32>
    %367 = vector.extract_strided_slice %366 {offsets = [0, 0], sizes = [8, 32], strides = [1, 1]} : vector<8x96xf32> to vector<8x32xf32>
    %368 = vector.extract_strided_slice %366 {offsets = [0, 32], sizes = [8, 32], strides = [1, 1]} : vector<8x96xf32> to vector<8x32xf32>
    %369 = vector.extract_strided_slice %366 {offsets = [0, 64], sizes = [8, 32], strides = [1, 1]} : vector<8x96xf32> to vector<8x32xf32>
    %370 = vector.extract_strided_slice %360 {offsets = [0, 96], sizes = [8, 32], strides = [1, 1]} : vector<8x128xf32> to vector<8x32xf32>
    %371 = math.tanh %370 : vector<8x32xf32>
    %372 = arith.mulf %368, %345 : vector<8x32xf32>
    %373 = arith.mulf %367, %371 : vector<8x32xf32>
    %374 = arith.addf %372, %373 : vector<8x32xf32>
    %375 = math.tanh %374 : vector<8x32xf32>
    %376 = arith.mulf %369, %375 : vector<8x32xf32>
    %377 = vector.extract_strided_slice %376 {offsets = [0, 0], sizes = [8, 16], strides = [1, 1]} : vector<8x32xf32> to vector<8x16xf32>
    %c8_144 = arith.constant 8 : index
    %c0_145 = arith.constant 0 : index
    %c0_146 = arith.constant 0 : index
    %378 = vector.load %arg15[%c8_144, %c0_145, %c0_146] : memref<10x8x32xf32, #tpu.memory_space<vmem>>, vector<1x8x16xf32>
    %379 = vector.shape_cast %378 : vector<1x8x16xf32> to vector<8x16xf32>
    %380 = vector.shape_cast %377 : vector<8x16xf32> to vector<1x8x16xf32>
    tpu.vector_store %arg15[%c8_144, %c0_145, %c0_146], %380 {strides = array<i32>} : memref<10x8x32xf32, #tpu.memory_space<vmem>>, vector<1x8x16xf32>,
    %381 = vector.extract_strided_slice %376 {offsets = [0, 16], sizes = [8, 16], strides = [1, 1]} : vector<8x32xf32> to vector<8x16xf32>
    %c1_147 = arith.constant 1 : index
    %c0_148 = arith.constant 0 : index
    %c16_149 = arith.constant 16 : index
    %382 = vector.load %arg15[%c1_147, %c0_148, %c16_149] : memref<10x8x32xf32, #tpu.memory_space<vmem>>, vector<1x8x16xf32>
    %383 = vector.shape_cast %382 : vector<1x8x16xf32> to vector<8x16xf32>
    %384 = vector.shape_cast %381 : vector<8x16xf32> to vector<1x8x16xf32>
    tpu.vector_store %arg15[%c1_147, %c0_148, %c16_149], %384 {strides = array<i32>} : memref<10x8x32xf32, #tpu.memory_space<vmem>>, vector<1x8x16xf32>,
    %c9_150 = arith.constant 9 : index
    %c0_151 = arith.constant 0 : index
    %c0_152 = arith.constant 0 : index
    %385 = vector.load %arg14[%c9_150, %c0_151, %c0_152] : memref<10x8x128xf32, #tpu.memory_space<vmem>>, vector<1x8x128xf32>
    %386 = vector.shape_cast %385 : vector<1x8x128xf32> to vector<8x128xf32>
    %387 = arith.truncf %376 : vector<8x32xf32> to vector<8x32xbf16>
    %cst_153 = arith.constant dense<0.000000e+00> : vector<8x128xf32>
    %388 = tpu.matmul %387, %121, %cst_153 {dimension_numbers = #tpu.dot_dimension_numbers<[1], [0], [0], [1], [0, 0, 1, 1], [], []>} : vector<8x32xbf16>, vector<32x128xbf16>, vector<8x128xf32> -> vector<8x128xf32>
    %389 = arith.addf %386, %388 : vector<8x128xf32>
    %390 = vector.extract_strided_slice %389 {offsets = [0, 0], sizes = [8, 96], strides = [1, 1]} : vector<8x128xf32> to vector<8x96xf32>
    %391 = arith.negf %390 : vector<8x96xf32>
    %392 = math.exp %391 : vector<8x96xf32>
    %cst_154 = arith.constant 1.000000e+00 : f32
    %393 = vector.broadcast %cst_154 : f32 to vector<8x96xf32>
    %394 = arith.addf %393, %392 : vector<8x96xf32>
    %395 = arith.divf %393, %394 : vector<8x96xf32>
    %396 = vector.extract_strided_slice %395 {offsets = [0, 0], sizes = [8, 32], strides = [1, 1]} : vector<8x96xf32> to vector<8x32xf32>
    %397 = vector.extract_strided_slice %395 {offsets = [0, 32], sizes = [8, 32], strides = [1, 1]} : vector<8x96xf32> to vector<8x32xf32>
    %398 = vector.extract_strided_slice %395 {offsets = [0, 64], sizes = [8, 32], strides = [1, 1]} : vector<8x96xf32> to vector<8x32xf32>
    %399 = vector.extract_strided_slice %389 {offsets = [0, 96], sizes = [8, 32], strides = [1, 1]} : vector<8x128xf32> to vector<8x32xf32>
    %400 = math.tanh %399 : vector<8x32xf32>
    %401 = arith.mulf %397, %374 : vector<8x32xf32>
    %402 = arith.mulf %396, %400 : vector<8x32xf32>
    %403 = arith.addf %401, %402 : vector<8x32xf32>
    %404 = math.tanh %403 : vector<8x32xf32>
    %405 = arith.mulf %398, %404 : vector<8x32xf32>
    %406 = vector.extract_strided_slice %405 {offsets = [0, 0], sizes = [8, 16], strides = [1, 1]} : vector<8x32xf32> to vector<8x16xf32>
    %c9_155 = arith.constant 9 : index
    %c0_156 = arith.constant 0 : index
    %c0_157 = arith.constant 0 : index
    %407 = vector.load %arg15[%c9_155, %c0_156, %c0_157] : memref<10x8x32xf32, #tpu.memory_space<vmem>>, vector<1x8x16xf32>
    %408 = vector.shape_cast %407 : vector<1x8x16xf32> to vector<8x16xf32>
    %409 = vector.shape_cast %406 : vector<8x16xf32> to vector<1x8x16xf32>
    tpu.vector_store %arg15[%c9_155, %c0_156, %c0_157], %409 {strides = array<i32>} : memref<10x8x32xf32, #tpu.memory_space<vmem>>, vector<1x8x16xf32>,
    %410 = vector.extract_strided_slice %405 {offsets = [0, 16], sizes = [8, 16], strides = [1, 1]} : vector<8x32xf32> to vector<8x16xf32>
    %c0_158 = arith.constant 0 : index
    %c0_159 = arith.constant 0 : index
    %c16_160 = arith.constant 16 : index
    %411 = vector.load %arg15[%c0_158, %c0_159, %c16_160] : memref<10x8x32xf32, #tpu.memory_space<vmem>>, vector<1x8x16xf32>
    %412 = vector.shape_cast %411 : vector<1x8x16xf32> to vector<8x16xf32>
    %413 = vector.shape_cast %410 : vector<8x16xf32> to vector<1x8x16xf32>
    tpu.vector_store %arg15[%c0_158, %c0_159, %c16_160], %413 {strides = array<i32>} : memref<10x8x32xf32, #tpu.memory_space<vmem>>, vector<1x8x16xf32>,
    %c0_161 = arith.constant 0 : index
    %c0_162 = arith.constant 0 : index
    %c0_163 = arith.constant 0 : index
    %414 = vector.load %arg15[%c0_161, %c0_162, %c0_163] : memref<10x8x32xf32, #tpu.memory_space<vmem>>, vector<10x8x32xf32>
    %c0_164 = arith.constant 0 : index
    %c0_165 = arith.constant 0 : index
    %c0_166 = arith.constant 0 : index
    %415 = vector.load %arg13[%c0_164, %c0_165, %c0_166] : memref<10x8x32xf32, #tpu.memory_space<vmem>>, vector<10x8x32xf32>
    %416 = arith.addf %414, %415 : vector<10x8x32xf32>
    %417 = vector.shape_cast %416 : vector<10x8x32xf32> to vector<80x32xf32>
    %418 = arith.truncf %417 : vector<80x32xf32> to vector<80x32xbf16>
    %c0_167 = arith.constant 0 : index
    %c0_168 = arith.constant 0 : index
    %419 = vector.load %arg7[%c0_167, %c0_168] : memref<32x128xbf16, #tpu.memory_space<vmem>>, vector<32x128xbf16>
    %cst_169 = arith.constant dense<0.000000e+00> : vector<80x128xf32>
    %420 = tpu.matmul %418, %419, %cst_169 {dimension_numbers = #tpu.dot_dimension_numbers<[1], [0], [0], [1], [0, 0, 1, 1], [], []>} : vector<80x32xbf16>, vector<32x128xbf16>, vector<80x128xf32> -> vector<80x128xf32>
    %c0_170 = arith.constant 0 : index
    %c0_171 = arith.constant 0 : index
    %421 = vector.load %arg9[%c0_170, %c0_171] : memref<1x128xf32, #tpu.memory_space<vmem>>, vector<1x128xf32>
    %422 = vector.broadcast %421 : vector<1x128xf32> to vector<80x128xf32>
    %423 = arith.addf %420, %422 : vector<80x128xf32>
    %424 = vector.shape_cast %423 : vector<80x128xf32> to vector<10x8x128xf32>
    %c0_172 = arith.constant 0 : index
    %c0_173 = arith.constant 0 : index
    %c0_174 = arith.constant 0 : index
    %425 = vector.load %arg14[%c0_172, %c0_173, %c0_174] : memref<10x8x128xf32, #tpu.memory_space<vmem>>, vector<10x8x128xf32>
    tpu.vector_store %arg14[%c0_172, %c0_173, %c0_174], %424 {strides = array<i32>} : memref<10x8x128xf32, #tpu.memory_space<vmem>>, vector<10x8x128xf32>,
    %c0_175 = arith.constant 0 : index
    %c0_176 = arith.constant 0 : index
    %426 = vector.load %arg8[%c0_175, %c0_176] : memref<32x128xbf16, #tpu.memory_space<vmem>>, vector<32x128xbf16>
    %cst_177 = arith.constant 0.000000e+00 : f32
    %427 = vector.broadcast %cst_177 : f32 to vector<8x32xf32>
    %cst_178 = arith.constant 0.000000e+00 : f32
    %428 = vector.broadcast %cst_178 : f32 to vector<8x32xf32>
    %cst_179 = arith.constant 0xFF800000 : f32
    %429 = vector.broadcast %cst_179 : f32 to vector<8x32xf32>
    %c0_180 = arith.constant 0 : index
    %c0_181 = arith.constant 0 : index
    %c0_182 = arith.constant 0 : index
    %430 = vector.load %arg14[%c0_180, %c0_181, %c0_182] : memref<10x8x128xf32, #tpu.memory_space<vmem>>, vector<1x8x128xf32>
    %431 = vector.shape_cast %430 : vector<1x8x128xf32> to vector<8x128xf32>
    %432 = arith.truncf %427 : vector<8x32xf32> to vector<8x32xbf16>
    %cst_183 = arith.constant dense<0.000000e+00> : vector<8x128xf32>
    %433 = tpu.matmul %432, %426, %cst_183 {dimension_numbers = #tpu.dot_dimension_numbers<[1], [0], [0], [1], [0, 0, 1, 1], [], []>} : vector<8x32xbf16>, vector<32x128xbf16>, vector<8x128xf32> -> vector<8x128xf32>
    %434 = arith.addf %431, %433 : vector<8x128xf32>
    %435 = vector.extract_strided_slice %434 {offsets = [0, 0], sizes = [8, 96], strides = [1, 1]} : vector<8x128xf32> to vector<8x96xf32>
    %436 = arith.negf %435 : vector<8x96xf32>
    %437 = math.exp %436 : vector<8x96xf32>
    %cst_184 = arith.constant 1.000000e+00 : f32
    %438 = vector.broadcast %cst_184 : f32 to vector<8x96xf32>
    %439 = arith.addf %438, %437 : vector<8x96xf32>
    %440 = arith.divf %438, %439 : vector<8x96xf32>
    %441 = vector.extract_strided_slice %440 {offsets = [0, 0], sizes = [8, 32], strides = [1, 1]} : vector<8x96xf32> to vector<8x32xf32>
    %442 = vector.extract_strided_slice %440 {offsets = [0, 32], sizes = [8, 32], strides = [1, 1]} : vector<8x96xf32> to vector<8x32xf32>
    %443 = vector.extract_strided_slice %440 {offsets = [0, 64], sizes = [8, 32], strides = [1, 1]} : vector<8x96xf32> to vector<8x32xf32>
    %444 = vector.extract_strided_slice %434 {offsets = [0, 96], sizes = [8, 32], strides = [1, 1]} : vector<8x128xf32> to vector<8x32xf32>
    %445 = math.tanh %444 : vector<8x32xf32>
    %446 = arith.mulf %442, %428 : vector<8x32xf32>
    %447 = arith.mulf %441, %445 : vector<8x32xf32>
    %448 = arith.addf %446, %447 : vector<8x32xf32>
    %449 = math.tanh %448 : vector<8x32xf32>
    %450 = arith.mulf %443, %449 : vector<8x32xf32>
    %451 = arith.maximumf %429, %450 : vector<8x32xf32>
    %c1_185 = arith.constant 1 : index
    %c0_186 = arith.constant 0 : index
    %c0_187 = arith.constant 0 : index
    %452 = vector.load %arg14[%c1_185, %c0_186, %c0_187] : memref<10x8x128xf32, #tpu.memory_space<vmem>>, vector<1x8x128xf32>
    %453 = vector.shape_cast %452 : vector<1x8x128xf32> to vector<8x128xf32>
    %454 = arith.truncf %450 : vector<8x32xf32> to vector<8x32xbf16>
    %cst_188 = arith.constant dense<0.000000e+00> : vector<8x128xf32>
    %455 = tpu.matmul %454, %426, %cst_188 {dimension_numbers = #tpu.dot_dimension_numbers<[1], [0], [0], [1], [0, 0, 1, 1], [], []>} : vector<8x32xbf16>, vector<32x128xbf16>, vector<8x128xf32> -> vector<8x128xf32>
    %456 = arith.addf %453, %455 : vector<8x128xf32>
    %457 = vector.extract_strided_slice %456 {offsets = [0, 0], sizes = [8, 96], strides = [1, 1]} : vector<8x128xf32> to vector<8x96xf32>
    %458 = arith.negf %457 : vector<8x96xf32>
    %459 = math.exp %458 : vector<8x96xf32>
    %cst_189 = arith.constant 1.000000e+00 : f32
    %460 = vector.broadcast %cst_189 : f32 to vector<8x96xf32>
    %461 = arith.addf %460, %459 : vector<8x96xf32>
    %462 = arith.divf %460, %461 : vector<8x96xf32>
    %463 = vector.extract_strided_slice %462 {offsets = [0, 0], sizes = [8, 32], strides = [1, 1]} : vector<8x96xf32> to vector<8x32xf32>
    %464 = vector.extract_strided_slice %462 {offsets = [0, 32], sizes = [8, 32], strides = [1, 1]} : vector<8x96xf32> to vector<8x32xf32>
    %465 = vector.extract_strided_slice %462 {offsets = [0, 64], sizes = [8, 32], strides = [1, 1]} : vector<8x96xf32> to vector<8x32xf32>
    %466 = vector.extract_strided_slice %456 {offsets = [0, 96], sizes = [8, 32], strides = [1, 1]} : vector<8x128xf32> to vector<8x32xf32>
    %467 = math.tanh %466 : vector<8x32xf32>
    %468 = arith.mulf %464, %448 : vector<8x32xf32>
    %469 = arith.mulf %463, %467 : vector<8x32xf32>
    %470 = arith.addf %468, %469 : vector<8x32xf32>
    %471 = math.tanh %470 : vector<8x32xf32>
    %472 = arith.mulf %465, %471 : vector<8x32xf32>
    %473 = arith.maximumf %451, %472 : vector<8x32xf32>
    %c2_190 = arith.constant 2 : index
    %c0_191 = arith.constant 0 : index
    %c0_192 = arith.constant 0 : index
    %474 = vector.load %arg14[%c2_190, %c0_191, %c0_192] : memref<10x8x128xf32, #tpu.memory_space<vmem>>, vector<1x8x128xf32>
    %475 = vector.shape_cast %474 : vector<1x8x128xf32> to vector<8x128xf32>
    %476 = arith.truncf %472 : vector<8x32xf32> to vector<8x32xbf16>
    %cst_193 = arith.constant dense<0.000000e+00> : vector<8x128xf32>
    %477 = tpu.matmul %476, %426, %cst_193 {dimension_numbers = #tpu.dot_dimension_numbers<[1], [0], [0], [1], [0, 0, 1, 1], [], []>} : vector<8x32xbf16>, vector<32x128xbf16>, vector<8x128xf32> -> vector<8x128xf32>
    %478 = arith.addf %475, %477 : vector<8x128xf32>
    %479 = vector.extract_strided_slice %478 {offsets = [0, 0], sizes = [8, 96], strides = [1, 1]} : vector<8x128xf32> to vector<8x96xf32>
    %480 = arith.negf %479 : vector<8x96xf32>
    %481 = math.exp %480 : vector<8x96xf32>
    %cst_194 = arith.constant 1.000000e+00 : f32
    %482 = vector.broadcast %cst_194 : f32 to vector<8x96xf32>
    %483 = arith.addf %482, %481 : vector<8x96xf32>
    %484 = arith.divf %482, %483 : vector<8x96xf32>
    %485 = vector.extract_strided_slice %484 {offsets = [0, 0], sizes = [8, 32], strides = [1, 1]} : vector<8x96xf32> to vector<8x32xf32>
    %486 = vector.extract_strided_slice %484 {offsets = [0, 32], sizes = [8, 32], strides = [1, 1]} : vector<8x96xf32> to vector<8x32xf32>
    %487 = vector.extract_strided_slice %484 {offsets = [0, 64], sizes = [8, 32], strides = [1, 1]} : vector<8x96xf32> to vector<8x32xf32>
    %488 = vector.extract_strided_slice %478 {offsets = [0, 96], sizes = [8, 32], strides = [1, 1]} : vector<8x128xf32> to vector<8x32xf32>
    %489 = math.tanh %488 : vector<8x32xf32>
    %490 = arith.mulf %486, %470 : vector<8x32xf32>
    %491 = arith.mulf %485, %489 : vector<8x32xf32>
    %492 = arith.addf %490, %491 : vector<8x32xf32>
    %493 = math.tanh %492 : vector<8x32xf32>
    %494 = arith.mulf %487, %493 : vector<8x32xf32>
    %495 = arith.maximumf %473, %494 : vector<8x32xf32>
    %c3_195 = arith.constant 3 : index
    %c0_196 = arith.constant 0 : index
    %c0_197 = arith.constant 0 : index
    %496 = vector.load %arg14[%c3_195, %c0_196, %c0_197] : memref<10x8x128xf32, #tpu.memory_space<vmem>>, vector<1x8x128xf32>
    %497 = vector.shape_cast %496 : vector<1x8x128xf32> to vector<8x128xf32>
    %498 = arith.truncf %494 : vector<8x32xf32> to vector<8x32xbf16>
    %cst_198 = arith.constant dense<0.000000e+00> : vector<8x128xf32>
    %499 = tpu.matmul %498, %426, %cst_198 {dimension_numbers = #tpu.dot_dimension_numbers<[1], [0], [0], [1], [0, 0, 1, 1], [], []>} : vector<8x32xbf16>, vector<32x128xbf16>, vector<8x128xf32> -> vector<8x128xf32>
    %500 = arith.addf %497, %499 : vector<8x128xf32>
    %501 = vector.extract_strided_slice %500 {offsets = [0, 0], sizes = [8, 96], strides = [1, 1]} : vector<8x128xf32> to vector<8x96xf32>
    %502 = arith.negf %501 : vector<8x96xf32>
    %503 = math.exp %502 : vector<8x96xf32>
    %cst_199 = arith.constant 1.000000e+00 : f32
    %504 = vector.broadcast %cst_199 : f32 to vector<8x96xf32>
    %505 = arith.addf %504, %503 : vector<8x96xf32>
    %506 = arith.divf %504, %505 : vector<8x96xf32>
    %507 = vector.extract_strided_slice %506 {offsets = [0, 0], sizes = [8, 32], strides = [1, 1]} : vector<8x96xf32> to vector<8x32xf32>
    %508 = vector.extract_strided_slice %506 {offsets = [0, 32], sizes = [8, 32], strides = [1, 1]} : vector<8x96xf32> to vector<8x32xf32>
    %509 = vector.extract_strided_slice %506 {offsets = [0, 64], sizes = [8, 32], strides = [1, 1]} : vector<8x96xf32> to vector<8x32xf32>
    %510 = vector.extract_strided_slice %500 {offsets = [0, 96], sizes = [8, 32], strides = [1, 1]} : vector<8x128xf32> to vector<8x32xf32>
    %511 = math.tanh %510 : vector<8x32xf32>
    %512 = arith.mulf %508, %492 : vector<8x32xf32>
    %513 = arith.mulf %507, %511 : vector<8x32xf32>
    %514 = arith.addf %512, %513 : vector<8x32xf32>
    %515 = math.tanh %514 : vector<8x32xf32>
    %516 = arith.mulf %509, %515 : vector<8x32xf32>
    %517 = arith.maximumf %495, %516 : vector<8x32xf32>
    %c4_200 = arith.constant 4 : index
    %c0_201 = arith.constant 0 : index
    %c0_202 = arith.constant 0 : index
    %518 = vector.load %arg14[%c4_200, %c0_201, %c0_202] : memref<10x8x128xf32, #tpu.memory_space<vmem>>, vector<1x8x128xf32>
    %519 = vector.shape_cast %518 : vector<1x8x128xf32> to vector<8x128xf32>
    %520 = arith.truncf %516 : vector<8x32xf32> to vector<8x32xbf16>
    %cst_203 = arith.constant dense<0.000000e+00> : vector<8x128xf32>
    %521 = tpu.matmul %520, %426, %cst_203 {dimension_numbers = #tpu.dot_dimension_numbers<[1], [0], [0], [1], [0, 0, 1, 1], [], []>} : vector<8x32xbf16>, vector<32x128xbf16>, vector<8x128xf32> -> vector<8x128xf32>
    %522 = arith.addf %519, %521 : vector<8x128xf32>
    %523 = vector.extract_strided_slice %522 {offsets = [0, 0], sizes = [8, 96], strides = [1, 1]} : vector<8x128xf32> to vector<8x96xf32>
    %524 = arith.negf %523 : vector<8x96xf32>
    %525 = math.exp %524 : vector<8x96xf32>
    %cst_204 = arith.constant 1.000000e+00 : f32
    %526 = vector.broadcast %cst_204 : f32 to vector<8x96xf32>
    %527 = arith.addf %526, %525 : vector<8x96xf32>
    %528 = arith.divf %526, %527 : vector<8x96xf32>
    %529 = vector.extract_strided_slice %528 {offsets = [0, 0], sizes = [8, 32], strides = [1, 1]} : vector<8x96xf32> to vector<8x32xf32>
    %530 = vector.extract_strided_slice %528 {offsets = [0, 32], sizes = [8, 32], strides = [1, 1]} : vector<8x96xf32> to vector<8x32xf32>
    %531 = vector.extract_strided_slice %528 {offsets = [0, 64], sizes = [8, 32], strides = [1, 1]} : vector<8x96xf32> to vector<8x32xf32>
    %532 = vector.extract_strided_slice %522 {offsets = [0, 96], sizes = [8, 32], strides = [1, 1]} : vector<8x128xf32> to vector<8x32xf32>
    %533 = math.tanh %532 : vector<8x32xf32>
    %534 = arith.mulf %530, %514 : vector<8x32xf32>
    %535 = arith.mulf %529, %533 : vector<8x32xf32>
    %536 = arith.addf %534, %535 : vector<8x32xf32>
    %537 = math.tanh %536 : vector<8x32xf32>
    %538 = arith.mulf %531, %537 : vector<8x32xf32>
    %539 = arith.maximumf %517, %538 : vector<8x32xf32>
    %c5_205 = arith.constant 5 : index
    %c0_206 = arith.constant 0 : index
    %c0_207 = arith.constant 0 : index
    %540 = vector.load %arg14[%c5_205, %c0_206, %c0_207] : memref<10x8x128xf32, #tpu.memory_space<vmem>>, vector<1x8x128xf32>
    %541 = vector.shape_cast %540 : vector<1x8x128xf32> to vector<8x128xf32>
    %542 = arith.truncf %538 : vector<8x32xf32> to vector<8x32xbf16>
    %cst_208 = arith.constant dense<0.000000e+00> : vector<8x128xf32>
    %543 = tpu.matmul %542, %426, %cst_208 {dimension_numbers = #tpu.dot_dimension_numbers<[1], [0], [0], [1], [0, 0, 1, 1], [], []>} : vector<8x32xbf16>, vector<32x128xbf16>, vector<8x128xf32> -> vector<8x128xf32>
    %544 = arith.addf %541, %543 : vector<8x128xf32>
    %545 = vector.extract_strided_slice %544 {offsets = [0, 0], sizes = [8, 96], strides = [1, 1]} : vector<8x128xf32> to vector<8x96xf32>
    %546 = arith.negf %545 : vector<8x96xf32>
    %547 = math.exp %546 : vector<8x96xf32>
    %cst_209 = arith.constant 1.000000e+00 : f32
    %548 = vector.broadcast %cst_209 : f32 to vector<8x96xf32>
    %549 = arith.addf %548, %547 : vector<8x96xf32>
    %550 = arith.divf %548, %549 : vector<8x96xf32>
    %551 = vector.extract_strided_slice %550 {offsets = [0, 0], sizes = [8, 32], strides = [1, 1]} : vector<8x96xf32> to vector<8x32xf32>
    %552 = vector.extract_strided_slice %550 {offsets = [0, 32], sizes = [8, 32], strides = [1, 1]} : vector<8x96xf32> to vector<8x32xf32>
    %553 = vector.extract_strided_slice %550 {offsets = [0, 64], sizes = [8, 32], strides = [1, 1]} : vector<8x96xf32> to vector<8x32xf32>
    %554 = vector.extract_strided_slice %544 {offsets = [0, 96], sizes = [8, 32], strides = [1, 1]} : vector<8x128xf32> to vector<8x32xf32>
    %555 = math.tanh %554 : vector<8x32xf32>
    %556 = arith.mulf %552, %536 : vector<8x32xf32>
    %557 = arith.mulf %551, %555 : vector<8x32xf32>
    %558 = arith.addf %556, %557 : vector<8x32xf32>
    %559 = math.tanh %558 : vector<8x32xf32>
    %560 = arith.mulf %553, %559 : vector<8x32xf32>
    %561 = arith.maximumf %539, %560 : vector<8x32xf32>
    %c6_210 = arith.constant 6 : index
    %c0_211 = arith.constant 0 : index
    %c0_212 = arith.constant 0 : index
    %562 = vector.load %arg14[%c6_210, %c0_211, %c0_212] : memref<10x8x128xf32, #tpu.memory_space<vmem>>, vector<1x8x128xf32>
    %563 = vector.shape_cast %562 : vector<1x8x128xf32> to vector<8x128xf32>
    %564 = arith.truncf %560 : vector<8x32xf32> to vector<8x32xbf16>
    %cst_213 = arith.constant dense<0.000000e+00> : vector<8x128xf32>
    %565 = tpu.matmul %564, %426, %cst_213 {dimension_numbers = #tpu.dot_dimension_numbers<[1], [0], [0], [1], [0, 0, 1, 1], [], []>} : vector<8x32xbf16>, vector<32x128xbf16>, vector<8x128xf32> -> vector<8x128xf32>
    %566 = arith.addf %563, %565 : vector<8x128xf32>
    %567 = vector.extract_strided_slice %566 {offsets = [0, 0], sizes = [8, 96], strides = [1, 1]} : vector<8x128xf32> to vector<8x96xf32>
    %568 = arith.negf %567 : vector<8x96xf32>
    %569 = math.exp %568 : vector<8x96xf32>
    %cst_214 = arith.constant 1.000000e+00 : f32
    %570 = vector.broadcast %cst_214 : f32 to vector<8x96xf32>
    %571 = arith.addf %570, %569 : vector<8x96xf32>
    %572 = arith.divf %570, %571 : vector<8x96xf32>
    %573 = vector.extract_strided_slice %572 {offsets = [0, 0], sizes = [8, 32], strides = [1, 1]} : vector<8x96xf32> to vector<8x32xf32>
    %574 = vector.extract_strided_slice %572 {offsets = [0, 32], sizes = [8, 32], strides = [1, 1]} : vector<8x96xf32> to vector<8x32xf32>
    %575 = vector.extract_strided_slice %572 {offsets = [0, 64], sizes = [8, 32], strides = [1, 1]} : vector<8x96xf32> to vector<8x32xf32>
    %576 = vector.extract_strided_slice %566 {offsets = [0, 96], sizes = [8, 32], strides = [1, 1]} : vector<8x128xf32> to vector<8x32xf32>
    %577 = math.tanh %576 : vector<8x32xf32>
    %578 = arith.mulf %574, %558 : vector<8x32xf32>
    %579 = arith.mulf %573, %577 : vector<8x32xf32>
    %580 = arith.addf %578, %579 : vector<8x32xf32>
    %581 = math.tanh %580 : vector<8x32xf32>
    %582 = arith.mulf %575, %581 : vector<8x32xf32>
    %583 = arith.maximumf %561, %582 : vector<8x32xf32>
    %c7_215 = arith.constant 7 : index
    %c0_216 = arith.constant 0 : index
    %c0_217 = arith.constant 0 : index
    %584 = vector.load %arg14[%c7_215, %c0_216, %c0_217] : memref<10x8x128xf32, #tpu.memory_space<vmem>>, vector<1x8x128xf32>
    %585 = vector.shape_cast %584 : vector<1x8x128xf32> to vector<8x128xf32>
    %586 = arith.truncf %582 : vector<8x32xf32> to vector<8x32xbf16>
    %cst_218 = arith.constant dense<0.000000e+00> : vector<8x128xf32>
    %587 = tpu.matmul %586, %426, %cst_218 {dimension_numbers = #tpu.dot_dimension_numbers<[1], [0], [0], [1], [0, 0, 1, 1], [], []>} : vector<8x32xbf16>, vector<32x128xbf16>, vector<8x128xf32> -> vector<8x128xf32>
    %588 = arith.addf %585, %587 : vector<8x128xf32>
    %589 = vector.extract_strided_slice %588 {offsets = [0, 0], sizes = [8, 96], strides = [1, 1]} : vector<8x128xf32> to vector<8x96xf32>
    %590 = arith.negf %589 : vector<8x96xf32>
    %591 = math.exp %590 : vector<8x96xf32>
    %cst_219 = arith.constant 1.000000e+00 : f32
    %592 = vector.broadcast %cst_219 : f32 to vector<8x96xf32>
    %593 = arith.addf %592, %591 : vector<8x96xf32>
    %594 = arith.divf %592, %593 : vector<8x96xf32>
    %595 = vector.extract_strided_slice %594 {offsets = [0, 0], sizes = [8, 32], strides = [1, 1]} : vector<8x96xf32> to vector<8x32xf32>
    %596 = vector.extract_strided_slice %594 {offsets = [0, 32], sizes = [8, 32], strides = [1, 1]} : vector<8x96xf32> to vector<8x32xf32>
    %597 = vector.extract_strided_slice %594 {offsets = [0, 64], sizes = [8, 32], strides = [1, 1]} : vector<8x96xf32> to vector<8x32xf32>
    %598 = vector.extract_strided_slice %588 {offsets = [0, 96], sizes = [8, 32], strides = [1, 1]} : vector<8x128xf32> to vector<8x32xf32>
    %599 = math.tanh %598 : vector<8x32xf32>
    %600 = arith.mulf %596, %580 : vector<8x32xf32>
    %601 = arith.mulf %595, %599 : vector<8x32xf32>
    %602 = arith.addf %600, %601 : vector<8x32xf32>
    %603 = math.tanh %602 : vector<8x32xf32>
    %604 = arith.mulf %597, %603 : vector<8x32xf32>
    %605 = arith.maximumf %583, %604 : vector<8x32xf32>
    %c8_220 = arith.constant 8 : index
    %c0_221 = arith.constant 0 : index
    %c0_222 = arith.constant 0 : index
    %606 = vector.load %arg14[%c8_220, %c0_221, %c0_222] : memref<10x8x128xf32, #tpu.memory_space<vmem>>, vector<1x8x128xf32>
    %607 = vector.shape_cast %606 : vector<1x8x128xf32> to vector<8x128xf32>
    %608 = arith.truncf %604 : vector<8x32xf32> to vector<8x32xbf16>
    %cst_223 = arith.constant dense<0.000000e+00> : vector<8x128xf32>
    %609 = tpu.matmul %608, %426, %cst_223 {dimension_numbers = #tpu.dot_dimension_numbers<[1], [0], [0], [1], [0, 0, 1, 1], [], []>} : vector<8x32xbf16>, vector<32x128xbf16>, vector<8x128xf32> -> vector<8x128xf32>
    %610 = arith.addf %607, %609 : vector<8x128xf32>
    %611 = vector.extract_strided_slice %610 {offsets = [0, 0], sizes = [8, 96], strides = [1, 1]} : vector<8x128xf32> to vector<8x96xf32>
    %612 = arith.negf %611 : vector<8x96xf32>
    %613 = math.exp %612 : vector<8x96xf32>
    %cst_224 = arith.constant 1.000000e+00 : f32
    %614 = vector.broadcast %cst_224 : f32 to vector<8x96xf32>
    %615 = arith.addf %614, %613 : vector<8x96xf32>
    %616 = arith.divf %614, %615 : vector<8x96xf32>
    %617 = vector.extract_strided_slice %616 {offsets = [0, 0], sizes = [8, 32], strides = [1, 1]} : vector<8x96xf32> to vector<8x32xf32>
    %618 = vector.extract_strided_slice %616 {offsets = [0, 32], sizes = [8, 32], strides = [1, 1]} : vector<8x96xf32> to vector<8x32xf32>
    %619 = vector.extract_strided_slice %616 {offsets = [0, 64], sizes = [8, 32], strides = [1, 1]} : vector<8x96xf32> to vector<8x32xf32>
    %620 = vector.extract_strided_slice %610 {offsets = [0, 96], sizes = [8, 32], strides = [1, 1]} : vector<8x128xf32> to vector<8x32xf32>
    %621 = math.tanh %620 : vector<8x32xf32>
    %622 = arith.mulf %618, %602 : vector<8x32xf32>
    %623 = arith.mulf %617, %621 : vector<8x32xf32>
    %624 = arith.addf %622, %623 : vector<8x32xf32>
    %625 = math.tanh %624 : vector<8x32xf32>
    %626 = arith.mulf %619, %625 : vector<8x32xf32>
    %627 = arith.maximumf %605, %626 : vector<8x32xf32>
    %c9_225 = arith.constant 9 : index
    %c0_226 = arith.constant 0 : index
    %c0_227 = arith.constant 0 : index
    %628 = vector.load %arg14[%c9_225, %c0_226, %c0_227] : memref<10x8x128xf32, #tpu.memory_space<vmem>>, vector<1x8x128xf32>
    %629 = vector.shape_cast %628 : vector<1x8x128xf32> to vector<8x128xf32>
    %630 = arith.truncf %626 : vector<8x32xf32> to vector<8x32xbf16>
    %cst_228 = arith.constant dense<0.000000e+00> : vector<8x128xf32>
    %631 = tpu.matmul %630, %426, %cst_228 {dimension_numbers = #tpu.dot_dimension_numbers<[1], [0], [0], [1], [0, 0, 1, 1], [], []>} : vector<8x32xbf16>, vector<32x128xbf16>, vector<8x128xf32> -> vector<8x128xf32>
    %632 = arith.addf %629, %631 : vector<8x128xf32>
    %633 = vector.extract_strided_slice %632 {offsets = [0, 0], sizes = [8, 96], strides = [1, 1]} : vector<8x128xf32> to vector<8x96xf32>
    %634 = arith.negf %633 : vector<8x96xf32>
    %635 = math.exp %634 : vector<8x96xf32>
    %cst_229 = arith.constant 1.000000e+00 : f32
    %636 = vector.broadcast %cst_229 : f32 to vector<8x96xf32>
    %637 = arith.addf %636, %635 : vector<8x96xf32>
    %638 = arith.divf %636, %637 : vector<8x96xf32>
    %639 = vector.extract_strided_slice %638 {offsets = [0, 0], sizes = [8, 32], strides = [1, 1]} : vector<8x96xf32> to vector<8x32xf32>
    %640 = vector.extract_strided_slice %638 {offsets = [0, 32], sizes = [8, 32], strides = [1, 1]} : vector<8x96xf32> to vector<8x32xf32>
    %641 = vector.extract_strided_slice %638 {offsets = [0, 64], sizes = [8, 32], strides = [1, 1]} : vector<8x96xf32> to vector<8x32xf32>
    %642 = vector.extract_strided_slice %632 {offsets = [0, 96], sizes = [8, 32], strides = [1, 1]} : vector<8x128xf32> to vector<8x32xf32>
    %643 = math.tanh %642 : vector<8x32xf32>
    %644 = arith.mulf %640, %624 : vector<8x32xf32>
    %645 = arith.mulf %639, %643 : vector<8x32xf32>
    %646 = arith.addf %644, %645 : vector<8x32xf32>
    %647 = math.tanh %646 : vector<8x32xf32>
    %648 = arith.mulf %641, %647 : vector<8x32xf32>
    %649 = arith.maximumf %627, %648 : vector<8x32xf32>
    %c0_230 = arith.constant 0 : index
    %c0_231 = arith.constant 0 : index
    %650 = vector.load %arg10[%c0_230, %c0_231] : memref<1x32xf32, #tpu.memory_space<vmem>>, vector<1x32xf32>
    %651 = vector.broadcast %650 : vector<1x32xf32> to vector<8x32xf32>
    %652 = arith.mulf %649, %651 : vector<8x32xf32>
    %cst_232 = arith.constant dense<0.000000e+00> : vector<8xf32>
    %653 = vector.multi_reduction <add>, %652, %cst_232 [1] : vector<8x32xf32> to vector<8xf32>
    %654 = vector.shape_cast %653 : vector<8xf32> to vector<8x1xf32>
    %c0_233 = arith.constant 0 : index
    %c0_234 = arith.constant 0 : index
    %655 = vector.load %arg11[%c0_233, %c0_234] : memref<1x1xf32, #tpu.memory_space<vmem>>, vector<1x1xf32>
    %656 = vector.broadcast %655 : vector<1x1xf32> to vector<8x1xf32>
    %657 = arith.addf %654, %656 : vector<8x1xf32>
    %658 = arith.negf %657 : vector<8x1xf32>
    %659 = math.exp %658 : vector<8x1xf32>
    %cst_235 = arith.constant 1.000000e+00 : f32
    %660 = vector.broadcast %cst_235 : f32 to vector<8x1xf32>
    %661 = arith.addf %660, %659 : vector<8x1xf32>
    %662 = arith.divf %660, %661 : vector<8x1xf32>
    %c0_236 = arith.constant 0 : index
    %c0_237 = arith.constant 0 : index
    %663 = vector.load %arg12[%c0_236, %c0_237] : memref<8x1xf32, #tpu.memory_space<vmem>>, vector<8x1xf32>
    tpu.vector_store %arg12[%c0_236, %c0_237], %662 {strides = array<i32>} : memref<8x1xf32, #tpu.memory_space<vmem>>, vector<8x1xf32>,
    return
  }
}

</mosaic_0001>

<bundles_post_ra>
// kernel: cnn_rnn_binary_forward.1
= control target key start
LH: loop header
LB: loop body
LE: loop exit
PB: predicated region body
PF: predicated region fallthrough
CT: control target
= control target key end

     0   :  { %v47_v0 = vlaneseq  ;;  %vm393_vm12 = vcmask 261120   ;;  %s2353_s21 = smov 64   ;;  %s2986_s0 = inlined_call_operand.vmem [shape: s32[12,8], index: 0, kind: input, shape index: {}]   ;;  %s2987_s1 = inlined_call_operand.vmem [shape: f32[3,128,32], index: 1, kind: input, shape index: {}]   ;;  %s2988_s2 = inlined_call_operand.vmem [shape: f32[1,32], index: 2, kind: input, shape index: {}]   ;;  %s2989_s3 = inlined_call_operand.vmem [shape: bf16[32,128], index: 3, kind: input, shape index: {}]   ;;  %s2990_s4 = inlined_call_operand.vmem [shape: bf16[32,128], index: 4, kind: input, shape index: {}]   ;;  %s2991_s5 = inlined_call_operand.vmem [shape: f32[1,128], index: 5, kind: input, shape index: {}]   ;;  %s2992_s6 = inlined_call_operand.vmem [shape: bf16[32,128], index: 6, kind: input, shape index: {}]   ;;  %s2993_s8 = inlined_call_operand.vmem [shape: bf16[32,128], index: 8, kind: input, shape index: {}]   ;;  %s2994_s7 = inlined_call_operand.vmem [shape: bf16[32,128], index: 7, kind: input, shape index: {}]   ;;  %s2995_s9 = inlined_call_operand.vmem [shape: f32[1,128], index: 9, kind: input, shape index: {}]   ;;  %s2996_s10 = inlined_call_operand.vmem [shape: f32[1,32], index: 10, kind: input, shape index: {}]   ;;  %s2997_s11 = inlined_call_operand.<no memory space> [shape: f32[1,1], index: 11, kind: input, shape index: {}]   ;;  %s2998_s12 = inlined_call_operand.vmem [shape: f32[8,1], index: 12, kind: output, shape index: {}]  }
   0x1   :  { %v2423_v2 = vld [vmem:[%s2986_s0] sm:$0xff]  ;;  %v2023_v3 = vld [vmem:[%s2987_s1 + $0xf8] sm:$0xff]  ;;  %v2022_v5 = vld [vmem:[%s2987_s1 + $0xf0] sm:$0xff] }
   0x2   :  { %v48_v1 = vshrl.u32 %v47_v0, 7  ;;  %v2059_v4 = vld [vmem:[%s2987_s1 + $0x178] sm:$0xff]  ;;  %201 = vmatpush.msra.mxu0 %v2023_v3  ;;  %v2058_v6 = vld [vmem:[%s2987_s1 + $0x170] sm:$0xff]  ;;  %v2021_v7 = vld [vmem:[%s2987_s1 + $0xe8] sm:$0xff]  ;;  %v60_v9 = vperm.slane %v2423_v2, 2  ;;  %v53_v10 = vperm.slane %v2423_v2, 1 }
   0x3   :  { %312 = vmatpush.msra.mxu2 %v2059_v4  ;;  %v2057_v8 = vld [vmem:[%s2987_s1 + $0x168] sm:$0xff]  ;;  %v183_v11 = vld [vmem:[%s2987_s1 + $0x78] sm:$0xff]  ;;  %v74_v12 = vperm.slane %v2423_v2, 4  ;;  %v182_v13 = vld [vmem:[%s2987_s1 + $0x70] sm:$0xff]  ;;  %v67_v23 = vperm.slane %v2423_v2, 3  ;;  %v46_v24 = vperm.slane %v2423_v2, 0 }
   0x4   :  { %2179 = vset.pattern.permute.xlu1 %v48_v1  ;;  %2178 = vset.pattern.permute.xlu0 %v48_v1  ;;  %v2020_v14 = vld [vmem:[%s2987_s1 + $0xe0] sm:$0xff]  ;;  %v181_v16 = vld [vmem:[%s2987_s1 + $0x68] sm:$0xff]  ;;  %v2019_v17 = vld [vmem:[%s2987_s1 + $0xd8] sm:$0xff]  ;;  %v81_v26 = vperm.slane %v2423_v2, 5  ;;  %v95_v36 = vperm.slane %v2423_v2, 7  ;;  %v88_v37 = vperm.slane %v2423_v2, 6 }
   0x5   :  { %2180 = vset.pattern.permute.xlu2 %v48_v1  ;;  %202 = vmatpush.msra.mxu0 %v2022_v5  ;;  %v2056_v15 = vld [vmem:[%s2987_s1 + $0x160] sm:$0xff]  ;;  %v2055_v18 = vld [vmem:[%s2987_s1 + $0x158] sm:$0xff]  ;;  %v2018_v20 = vld [vmem:[%s2987_s1 + $0xd0] sm:$0xff]  ;;  %v131_v1 = vand.u32 127, %v47_v0  ;;  %v2350_v4 = vmov 1.0  }
   0x6   :  { %313 = vmatpush.msra.mxu2 %v2058_v6  ;;  %248 = vmatpush.msra.mxu1 %v183_v11  ;;  %v180_v19 = vld [vmem:[%s2987_s1 + $0x60] sm:$0xff]  ;;  %v2054_v21 = vld [vmem:[%s2987_s1 + $0x150] sm:$0xff]  ;;  %v179_v22 = vld [vmem:[%s2987_s1 + $0x58] sm:$0xff] }
   0x7   :  { %203 = vmatpush.msra.mxu0 %v2021_v7  ;;  %v2017_v25 = vld [vmem:[%s2987_s1 + $0xc8] sm:$0xff]  ;;  %v2016_v28 = vld [vmem:[%s2987_s1 + $0xc0] sm:$0xff]  ;;  %v178_v29 = vld [vmem:[%s2987_s1 + $0x50] sm:$0xff] }
   0x8   :  { %314 = vmatpush.msra.mxu2 %v2057_v8  ;;  %249 = vmatpush.msra.mxu1 %v182_v13  ;;  %v2053_v27 = vld [vmem:[%s2987_s1 + $0x148] sm:$0xff]  ;;  %v2052_v30 = vld [vmem:[%s2987_s1 + $0x140] sm:$0xff]  ;;  %v2015_v31 = vld [vmem:[%s2987_s1 + $0xb8] sm:$0xff] }
   0x9   :  { %204 = vmatpush.msra.mxu0 %v2020_v14  ;;  %v177_v32 = vld [vmem:[%s2987_s1 + $0x48] sm:$0xff]  ;;  %v2051_v33 = vld [vmem:[%s2987_s1 + $0x138] sm:$0xff]  ;;  %v2014_v34 = vld [vmem:[%s2987_s1 + $0xb0] sm:$0xff] }
   0xa   :  { %315 = vmatpush.msra.mxu2 %v2056_v15  ;;  %250 = vmatpush.msra.mxu1 %v181_v16  ;;  %v176_v35 = vld [vmem:[%s2987_s1 + $0x40] sm:$0xff]  ;;  %v45_v38 = vld [vmem:[%s2986_s0 + $0x8] sm:$0xf]  ;;  %v2050_v39 = vld [vmem:[%s2987_s1 + $0x130] sm:$0xff] }
   0xb   :  { %205 = vmatpush.msra.mxu0 %v2019_v17  ;;  %v102_v40 = vperm.slane %v45_v38, 0  ;;  %v2013_v41 = vld [vmem:[%s2987_s1 + $0xa8] sm:$0xff]  ;;  %v175_v43 = vld [vmem:[%s2987_s1 + $0x38] sm:$0xff]  ;;  %v2012_v44 = vld [vmem:[%s2987_s1 + $0xa0] sm:$0xff]  ;;  %v116_v48 = vperm.slane %v45_v38, 2  ;;  %v109_v49 = vperm.slane %v45_v38, 1 }
   0xc   :  { %65 = vperm.xlu0 %2178, %v60_v9   ;;  %58 = vperm.xlu1 %2179, %v53_v10   ;;  %v2049_v42 = vld [vmem:[%s2987_s1 + $0x128] sm:$0xff]  ;;  %v2048_v45 = vld [vmem:[%s2987_s1 + $0x120] sm:$0xff]  ;;  %v2011_v46 = vld [vmem:[%s2987_s1 + $0x98] sm:$0xff]  ;;  %v123_v50 = vperm.slane %v45_v38, 3 }
   0xd   :  { %79 = vperm.xlu2 %2180, %v74_v12   ;;  %316 = vmatpush.msra.mxu2 %v2055_v18  ;;  %v2047_v47 = vld [vmem:[%s2987_s1 + $0x118] sm:$0xff]  ;;  %v2010_v51 = vld [vmem:[%s2987_s1 + $0x90] sm:$0xff]  ;;  %v2009_v54 = vld [vmem:[%s2987_s1 + $0x88] sm:$0xff] }
   0xe   :  { %251 = vmatpush.msra.mxu1 %v180_v19  ;;  %206 = vmatpush.msra.mxu0 %v2018_v20  ;;  %v174_v52 = vld [vmem:[%s2987_s1 + $0x30] sm:$0xff]  ;;  %v173_v55 = vld [vmem:[%s2987_s1 + $0x28] sm:$0xff]  ;;  %v2008_v57 = vld [vmem:[%s2987_s1 + $0x80] sm:$0xff] }
   0xf   :  { %317 = vmatpush.msra.mxu2 %v2054_v21  ;;  %v2046_v53 = vld [vmem:[%s2987_s1 + $0x110] sm:$0xff]  ;;  %v2045_v56 = vld [vmem:[%s2987_s1 + $0x108] sm:$0xff]  ;;  %v172_v58 = vld [vmem:[%s2987_s1 + $0x20] sm:$0xff] }
  0x10   :  { %252 = vmatpush.msra.mxu1 %v179_v22  ;;  %207 = vmatpush.msra.mxu0 %v2017_v25  ;;  %v2044_v59 = vld [vmem:[%s2987_s1 + $0x100] sm:$0xff]  ;;  %v171_v60 = vld [vmem:[%s2987_s1 + $0x18] sm:$0xff]  ;;  %v170_v61 = vld [vmem:[%s2987_s1 + $0x10] sm:$0xff] }
  0x11   :  { %318 = vmatpush.msra.mxu2 %v2053_v27  ;;  %v169_v62 = vld [vmem:[%s2987_s1 + $0x8] sm:$0xff]  ;;  %v168_v63 = vld [vmem:[%s2987_s1] sm:$0xff] }
  0x12   :  { %208 = vmatpush.msra.mxu0 %v2016_v28  ;;  %253 = vmatpush.msra.mxu1 %v178_v29  ;;  %v2165_v14 = vld [vmem:[%s2989_s3 + $0x8] sm:$0xff]  ;;  %v2164_v15 = vld [vmem:[%s2989_s3] sm:$0xff] }
  0x13   :  { %319 = vmatpush.msra.mxu2 %v2052_v30  ;;  %450 = vmatpush.bf16.msra.mxu3 %v2165_v14  ;;  %v2167_v17 = vld [vmem:[%s2990_s4 + $0x8] sm:$0xff]  ;;  %v2614_v22 = vld [vmem:[%s2988_s2] ss:$0 sm:$0xff] }
  0x14   :  { %72 = vperm.xlu1 %2179, %v67_v23   ;;  %51 = vperm.xlu0 %2178, %v46_v24  }
  0x15   :  { %86 = vperm.xlu2 %2180, %v81_v26   ;;  %209 = vmatpush.msra.mxu0 %v2015_v31 }
  0x16   :  { %254 = vmatpush.msra.mxu1 %v177_v32  ;;  %320 = vmatpush.msra.mxu2 %v2051_v33 }
  0x17   :  { %210 = vmatpush.msra.mxu0 %v2014_v34  ;;  %451 = vmatpush.bf16.msra.mxu3 %v2164_v15 }
  0x18   :  { %255 = vmatpush.msra.mxu1 %v176_v35  ;;  %321 = vmatpush.msra.mxu2 %v2050_v39 }
  0x19   :  { %211 = vmatpush.msra.mxu0 %v2013_v41 }
  0x1a   :  { %322 = vmatpush.msra.mxu2 %v2049_v42  ;;  %256 = vmatpush.msra.mxu1 %v175_v43 }
  0x1b   :  { %212 = vmatpush.msra.mxu0 %v2012_v44  ;;  %500 = vmatpush.bf16.msrb.mxu3 %v2167_v17 }
  0x1c   :  { %100 = vperm.xlu1 %2179, %v95_v36   ;;  %93 = vperm.xlu0 %2178, %v88_v37  }
  0x1d   :  { %107 = vperm.xlu2 %2180, %v102_v40   ;;  %323 = vmatpush.msra.mxu2 %v2048_v45 }
  0x1e   :  { %213 = vmatpush.msra.mxu0 %v2011_v46  ;;  %257 = vmatpush.msra.mxu1 %v174_v52 }
  0x1f   :  { %324 = vmatpush.msra.mxu2 %v2047_v47 }
  0x20   :  { %214 = vmatpush.msra.mxu0 %v2010_v51  ;;  %258 = vmatpush.msra.mxu1 %v173_v55 }
  0x21   :  { %325 = vmatpush.msra.mxu2 %v2046_v53  ;;  %v2166_v53 = vld [vmem:[%s2990_s4] sm:$0xff] }
  0x22   :  { %215 = vmatpush.msra.mxu0 %v2009_v54  ;;  %259 = vmatpush.msra.mxu1 %v172_v58 }
  0x23   :  { %326 = vmatpush.msra.mxu2 %v2045_v56  ;;  %501 = vmatpush.bf16.msrb.mxu3 %v2166_v53 }
  0x24   :  { %121 = vperm.xlu1 %2179, %v116_v48   ;;  %114 = vperm.xlu0 %2178, %v109_v49  }
  0x25   :  { %128 = vperm.xlu2 %2180, %v123_v50   ;;  %216 = vmatpush.msra.mxu0 %v2008_v57 }
  0x26   :  { %327 = vmatpush.msra.mxu2 %v2044_v59  ;;  %260 = vmatpush.msra.mxu1 %v171_v60 }
  0x28   :  { %261 = vmatpush.msra.mxu1 %v170_v61 }
  0x2a   :  { %262 = vmatpush.msra.mxu1 %v169_v62 }
  0x2c   :  { %263 = vmatpush.msra.mxu1 %v168_v63 }
  0x67   :  { %v80_v7 = vpop.permute.xlu2 %79 }
  0x68   :  { %vm136_vm4 = vcmp.eq.s32.totalorder %v80_v7, %v131_v1 }
  0x6f   :  { %v87_v0 = vpop.permute.xlu2 %86 }
  0x70   :  { %vm137_vm5 = vcmp.eq.s32.totalorder %v87_v0, %v131_v1 }
  0x77   :  { %v108_v10 = vpop.permute.xlu2 %107 }
  0x78   :  { %vm140_vm8 = vcmp.eq.s32.totalorder %v108_v10, %v131_v1 }
  0x7e   :  { %v66_v2 = vpop.permute.xlu0 %65  ;;  %v59_v3 = vpop.permute.xlu1 %58 }
  0x7f   :  { %vm134_vm0 = vcmp.eq.s32.totalorder %v66_v2, %v131_v1  ;;  %vm133_vm1 = vcmp.eq.s32.totalorder %v59_v3, %v131_v1  ;;  %v129_v13 = vpop.permute.xlu2 %128 }
  0x80   :  { %2024 = vmatmul.msk.f32.vlgmr.msra.gmra.mxu0 %vm133_vm1, %v2350_v4  ;;  %2060 = vmatmul.msk.f32.vlgmr.msra.gmra.mxu2 %vm134_vm0, %v2350_v4  ;;  %vm143_vm11 = vcmp.eq.s32.totalorder %v129_v13, %v131_v1 }
  0x86   :  { %v73_v5 = vpop.permute.xlu1 %72  ;;  %v52_v6 = vpop.permute.xlu0 %51 }
  0x87   :  { %vm135_vm2 = vcmp.eq.s32.totalorder %v73_v5, %v131_v1  ;;  %vm132_vm3 = vcmp.eq.s32.totalorder %v52_v6, %v131_v1 }
  0x88   :  { %2025 = vmatmul.msk.f32.gmra.mxu0 %vm134_vm0, %v2350_v4  ;;  %2034 = vmatmul.msk.f32.vlgmr.msra.gmra.mxu1 %vm132_vm3, %v2350_v4 }
  0x89   :  { %2061 = vmatmul.msk.f32.gmra.mxu2 %vm135_vm2, %v2350_v4 }
  0x8e   :  { %v94_v8 = vpop.permute.xlu0 %93  ;;  %v101_v9 = vpop.permute.xlu1 %100 }
  0x8f   :  { %vm138_vm6 = vcmp.eq.s32.totalorder %v94_v8, %v131_v1  ;;  %vm139_vm7 = vcmp.eq.s32.totalorder %v101_v9, %v131_v1 }
  0x90   :  { %2026 = vmatmul.msk.f32.gmra.mxu0 %vm135_vm2, %v2350_v4  ;;  %2035 = vmatmul.msk.f32.gmra.mxu1 %vm133_vm1, %v2350_v4 }
  0x91   :  { %2062 = vmatmul.msk.f32.gmra.mxu2 %vm136_vm4, %v2350_v4 }
  0x96   :  { %v115_v11 = vpop.permute.xlu0 %114  ;;  %v122_v12 = vpop.permute.xlu1 %121 }
  0x97   :  { %vm141_vm9 = vcmp.eq.s32.totalorder %v115_v11, %v131_v1  ;;  %vm142_vm10 = vcmp.eq.s32.totalorder %v122_v12, %v131_v1 }
  0x98   :  { %2027 = vmatmul.msk.f32.gmra.mxu0 %vm136_vm4, %v2350_v4  ;;  %2036 = vmatmul.msk.f32.gmra.mxu1 %vm134_vm0, %v2350_v4 }
  0x99   :  { %2063 = vmatmul.msk.f32.gmra.mxu2 %vm137_vm5, %v2350_v4 }
  0xa0   :  { %2028 = vmatmul.msk.f32.gmra.mxu0 %vm137_vm5, %v2350_v4  ;;  %2037 = vmatmul.msk.f32.gmra.mxu1 %vm135_vm2, %v2350_v4 }
  0xa1   :  { %2064 = vmatmul.msk.f32.gmra.mxu2 %vm138_vm6, %v2350_v4 }
  0xa8   :  { %2029 = vmatmul.msk.f32.gmra.mxu0 %vm138_vm6, %v2350_v4  ;;  %2038 = vmatmul.msk.f32.gmra.mxu1 %vm136_vm4, %v2350_v4 }
  0xa9   :  { %2065 = vmatmul.msk.f32.gmra.mxu2 %vm139_vm7, %v2350_v4 }
  0xb0   :  { %2030 = vmatmul.msk.f32.gmra.mxu0 %vm139_vm7, %v2350_v4  ;;  %2039 = vmatmul.msk.f32.gmra.mxu1 %vm137_vm5, %v2350_v4 }
  0xb1   :  { %2066 = vmatmul.msk.f32.gmra.mxu2 %vm140_vm8, %v2350_v4 }
  0xb8   :  { %2031 = vmatmul.msk.f32.gmra.mxu0 %vm140_vm8, %v2350_v4  ;;  %2040 = vmatmul.msk.f32.gmra.mxu1 %vm138_vm6, %v2350_v4 }
  0xb9   :  { %2067 = vmatmul.msk.f32.gmra.mxu2 %vm141_vm9, %v2350_v4 }
  0xc0   :  { %2032 = vmatmul.msk.f32.gmra.mxu0 %vm141_vm9, %v2350_v4  ;;  %2041 = vmatmul.msk.f32.gmra.mxu1 %vm139_vm7, %v2350_v4 }
  0xc1   :  { %2068 = vmatmul.msk.f32.gmra.mxu2 %vm142_vm10, %v2350_v4 }
  0xc8   :  { %2033 = vmatmul.msk.f32.gmra.mxu0 %vm142_vm10, %v2350_v4  ;;  %2042 = vmatmul.msk.f32.gmra.mxu1 %vm140_vm8, %v2350_v4 }
  0xc9   :  { %2069 = vmatmul.msk.f32.gmra.mxu2 %vm143_vm11, %v2350_v4 }
  0xd0   :  { %2043 = vmatmul.msk.f32.gmra.mxu1 %vm141_vm9, %v2350_v4 }
  0xfd   :  { %v218_v16 = vpop.f32.mrf.mxu0 }
 0x103   :  { %v329_v18 = vpop.f32.mrf.mxu2 }
 0x105   :  { %v221_v19 = vpop.f32.mrf.mxu0  ;;  %v265_v20 = vpop.f32.mrf.mxu1 }
 0x106   :  { %v266_v21 = vadd.f32 %v265_v20, %v218_v16  ;;  %v2648_v20 = vld [vmem:[%s2992_s6 + $0x8] sm:$0xff] }
 0x107   :  { %583 = vmatpush.bf16.msrb.mxu0 %v2648_v20  ;;  %718 = vmatpush.bf16.msrb.mxu2 %v2648_v20 }
 0x108   :  { %v359_v23 = vadd.f32 %v329_v18, %v266_v21  ;;  %852 = vmatpush.bf16.msrb.mxu1 %v2648_v20 }
 0x10a   :  { %v373_v24 = vadd.f32 %v2614_v22, %v359_v23 }
 0x10c   :  { %v383_v25 = vmax.f32 %v373_v24, 0.0  ;;  %v332_v26 = vpop.f32.mrf.mxu2 }
 0x10d   :  { %v224_v27 = vpop.f32.mrf.mxu0  ;;  %v268_v28 = vpop.f32.mrf.mxu1 }
 0x10e   :  { %394 = vst.msk [vmem:[#allocation2] sm:$0xff] %vm393_vm12, %v383_v25  ;;  %v269_v29 = vadd.f32 %v268_v28, %v221_v19 }
 0x110   :  { %v360_v30 = vadd.f32 %v332_v26, %v269_v29 }
 0x112   :  { %v374_v31 = vadd.f32 %v2614_v22, %v360_v30 }
 0x114   :  { %v384_v32 = vmax.f32 %v374_v31, 0.0  ;;  %v335_v33 = vpop.f32.mrf.mxu2 }
 0x115   :  { %v227_v34 = vpop.f32.mrf.mxu0  ;;  %v271_v35 = vpop.f32.mrf.mxu1 }
 0x116   :  { %395 = vst.msk [vmem:[#allocation2 + $0x8] sm:$0xff] %vm393_vm12, %v384_v32  ;;  %v272_v36 = vadd.f32 %v271_v35, %v224_v27  ;;  %v2620_v37 = vpack.c.bf16 %v384_v32, %v383_v25  ;;  %v2664_v32 = vld [vmem:[%s2992_s6] sm:$0xff] }
 0x117   :  { %584 = vmatpush.bf16.msrb.mxu0 %v2664_v32  ;;  %719 = vmatpush.bf16.msrb.mxu2 %v2664_v32 }
 0x118   :  { %v361_v38 = vadd.f32 %v335_v33, %v272_v36  ;;  %2078 = vmatmul.msk.bf16.vlgmr.msra.gmra.mxu3 %vm393_vm12, %v2620_v37  ;;  %853 = vmatpush.bf16.msrb.mxu1 %v2664_v32 }
 0x119   :  { %651 = vmatpush.bf16.msra.mxu3 %v2648_v20 }
 0x11a   :  { %v375_v39 = vadd.f32 %v2614_v22, %v361_v38 }
 0x11b   :  { %785 = vmatpush.bf16.msra.mxu0 %v2648_v20  ;;  %919 = vmatpush.bf16.msra.mxu2 %v2648_v20 }
 0x11c   :  { %v385_v40 = vmax.f32 %v375_v39, 0.0  ;;  %v338_v41 = vpop.f32.mrf.mxu2  ;;  %1049 = vmatpush.bf16.msra.mxu1 %v2648_v20 }
 0x11d   :  { %v230_v42 = vpop.f32.mrf.mxu0  ;;  %v274_v43 = vpop.f32.mrf.mxu1  ;;  %652 = vmatpush.bf16.msra.mxu3 %v2664_v32 }
 0x11e   :  { %396 = vst.msk [vmem:[#allocation2 + $0x10] sm:$0xff] %vm393_vm12, %v385_v40  ;;  %v275_v44 = vadd.f32 %v274_v43, %v227_v34  ;;  %v2691_v43 = vld [vmem:[%s2991_s5] ss:$0 sm:$0xff]  ;;  %s2352_s5 = smov 32  }
 0x11f   :  { %786 = vmatpush.bf16.msra.mxu0 %v2664_v32  ;;  %920 = vmatpush.bf16.msra.mxu2 %v2664_v32 }
 0x120   :  { %v362_v45 = vadd.f32 %v338_v41, %v275_v44  ;;  %1050 = vmatpush.bf16.msra.mxu1 %v2664_v32 }
 0x122   :  { %v376_v46 = vadd.f32 %v2614_v22, %v362_v45 }
 0x124   :  { %v386_v47 = vmax.f32 %v376_v46, 0.0  ;;  %v341_v48 = vpop.f32.mrf.mxu2 }
 0x125   :  { %v233_v49 = vpop.f32.mrf.mxu0  ;;  %v277_v50 = vpop.f32.mrf.mxu1 }
 0x126   :  { %397 = vst.msk [vmem:[#allocation2 + $0x18] sm:$0xff] %vm393_vm12, %v386_v47  ;;  %v278_v51 = vadd.f32 %v277_v50, %v230_v42  ;;  %v2628_v52 = vpack.c.bf16 %v386_v47, %v385_v40 }
 0x128   :  { %v363_v54 = vadd.f32 %v341_v48, %v278_v51  ;;  %2079 = vmatmul.msk.bf16.gmra.mxu3 %vm393_vm12, %v2628_v52 }
 0x12a   :  { %v377_v55 = vadd.f32 %v2614_v22, %v363_v54 }
 0x12c   :  { %v387_v56 = vmax.f32 %v377_v55, 0.0  ;;  %v344_v57 = vpop.f32.mrf.mxu2 }
 0x12d   :  { %v280_v58 = vpop.f32.mrf.mxu1  ;;  %v236_v60 = vpop.f32.mrf.mxu0 }
 0x12e   :  { %398 = vst.msk [vmem:[#allocation2 + $0x20] sm:$0xff] %vm393_vm12, %v387_v56  ;;  %v281_v59 = vadd.f32 %v280_v58, %v233_v49 }
 0x130   :  { %v364_v61 = vadd.f32 %v344_v57, %v281_v59 }
 0x132   :  { %v378_v62 = vadd.f32 %v2614_v22, %v364_v61 }
 0x134   :  { %v388_v63 = vmax.f32 %v378_v62, 0.0  ;;  %v347_v1 = vpop.f32.mrf.mxu2 }
 0x135   :  { %v283_v2 = vpop.f32.mrf.mxu1  ;;  %v239_v6 = vpop.f32.mrf.mxu0 }
 0x136   :  { %399 = vst.msk [vmem:[#allocation2 + $0x28] sm:$0xff] %vm393_vm12, %v388_v63  ;;  %v284_v3 = vadd.f32 %v283_v2, %v236_v60  ;;  %v406_v4 = vpack.c.bf16 %v388_v63, %v387_v56 }
 0x138   :  { %v365_v5 = vadd.f32 %v347_v1, %v284_v3  ;;  %2080 = vmatmul.msk.bf16.gmra.mxu3 %vm393_vm12, %v406_v4 }
 0x13a   :  { %v379_v7 = vadd.f32 %v2614_v22, %v365_v5 }
 0x13c   :  { %v389_v0 = vmax.f32 %v379_v7, 0.0  ;;  %v350_v8 = vpop.f32.mrf.mxu2 }
 0x13d   :  { %v286_v9 = vpop.f32.mrf.mxu1  ;;  %v242_v13 = vpop.f32.mrf.mxu0 }
 0x13e   :  { %400 = vst.msk [vmem:[#allocation2 + $0x30] sm:$0xff] %vm393_vm12, %v389_v0  ;;  %v287_v10 = vadd.f32 %v286_v9, %v239_v6 }
 0x140   :  { %v366_v11 = vadd.f32 %v350_v8, %v287_v10 }
 0x142   :  { %v380_v12 = vadd.f32 %v2614_v22, %v366_v11 }
 0x144   :  { %v390_v14 = vmax.f32 %v380_v12, 0.0  ;;  %v353_v15 = vpop.f32.mrf.mxu2 }
 0x145   :  { %v289_v16 = vpop.f32.mrf.mxu1  ;;  %v245_v24 = vpop.f32.mrf.mxu0 }
 0x146   :  { %401 = vst.msk [vmem:[#allocation2 + $0x38] sm:$0xff] %vm393_vm12, %v390_v14  ;;  %v290_v17 = vadd.f32 %v289_v16, %v242_v13  ;;  %v407_v18 = vpack.c.bf16 %v390_v14, %v389_v0 }
 0x148   :  { %v367_v19 = vadd.f32 %v353_v15, %v290_v17  ;;  %2081 = vmatmul.msk.bf16.gmra.mxu3 %vm393_vm12, %v407_v18 }
 0x14a   :  { %v381_v21 = vadd.f32 %v2614_v22, %v367_v19 }
 0x14c   :  { %v391_v23 = vmax.f32 %v381_v21, 0.0  ;;  %v356_v27 = vpop.f32.mrf.mxu2 }
 0x14d   :  { %v292_v25 = vpop.f32.mrf.mxu1 }
 0x14e   :  { %402 = vst.msk [vmem:[#allocation2 + $0x40] sm:$0xff] %vm393_vm12, %v391_v23  ;;  %v293_v26 = vadd.f32 %v292_v25, %v245_v24 }
 0x150   :  { %v368_v28 = vadd.f32 %v356_v27, %v293_v26 }
 0x152   :  { %v382_v29 = vadd.f32 %v2614_v22, %v368_v28  ;;  %v2351_v22 = vmov 0  }
 0x153   :  { %585 = vmatmul.bf16.vlgmr.msrb.gmra.mxu0 %v2351_v22 }
 0x154   :  { %v392_v30 = vmax.f32 %v382_v29, 0.0  ;;  %984 = vmatpush.bf16.msrb.mxu0 %v2648_v20 }
 0x156   :  { %403 = vst.msk [vmem:[#allocation2 + $0x48] sm:$0xff] %vm393_vm12, %v392_v30  ;;  %v408_v31 = vpack.c.bf16 %v392_v30, %v391_v23 }
 0x158   :  { %2082 = vmatmul.msk.bf16.gmra.mxu3 %vm393_vm12, %v408_v31  ;;  %985 = vmatpush.bf16.msrb.mxu0 %v2664_v32 }
 0x168   :  { %2091 = vmatmul.msk.bf16.vlgmr.msrb.gmra.mxu3 %vm393_vm12, %v2620_v37 }
 0x178   :  { %2092 = vmatmul.msk.bf16.gmra.mxu3 %vm393_vm12, %v2628_v52 }
 0x188   :  { %2093 = vmatmul.msk.bf16.gmra.mxu3 %vm393_vm12, %v406_v4 }
 0x198   :  { %2094 = vmatmul.msk.bf16.gmra.mxu3 %vm393_vm12, %v407_v18 }
 0x19b   :  { %v453_v33 = vpop.f32.mrf.mxu3 }
 0x19c   :  { %v454_v6 = vadd.f32 %v2691_v43, %v453_v33 }
 0x1a3   :  { %v2683_v34 = vpop.f32.mrf.mxu3 }
 0x1a8   :  { %2095 = vmatmul.msk.bf16.gmra.mxu3 %vm393_vm12, %v408_v31 }
 0x1ab   :  { %v458_v35 = vpop.f32.mrf.mxu3 }
 0x1ac   :  { %v459_v2 = vadd.f32 %v2691_v43, %v458_v35 }
 0x1b3   :  { %v2686_v36 = vpop.f32.mrf.mxu3 }
 0x1bb   :  { %v463_v37 = vpop.f32.mrf.mxu3 }
 0x1bc   :  { %v464_v60 = vadd.f32 %v2691_v43, %v463_v37 }
 0x1c3   :  { %v465_v38 = vpop.f32.mrf.mxu3 }
 0x1c4   :  { %v466_v56 = vadd.f32 %v2691_v43, %v465_v38  ;;  %v456_v38 = vadd.f32 %v2691_v43, %v2683_v34 }
 0x1cb   :  { %v468_v39 = vpop.f32.mrf.mxu3 }
 0x1cc   :  { %v469_v53 = vadd.f32 %v2691_v43, %v468_v39 }
 0x1d0   :  { %v586_v59 = vpop.f32.mrf.mxu0 }
 0x1d3   :  { %v470_v40 = vpop.f32.mrf.mxu3 }
 0x1d4   :  { %v471_v50 = vadd.f32 %v2691_v43, %v470_v40 }
 0x1d8   :  { %v588_v63 = vpop.f32.mrf.mxu0 }
 0x1db   :  { %v473_v41 = vpop.f32.mrf.mxu3 }
 0x1dc   :  { %v474_v47 = vadd.f32 %v2691_v43, %v473_v41 }
 0x1e3   :  { %v475_v42 = vpop.f32.mrf.mxu3 }
 0x1e4   :  { %v476_v44 = vadd.f32 %v2691_v43, %v475_v42 }
 0x1eb   :  { %v503_v45 = vpop.f32.mrf.mxu3 }
 0x1ec   :  { %v2694_v46 = vadd.f32 %v503_v45, %v476_v44 }
 0x1f3   :  { %v505_v48 = vpop.f32.mrf.mxu3 }
 0x1f4   :  { %v2697_v49 = vadd.f32 %v505_v48, %v474_v47 }
 0x1fb   :  { %v508_v51 = vpop.f32.mrf.mxu3 }
 0x1fc   :  { %v2700_v52 = vadd.f32 %v508_v51, %v471_v50 }
 0x203   :  { %v510_v54 = vpop.f32.mrf.mxu3 }
 0x204   :  { %v2703_v55 = vadd.f32 %v510_v54, %v469_v53 }
 0x20b   :  { %v513_v57 = vpop.f32.mrf.mxu3 }
 0x20c   :  { %v2706_v58 = vadd.f32 %v513_v57, %v466_v56 }
 0x213   :  { %v515_v61 = vpop.f32.mrf.mxu3 }
 0x214   :  { %v2709_v62 = vadd.f32 %v515_v61, %v464_v60 }
 0x21b   :  { %v2711_v1 = vpop.f32.mrf.mxu3 }
 0x223   :  { %v520_v3 = vpop.f32.mrf.mxu3 }
 0x224   :  { %v2714_v4 = vadd.f32 %v520_v3, %v459_v2 }
 0x22b   :  { %v523_v5 = vpop.f32.mrf.mxu3 }
 0x22c   :  { %v530_v39 = vadd.f32 %v523_v5, %v456_v38 }
 0x233   :  { %v525_v7 = vpop.f32.mrf.mxu3 }
 0x234   :  { %v528_v0 = vadd.f32 %v525_v7, %v454_v6 }
 0x236   :  { %v590_v8 = vadd.f32 %v586_v59, %v528_v0 }
 0x238   :  { %2186 = vtanh.f32 %v590_v8  ;;  %v2104_v10 = vmul.f32 -1.442695, %v590_v8 }
 0x23a   :  { %2188 = vpow2.f32 %v2104_v10 }
 0x23e   :  { %v2187_v9 = vpop.eup %2186 }
 0x23f   :  { %613 = vrot.lane.b32.xlu0 %v2187_v9, %s2352_s5 }
 0x240   :  { %v2189_v11 = vpop.eup %2188 }
 0x241   :  { %v594_v12 = vadd.f32 1.0, %v2189_v11 }
 0x243   :  { %2190 = vrcp.f32 %v594_v12  ;;  %v606_v18 = vand.u32 2147483648, %v594_v12  ;;  %vm600_vm14 = vweird.f32 %v594_v12  ;;  %v604_v19 = vand.u32 2147483647, %v594_v12 }
 0x245   :  { %v607_v23 = vor.u32 1.1754944e-38, %v606_v18  ;;  %vm605_vm0 = vcmp.eq.f32.partialorder %v604_v19, 8.507059e+37 }
 0x249   :  { %v2191_v13 = vpop.eup %2190 }
 0x24a   :  { %v596_v14 = vmul.f32 %v2191_v13, %v594_v12  ;;  %vm601_vm13 = vweird.f32 %v2191_v13 }
 0x24b   :  { %vm602_vm15 = vmor %vm600_vm14, %vm601_vm13 }
 0x24c   :  { %v597_v15 = vsub.f32 1.0, %v596_v14 }
 0x24e   :  { %v598_v16 = vmul.f32 %v2191_v13, %v597_v15 }
 0x250   :  { %v599_v17 = vadd.f32 %v2191_v13, %v598_v16 }
 0x252   :  { %v603_v21 = vsel %vm602_vm15, %v2191_v13, %v599_v17 }
 0x253   :  { %v608_v25 = vsel %vm605_vm0, %v607_v23, %v603_v21 }
 0x254   :  { %v611_v27 = vmul.f32 0.0, %v608_v25 }
 0x2b1   :  { %v614_v24 = vpop.permute.xlu0 %613 }
 0x2b2   :  { %v616_v26 = vmul.f32 %v614_v24, %v608_v25 }
 0x2b4   :  { %618 = vrot.lane.b32.xlu1 %v616_v26, %s2352_s5 }
 0x326   :  { %v619_v28 = vpop.permute.xlu1 %618 }
 0x327   :  { %v621_v29 = vadd.f32 %v619_v28, %v611_v27 }
 0x329   :  { %2192 = vtanh.f32 %v621_v29 }
 0x32f   :  { %v2193_v30 = vpop.eup %2192 }
 0x330   :  { %624 = vrot.lane.b32.xlu2 %v2193_v30, %s2352_s5 }
 0x38a   :  { %v625_v31 = vpop.permute.xlu2 %624 }
 0x38b   :  { %v2720_v33 = vmul.f32 %v625_v31, %v608_v25 }
 0x38d   :  { %v638_v35 = vpack.c.bf16 %v2720_v33, %v2720_v33 }
 0x38f   :  { %640 = vrot.lane.b32.xlu0 %v638_v35, %s2353_s21 }
 0x401   :  { %v641_v37 = vpop.permute.xlu0 %640 }
 0x402   :  { %2105 = vmatmul.msk.bf16.vlgmr.msra.gmra.mxu3 %vm393_vm12, %v641_v37 }
 0x485   :  { %v654_v40 = vpop.f32.mrf.mxu3 }
 0x486   :  { %v658_v41 = vadd.f32 %v654_v40, %v530_v39 }
 0x488   :  { %2194 = vtanh.f32 %v658_v41  ;;  %v2106_v45 = vmul.f32 -1.442695, %v658_v41 }
 0x48a   :  { %2196 = vpow2.f32 %v2106_v45 }
 0x48d   :  { %v656_v42 = vpop.f32.mrf.mxu3 }
 0x48e   :  { %v2195_v44 = vpop.eup %2194 }
 0x48f   :  { %681 = vrot.lane.b32.xlu1 %v2195_v44, %s2352_s5  ;;  %v461_v44 = vadd.f32 %v2691_v43, %v2686_v36 }
 0x490   :  { %v2197_v47 = vpop.eup %2196 }
 0x491   :  { %v662_v48 = vadd.f32 1.0, %v2197_v47  ;;  %v536_v45 = vadd.f32 %v2711_v1, %v461_v44 }
 0x493   :  { %2198 = vrcp.f32 %v662_v48  ;;  %v674_v34 = vand.u32 2147483648, %v662_v48  ;;  %vm668_vm2 = vweird.f32 %v662_v48  ;;  %v672_v57 = vand.u32 2147483647, %v662_v48 }
 0x495   :  { %v675_v60 = vor.u32 1.1754944e-38, %v674_v34  ;;  %vm673_vm4 = vcmp.eq.f32.partialorder %v672_v57, 8.507059e+37 }
 0x499   :  { %v2199_v50 = vpop.eup %2198 }
 0x49a   :  { %v664_v51 = vmul.f32 %v2199_v50, %v662_v48  ;;  %vm669_vm1 = vweird.f32 %v2199_v50 }
 0x49b   :  { %vm670_vm3 = vmor %vm668_vm2, %vm669_vm1 }
 0x49c   :  { %v665_v53 = vsub.f32 1.0, %v664_v51 }
 0x49e   :  { %v666_v54 = vmul.f32 %v2199_v50, %v665_v53 }
 0x4a0   :  { %v667_v56 = vadd.f32 %v2199_v50, %v666_v54 }
 0x4a2   :  { %v671_v59 = vsel %vm670_vm3, %v2199_v50, %v667_v56 }
 0x4a3   :  { %v676_v63 = vsel %vm673_vm4, %v675_v60, %v671_v59 }
 0x4a4   :  { %v679_v3 = vmul.f32 %v676_v63, %v621_v29 }
 0x501   :  { %v682_v61 = vpop.permute.xlu1 %681 }
 0x502   :  { %v684_v2 = vmul.f32 %v682_v61, %v676_v63 }
 0x504   :  { %686 = vrot.lane.b32.xlu2 %v684_v2, %s2352_s5 }
 0x55e   :  { %v687_v5 = vpop.permute.xlu2 %686 }
 0x55f   :  { %v689_v6 = vadd.f32 %v687_v5, %v679_v3 }
 0x561   :  { %2200 = vtanh.f32 %v689_v6 }
 0x567   :  { %v2201_v7 = vpop.eup %2200 }
 0x568   :  { %692 = vrot.lane.b32.xlu0 %v2201_v7, %s2352_s5 }
 0x5da   :  { %v693_v0 = vpop.permute.xlu0 %692 }
 0x5db   :  { %v2731_v8 = vmul.f32 %v693_v0, %v676_v63 }
 0x5dd   :  { %v705_v9 = vpack.c.bf16 %v2731_v8, %v2731_v8 }
 0x5df   :  { %707 = vrot.lane.b32.xlu1 %v705_v9, %s2353_s21 }
 0x651   :  { %v708_v10 = vpop.permute.xlu1 %707 }
 0x652   :  { %2107 = vmatmul.msk.bf16.vlgmr.msrb.gmra.mxu2 %vm393_vm12, %v708_v10 }
 0x653   :  { %1114 = vmatpush.bf16.msrb.mxu2 %v2648_v20 }
 0x657   :  { %1115 = vmatpush.bf16.msrb.mxu2 %v2664_v32 }
 0x6d5   :  { %v721_v11 = vpop.f32.mrf.mxu2 }
 0x6d6   :  { %v725_v12 = vadd.f32 %v721_v11, %v2714_v4 }
 0x6d8   :  { %2202 = vtanh.f32 %v725_v12  ;;  %v2108_v15 = vmul.f32 -1.442695, %v725_v12 }
 0x6da   :  { %2204 = vpow2.f32 %v2108_v15 }
 0x6dd   :  { %v723_v13 = vpop.f32.mrf.mxu2 }
 0x6de   :  { %v2203_v14 = vpop.eup %2202 }
 0x6df   :  { %748 = vrot.lane.b32.xlu2 %v2203_v14, %s2352_s5 }
 0x6e0   :  { %v2205_v16 = vpop.eup %2204 }
 0x6e1   :  { %v729_v17 = vadd.f32 1.0, %v2205_v16 }
 0x6e3   :  { %2206 = vrcp.f32 %v729_v17  ;;  %v741_v25 = vand.u32 2147483648, %v729_v17  ;;  %vm735_vm6 = vweird.f32 %v729_v17  ;;  %v739_v26 = vand.u32 2147483647, %v729_v17 }
 0x6e5   :  { %v742_v27 = vor.u32 1.1754944e-38, %v741_v25  ;;  %vm740_vm8 = vcmp.eq.f32.partialorder %v739_v26, 8.507059e+37 }
 0x6e9   :  { %v2207_v18 = vpop.eup %2206 }
 0x6ea   :  { %v731_v19 = vmul.f32 %v2207_v18, %v729_v17  ;;  %vm736_vm5 = vweird.f32 %v2207_v18 }
 0x6eb   :  { %vm737_vm7 = vmor %vm735_vm6, %vm736_vm5 }
 0x6ec   :  { %v732_v21 = vsub.f32 1.0, %v731_v19 }
 0x6ee   :  { %v733_v23 = vmul.f32 %v2207_v18, %v732_v21 }
 0x6f0   :  { %v734_v24 = vadd.f32 %v2207_v18, %v733_v23 }
 0x6f2   :  { %v738_v4 = vsel %vm737_vm7, %v2207_v18, %v734_v24 }
 0x6f3   :  { %v743_v29 = vsel %vm740_vm8, %v742_v27, %v738_v4 }
 0x6f4   :  { %v746_v31 = vmul.f32 %v743_v29, %v689_v6 }
 0x739   :  { %v749_v28 = vpop.permute.xlu2 %748 }
 0x73a   :  { %v751_v30 = vmul.f32 %v749_v28, %v743_v29 }
 0x73c   :  { %753 = vrot.lane.b32.xlu0 %v751_v30, %s2352_s5 }
 0x7ae   :  { %v754_v35 = vpop.permute.xlu0 %753 }
 0x7af   :  { %v756_v37 = vadd.f32 %v754_v35, %v746_v31 }
 0x7b1   :  { %2208 = vtanh.f32 %v756_v37 }
 0x7b7   :  { %v2209_v38 = vpop.eup %2208 }
 0x7b8   :  { %759 = vrot.lane.b32.xlu1 %v2209_v38, %s2352_s5 }
 0x82a   :  { %v760_v39 = vpop.permute.xlu1 %759 }
 0x82b   :  { %v2743_v40 = vmul.f32 %v760_v39, %v743_v29 }
 0x82d   :  { %v772_v41 = vpack.c.bf16 %v2743_v40, %v2743_v40 }
 0x82f   :  { %774 = vrot.lane.b32.xlu2 %v772_v41, %s2353_s21 }
 0x889   :  { %v775_v42 = vpop.permute.xlu2 %774 }
 0x88a   :  { %2109 = vmatmul.msk.bf16.vlgmr.msra.gmra.mxu0 %vm393_vm12, %v775_v42 }
 0x88b   :  { %1179 = vmatpush.bf16.msra.mxu0 %v2648_v20 }
 0x88f   :  { %1180 = vmatpush.bf16.msra.mxu0 %v2664_v32 }
 0x907   :  { %v788_v47 = vpop.f32.mrf.mxu0 }
 0x908   :  { %v792_v48 = vadd.f32 %v788_v47, %v536_v45 }
 0x90a   :  { %2210 = vtanh.f32 %v792_v48  ;;  %v2110_v53 = vmul.f32 -1.442695, %v792_v48 }
 0x90c   :  { %2212 = vpow2.f32 %v2110_v53 }
 0x90f   :  { %v790_v50 = vpop.f32.mrf.mxu0 }
 0x910   :  { %v2211_v51 = vpop.eup %2210 }
 0x911   :  { %815 = vrot.lane.b32.xlu0 %v2211_v51, %s2352_s5 }
 0x912   :  { %v2213_v54 = vpop.eup %2212 }
 0x913   :  { %v796_v56 = vadd.f32 1.0, %v2213_v54 }
 0x915   :  { %2214 = vrcp.f32 %v796_v56  ;;  %v808_v36 = vand.u32 2147483648, %v796_v56  ;;  %vm802_vm10 = vweird.f32 %v796_v56  ;;  %v806_v43 = vand.u32 2147483647, %v796_v56 }
 0x917   :  { %v809_v60 = vor.u32 1.1754944e-38, %v808_v36  ;;  %vm807_vm13 = vcmp.eq.f32.partialorder %v806_v43, 8.507059e+37 }
 0x91b   :  { %v2215_v20 = vpop.eup %2214 }
 0x91c   :  { %v798_v34 = vmul.f32 %v2215_v20, %v796_v56  ;;  %vm803_vm9 = vweird.f32 %v2215_v20 }
 0x91d   :  { %vm804_vm11 = vmor %vm802_vm10, %vm803_vm9 }
 0x91e   :  { %v799_v32 = vsub.f32 1.0, %v798_v34 }
 0x920   :  { %v800_v57 = vmul.f32 %v2215_v20, %v799_v32 }
 0x922   :  { %v801_v59 = vadd.f32 %v2215_v20, %v800_v57 }
 0x924   :  { %v805_v1 = vsel %vm804_vm11, %v2215_v20, %v801_v59 }
 0x925   :  { %v810_v63 = vsel %vm807_vm13, %v809_v60, %v805_v1 }
 0x926   :  { %v813_v3 = vmul.f32 %v810_v63, %v756_v37 }
 0x983   :  { %v816_v61 = vpop.permute.xlu0 %815 }
 0x984   :  { %v818_v2 = vmul.f32 %v816_v61, %v810_v63 }
 0x986   :  { %820 = vrot.lane.b32.xlu1 %v818_v2, %s2352_s5 }
 0x9f8   :  { %v821_v5 = vpop.permute.xlu1 %820 }
 0x9f9   :  { %v823_v6 = vadd.f32 %v821_v5, %v813_v3 }
 0x9fb   :  { %2216 = vtanh.f32 %v823_v6 }
 0xa01   :  { %v2217_v7 = vpop.eup %2216 }
 0xa02   :  { %826 = vrot.lane.b32.xlu2 %v2217_v7, %s2352_s5 }
 0xa5c   :  { %v827_v0 = vpop.permute.xlu2 %826 }
 0xa5d   :  { %v2757_v9 = vmul.f32 %v827_v0, %v810_v63 }
 0xa5f   :  { %v839_v10 = vpack.c.bf16 %v2757_v9, %v2757_v9 }
 0xa61   :  { %841 = vrot.lane.b32.xlu0 %v839_v10, %s2353_s21 }
 0xad3   :  { %v842_v11 = vpop.permute.xlu0 %841 }
 0xad4   :  { %2111 = vmatmul.msk.bf16.vlgmr.msrb.gmra.mxu1 %vm393_vm12, %v842_v11 }
 0xb51   :  { %v855_v12 = vpop.f32.mrf.mxu1 }
 0xb52   :  { %v859_v13 = vadd.f32 %v855_v12, %v2709_v62 }
 0xb54   :  { %2218 = vtanh.f32 %v859_v13  ;;  %v2112_v16 = vmul.f32 -1.442695, %v859_v13 }
 0xb56   :  { %2220 = vpow2.f32 %v2112_v16 }
 0xb59   :  { %v857_v14 = vpop.f32.mrf.mxu1 }
 0xb5a   :  { %v2219_v15 = vpop.eup %2218 }
 0xb5b   :  { %882 = vrot.lane.b32.xlu1 %v2219_v15, %s2352_s5 }
 0xb5c   :  { %v2221_v17 = vpop.eup %2220 }
 0xb5d   :  { %v863_v18 = vadd.f32 1.0, %v2221_v17 }
 0xb5f   :  { %2222 = vrcp.f32 %v863_v18  ;;  %v875_v26 = vand.u32 2147483648, %v863_v18  ;;  %vm869_vm15 = vweird.f32 %v863_v18  ;;  %v873_v4 = vand.u32 2147483647, %v863_v18 }
 0xb61   :  { %v876_v27 = vor.u32 1.1754944e-38, %v875_v26  ;;  %vm874_vm1 = vcmp.eq.f32.partialorder %v873_v4, 8.507059e+37 }
 0xb65   :  { %v2223_v19 = vpop.eup %2222 }
 0xb66   :  { %v865_v21 = vmul.f32 %v2223_v19, %v863_v18  ;;  %vm870_vm14 = vweird.f32 %v2223_v19 }
 0xb67   :  { %vm871_vm0 = vmor %vm869_vm15, %vm870_vm14 }
 0xb68   :  { %v866_v23 = vsub.f32 1.0, %v865_v21 }
 0xb6a   :  { %v867_v24 = vmul.f32 %v2223_v19, %v866_v23 }
 0xb6c   :  { %v868_v25 = vadd.f32 %v2223_v19, %v867_v24 }
 0xb6e   :  { %v872_v62 = vsel %vm871_vm0, %v2223_v19, %v868_v25 }
 0xb6f   :  { %v877_v29 = vsel %vm874_vm1, %v876_v27, %v872_v62 }
 0xb70   :  { %v880_v31 = vmul.f32 %v877_v29, %v823_v6 }
 0xbcd   :  { %v883_v28 = vpop.permute.xlu1 %882 }
 0xbce   :  { %v885_v30 = vmul.f32 %v883_v28, %v877_v29 }
 0xbd0   :  { %887 = vrot.lane.b32.xlu2 %v885_v30, %s2352_s5 }
 0xc2a   :  { %v888_v35 = vpop.permute.xlu2 %887 }
 0xc2b   :  { %v890_v37 = vadd.f32 %v888_v35, %v880_v31 }
 0xc2d   :  { %2224 = vtanh.f32 %v890_v37 }
 0xc33   :  { %v2225_v38 = vpop.eup %2224 }
 0xc34   :  { %893 = vrot.lane.b32.xlu0 %v2225_v38, %s2352_s5 }
 0xca6   :  { %v894_v39 = vpop.permute.xlu0 %893 }
 0xca7   :  { %v2767_v41 = vmul.f32 %v894_v39, %v877_v29 }
 0xca9   :  { %v906_v42 = vpack.c.bf16 %v2767_v41, %v2767_v41 }
 0xcab   :  { %908 = vrot.lane.b32.xlu1 %v906_v42, %s2353_s21 }
 0xd1d   :  { %v909_v44 = vpop.permute.xlu1 %908 }
 0xd1e   :  { %2113 = vmatmul.msk.bf16.vlgmr.msra.gmra.mxu2 %vm393_vm12, %v909_v44 }
 0xda1   :  { %v922_v45 = vpop.f32.mrf.mxu2 }
 0xda2   :  { %v926_v47 = vadd.f32 %v922_v45, %v2706_v58 }
 0xda4   :  { %2226 = vtanh.f32 %v926_v47  ;;  %v2114_v51 = vmul.f32 -1.442695, %v926_v47 }
 0xda6   :  { %2228 = vpow2.f32 %v2114_v51 }
 0xda9   :  { %v924_v48 = vpop.f32.mrf.mxu2 }
 0xdaa   :  { %v2227_v50 = vpop.eup %2226 }
 0xdab   :  { %949 = vrot.lane.b32.xlu2 %v2227_v50, %s2352_s5 }
 0xdac   :  { %v2229_v53 = vpop.eup %2228 }
 0xdad   :  { %v930_v54 = vadd.f32 1.0, %v2229_v53 }
 0xdaf   :  { %2230 = vrcp.f32 %v930_v54  ;;  %v942_v59 = vand.u32 2147483648, %v930_v54  ;;  %vm936_vm3 = vweird.f32 %v930_v54  ;;  %v940_v36 = vand.u32 2147483647, %v930_v54 }
 0xdb1   :  { %v943_v43 = vor.u32 1.1754944e-38, %v942_v59  ;;  %vm941_vm5 = vcmp.eq.f32.partialorder %v940_v36, 8.507059e+37 }
 0xdb5   :  { %v2231_v56 = vpop.eup %2230 }
 0xdb6   :  { %v932_v20 = vmul.f32 %v2231_v56, %v930_v54  ;;  %vm937_vm2 = vweird.f32 %v2231_v56 }
 0xdb7   :  { %vm938_vm4 = vmor %vm936_vm3, %vm937_vm2 }
 0xdb8   :  { %v933_v34 = vsub.f32 1.0, %v932_v20 }
 0xdba   :  { %v934_v32 = vmul.f32 %v2231_v56, %v933_v34 }
 0xdbc   :  { %v935_v57 = vadd.f32 %v2231_v56, %v934_v32 }
 0xdbe   :  { %v939_v58 = vsel %vm938_vm4, %v2231_v56, %v935_v57 }
 0xdbf   :  { %v944_v60 = vsel %vm941_vm5, %v943_v43, %v939_v58 }
 0xdc0   :  { %v947_v63 = vmul.f32 %v944_v60, %v890_v37 }
 0xe05   :  { %v950_v1 = vpop.permute.xlu2 %949 }
 0xe06   :  { %v952_v61 = vmul.f32 %v950_v1, %v944_v60 }
 0xe08   :  { %954 = vrot.lane.b32.xlu0 %v952_v61, %s2352_s5 }
 0xe7a   :  { %v955_v2 = vpop.permute.xlu0 %954 }
 0xe7b   :  { %v957_v3 = vadd.f32 %v955_v2, %v947_v63 }
 0xe7d   :  { %2232 = vtanh.f32 %v957_v3 }
 0xe83   :  { %v2233_v5 = vpop.eup %2232 }
 0xe84   :  { %960 = vrot.lane.b32.xlu1 %v2233_v5, %s2352_s5 }
 0xef6   :  { %v961_v6 = vpop.permute.xlu1 %960 }
 0xef7   :  { %v2777_v7 = vmul.f32 %v961_v6, %v944_v60 }
 0xef9   :  { %v971_v0 = vpack.c.bf16 %v2777_v7, %v2777_v7 }
 0xefb   :  { %973 = vrot.lane.b32.xlu2 %v971_v0, %s2353_s21 }
 0xf55   :  { %v974_v10 = vpop.permute.xlu2 %973 }
 0xf56   :  { %2115 = vmatmul.msk.bf16.vlgmr.msrb.gmra.mxu0 %vm393_vm12, %v974_v10 }
 0xfd3   :  { %v987_v11 = vpop.f32.mrf.mxu0 }
 0xfd4   :  { %v991_v12 = vadd.f32 %v987_v11, %v2703_v55 }
 0xfd6   :  { %2234 = vtanh.f32 %v991_v12  ;;  %v2116_v15 = vmul.f32 -1.442695, %v991_v12 }
 0xfd8   :  { %2236 = vpow2.f32 %v2116_v15 }
 0xfdb   :  { %v989_v13 = vpop.f32.mrf.mxu0 }
 0xfdc   :  { %v2235_v14 = vpop.eup %2234 }
 0xfdd   :  { %1014 = vrot.lane.b32.xlu0 %v2235_v14, %s2352_s5 }
 0xfde   :  { %v2237_v16 = vpop.eup %2236 }
 0xfdf   :  { %v995_v17 = vadd.f32 1.0, %v2237_v16 }
 0xfe1   :  { %2238 = vrcp.f32 %v995_v17  ;;  %v1007_v25 = vand.u32 2147483648, %v995_v17  ;;  %vm1001_vm7 = vweird.f32 %v995_v17  ;;  %v1005_v26 = vand.u32 2147483647, %v995_v17 }
 0xfe3   :  { %v1008_v4 = vor.u32 1.1754944e-38, %v1007_v25  ;;  %vm1006_vm9 = vcmp.eq.f32.partialorder %v1005_v26, 8.507059e+37 }
 0xfe7   :  { %v2239_v18 = vpop.eup %2238 }
 0xfe8   :  { %v997_v19 = vmul.f32 %v2239_v18, %v995_v17  ;;  %vm1002_vm6 = vweird.f32 %v2239_v18 }
 0xfe9   :  { %vm1003_vm8 = vmor %vm1001_vm7, %vm1002_vm6  ;;  %vm632_vm7 = vcmask 130048  }
 0xfea   :  { %v998_v21 = vsub.f32 1.0, %v997_v19 }
 0xfec   :  { %v999_v23 = vmul.f32 %v2239_v18, %v998_v21 }
 0xfee   :  { %v1000_v24 = vadd.f32 %v2239_v18, %v999_v23 }
 0xff0   :  { %v1004_v55 = vsel %vm1003_vm8, %v2239_v18, %v1000_v24  ;;  %vm635_vm8 = vcmask 261248  }
 0xff1   :  { %v1009_v27 = vsel %vm1006_vm9, %v1008_v4, %v1004_v55 }
 0xff2   :  { %v1012_v29 = vmul.f32 %v1009_v27, %v957_v3 }
0x104f   :  { %v1015_v62 = vpop.permute.xlu0 %1014 }
0x1050   :  { %v1017_v28 = vmul.f32 %v1015_v62, %v1009_v27 }
0x1052   :  { %1019 = vrot.lane.b32.xlu1 %v1017_v28, %s2352_s5 }
0x10c4   :  { %v1020_v30 = vpop.permute.xlu1 %1019 }
0x10c5   :  { %v1022_v31 = vadd.f32 %v1020_v30, %v1012_v29 }
0x10c7   :  { %2240 = vtanh.f32 %v1022_v31 }
0x10cd   :  { %v2241_v35 = vpop.eup %2240 }
0x10ce   :  { %1025 = vrot.lane.b32.xlu2 %v2241_v35, %s2352_s5 }
0x1128   :  { %v1026_v37 = vpop.permute.xlu2 %1025 }
0x1129   :  { %v2787_v38 = vmul.f32 %v1026_v37, %v1009_v27 }
0x112b   :  { %v1036_v39 = vpack.c.bf16 %v2787_v38, %v2787_v38 }
0x112d   :  { %1038 = vrot.lane.b32.xlu0 %v1036_v39, %s2353_s21 }
0x119f   :  { %v1039_v42 = vpop.permute.xlu0 %1038 }
0x11a0   :  { %2117 = vmatmul.msk.bf16.vlgmr.msra.gmra.mxu1 %vm393_vm12, %v1039_v42 }
0x121d   :  { %v1052_v44 = vpop.f32.mrf.mxu1 }
0x121e   :  { %v1056_v45 = vadd.f32 %v1052_v44, %v2700_v52 }
0x1220   :  { %2242 = vtanh.f32 %v1056_v45  ;;  %v2118_v50 = vmul.f32 -1.442695, %v1056_v45 }
0x1222   :  { %2244 = vpow2.f32 %v2118_v50 }
0x1225   :  { %v1054_v47 = vpop.f32.mrf.mxu1 }
0x1226   :  { %v2243_v48 = vpop.eup %2242 }
0x1227   :  { %1079 = vrot.lane.b32.xlu1 %v2243_v48, %s2352_s5 }
0x1228   :  { %v2245_v51 = vpop.eup %2244 }
0x1229   :  { %v1060_v53 = vadd.f32 1.0, %v2245_v51 }
0x122b   :  { %2246 = vrcp.f32 %v1060_v53  ;;  %v1072_v57 = vand.u32 2147483648, %v1060_v53  ;;  %vm1066_vm11 = vweird.f32 %v1060_v53  ;;  %v1070_v59 = vand.u32 2147483647, %v1060_v53 }
0x122d   :  { %v1073_v36 = vor.u32 1.1754944e-38, %v1072_v57  ;;  %vm1071_vm14 = vcmp.eq.f32.partialorder %v1070_v59, 8.507059e+37 }
0x1231   :  { %v2247_v54 = vpop.eup %2246 }
0x1232   :  { %v1062_v56 = vmul.f32 %v2247_v54, %v1060_v53  ;;  %vm1067_vm10 = vweird.f32 %v2247_v54 }
0x1233   :  { %vm1068_vm13 = vmor %vm1066_vm11, %vm1067_vm10 }
0x1234   :  { %v1063_v20 = vsub.f32 1.0, %v1062_v56 }
0x1236   :  { %v1064_v34 = vmul.f32 %v2247_v54, %v1063_v20 }
0x1238   :  { %v1065_v32 = vadd.f32 %v2247_v54, %v1064_v34 }
0x123a   :  { %v1069_v52 = vsel %vm1068_vm13, %v2247_v54, %v1065_v32 }
0x123b   :  { %v1074_v43 = vsel %vm1071_vm14, %v1073_v36, %v1069_v52 }
0x123c   :  { %v1077_v60 = vmul.f32 %v1074_v43, %v1022_v31 }
0x1299   :  { %v1080_v58 = vpop.permute.xlu1 %1079 }
0x129a   :  { %v1082_v1 = vmul.f32 %v1080_v58, %v1074_v43 }
0x129c   :  { %1084 = vrot.lane.b32.xlu2 %v1082_v1, %s2352_s5 }
0x12f6   :  { %v1085_v61 = vpop.permute.xlu2 %1084 }
0x12f7   :  { %v1087_v63 = vadd.f32 %v1085_v61, %v1077_v60 }
0x12f9   :  { %2248 = vtanh.f32 %v1087_v63 }
0x12ff   :  { %v2249_v2 = vpop.eup %2248 }
0x1300   :  { %1090 = vrot.lane.b32.xlu0 %v2249_v2, %s2352_s5  ;;  %v2825_v2 = vld [vmem:[%s2993_s8 + $0x8] sm:$0xff] }
0x1301   :  { %1367 = vmatpush.bf16.msra.mxu2 %v2825_v2  ;;  %1426 = vmatpush.bf16.msrb.mxu3 %v2825_v2 }
0x1302   :  { %1486 = vmatpush.bf16.msrb.mxu0 %v2825_v2 }
0x1372   :  { %v1091_v3 = vpop.permute.xlu0 %1090 }
0x1373   :  { %v2797_v5 = vmul.f32 %v1091_v3, %v1074_v43  ;;  %v2834_v3 = vld [vmem:[%s2993_s8] sm:$0xff] }
0x1374   :  { %1368 = vmatpush.bf16.msra.mxu2 %v2834_v3  ;;  %1427 = vmatpush.bf16.msrb.mxu3 %v2834_v3 }
0x1375   :  { %v1101_v6 = vpack.c.bf16 %v2797_v5, %v2797_v5  ;;  %1487 = vmatpush.bf16.msrb.mxu0 %v2834_v3 }
0x1377   :  { %1103 = vrot.lane.b32.xlu1 %v1101_v6, %s2353_s21 }
0x1378   :  { %1606 = vmatpush.bf16.msra.mxu3 %v2825_v2 }
0x137c   :  { %1607 = vmatpush.bf16.msra.mxu3 %v2834_v3 }
0x13e9   :  { %v1104_v0 = vpop.permute.xlu1 %1103 }
0x13ea   :  { %2119 = vmatmul.msk.bf16.vlgmr.msrb.gmra.mxu2 %vm393_vm12, %v1104_v0 }
0x13eb   :  { %1546 = vmatpush.bf16.msrb.mxu2 %v2825_v2 }
0x13ef   :  { %1547 = vmatpush.bf16.msrb.mxu2 %v2834_v3 }
0x13fa   :  { %1369 = vmatmul.bf16.vlgmr.msra.gmra.mxu2 %v2351_v22  ;;  %v2170_v22 = vld [vmem:[%s2994_s7] sm:$0xff] }
0x13fb   :  { %1726 = vmatpush.bf16.msra.mxu2 %v2825_v2 }
0x13ff   :  { %1727 = vmatpush.bf16.msra.mxu2 %v2834_v3 }
0x146d   :  { %v1117_v10 = vpop.f32.mrf.mxu2 }
0x146e   :  { %v1121_v11 = vadd.f32 %v1117_v10, %v2697_v49 }
0x1470   :  { %2250 = vtanh.f32 %v1121_v11  ;;  %v2120_v14 = vmul.f32 -1.442695, %v1121_v11 }
0x1472   :  { %2252 = vpow2.f32 %v2120_v14 }
0x1475   :  { %v1119_v12 = vpop.f32.mrf.mxu2 }
0x1476   :  { %v2251_v13 = vpop.eup %2250 }
0x1477   :  { %1144 = vrot.lane.b32.xlu2 %v2251_v13, %s2352_s5 }
0x1478   :  { %v2253_v15 = vpop.eup %2252 }
0x1479   :  { %v1125_v16 = vadd.f32 1.0, %v2253_v15  ;;  %v1240_v15 = vld [vmem:[#allocation2] sm:$0xff] }
0x147b   :  { %2254 = vrcp.f32 %v1125_v16  ;;  %v1137_v24 = vand.u32 2147483648, %v1125_v16  ;;  %vm1131_vm0 = vweird.f32 %v1125_v16  ;;  %v1135_v25 = vand.u32 2147483647, %v1125_v16 }
0x147d   :  { %v1138_v26 = vor.u32 1.1754944e-38, %v1137_v24  ;;  %vm1136_vm2 = vcmp.eq.f32.partialorder %v1135_v25, 8.507059e+37  ;;  %v1370_v12 = vpop.f32.mrf.mxu2 }
0x1481   :  { %v2255_v17 = vpop.eup %2254 }
0x1482   :  { %v1127_v18 = vmul.f32 %v2255_v17, %v1125_v16  ;;  %vm1132_vm15 = vweird.f32 %v2255_v17  ;;  %v1241_v16 = vld [vmem:[#allocation2 + $0x8] sm:$0xff] }
0x1483   :  { %vm1133_vm1 = vmor %vm1131_vm0, %vm1132_vm15 }
0x1484   :  { %v1128_v19 = vsub.f32 1.0, %v1127_v18 }
0x1486   :  { %v1129_v21 = vmul.f32 %v2255_v17, %v1128_v19 }
0x1488   :  { %v1130_v23 = vadd.f32 %v2255_v17, %v1129_v21 }
0x148a   :  { %v1134_v49 = vsel %vm1133_vm1, %v2255_v17, %v1130_v23  ;;  %v1372_v17 = vpop.f32.mrf.mxu2  ;;  %v2862_v23 = vld [vmem:[%s2995_s9] ss:$0 sm:$0xff] }
0x148b   :  { %v1139_v4 = vsel %vm1136_vm2, %v1138_v26, %v1134_v49 }
0x148c   :  { %v1142_v27 = vmul.f32 %v1139_v4, %v1087_v63 }
0x14d1   :  { %v1145_v55 = vpop.permute.xlu2 %1144 }
0x14d2   :  { %v1147_v62 = vmul.f32 %v1145_v55, %v1139_v4 }
0x14d4   :  { %1149 = vrot.lane.b32.xlu0 %v1147_v62, %s2352_s5 }
0x1546   :  { %v1150_v28 = vpop.permute.xlu0 %1149 }
0x1547   :  { %v1152_v29 = vadd.f32 %v1150_v28, %v1142_v27 }
0x1549   :  { %2256 = vtanh.f32 %v1152_v29 }
0x154f   :  { %v2257_v30 = vpop.eup %2256 }
0x1550   :  { %1155 = vrot.lane.b32.xlu1 %v2257_v30, %s2352_s5 }
0x15c2   :  { %v1156_v31 = vpop.permute.xlu1 %1155 }
0x15c3   :  { %v1158_v35 = vmul.f32 %v1156_v31, %v1139_v4 }
0x15c5   :  { %v1166_v37 = vpack.c.bf16 %v1158_v35, %v1158_v35 }
0x15c7   :  { %1168 = vrot.lane.b32.xlu2 %v1166_v37, %s2353_s21 }
0x1621   :  { %v1169_v39 = vpop.permute.xlu2 %1168 }
0x1622   :  { %2121 = vmatmul.msk.bf16.vlgmr.msra.gmra.mxu0 %vm393_vm12, %v1169_v39 }
0x1623   :  { %1666 = vmatpush.bf16.msra.mxu0 %v2825_v2 }
0x1627   :  { %1667 = vmatpush.bf16.msra.mxu0 %v2834_v3 }
0x169f   :  { %v1182_v42 = vpop.f32.mrf.mxu0 }
0x16a0   :  { %v1186_v44 = vadd.f32 %v1182_v42, %v2694_v46 }
0x16a2   :  { %2258 = vtanh.f32 %v1186_v44  ;;  %v2122_v48 = vmul.f32 -1.442695, %v1186_v44 }
0x16a4   :  { %2260 = vpow2.f32 %v2122_v48 }
0x16a7   :  { %v1184_v45 = vpop.f32.mrf.mxu0 }
0x16a8   :  { %v2259_v47 = vpop.eup %2258 }
0x16a9   :  { %1209 = vrot.lane.b32.xlu0 %v2259_v47, %s2352_s5 }
0x16aa   :  { %v2261_v50 = vpop.eup %2260 }
0x16ab   :  { %v1190_v51 = vadd.f32 1.0, %v2261_v50 }
0x16ad   :  { %2262 = vrcp.f32 %v1190_v51  ;;  %v1202_v46 = vand.u32 2147483648, %v1190_v51  ;;  %vm1196_vm4 = vweird.f32 %v1190_v51  ;;  %v1200_v32 = vand.u32 2147483647, %v1190_v51 }
0x16af   :  { %v1203_v59 = vor.u32 1.1754944e-38, %v1202_v46  ;;  %vm1201_vm6 = vcmp.eq.f32.partialorder %v1200_v32, 8.507059e+37 }
0x16b1   :  { %629 = vrot.lane.b32.xlu0 %v2720_v33, %s2353_s21 }
0x16b3   :  { %v2263_v53 = vpop.eup %2262 }
0x16b4   :  { %v1192_v54 = vmul.f32 %v2263_v53, %v1190_v51  ;;  %vm1197_vm3 = vweird.f32 %v2263_v53 }
0x16b5   :  { %vm1198_vm5 = vmor %vm1196_vm4, %vm1197_vm3 }
0x16b6   :  { %v1193_v56 = vsub.f32 1.0, %v1192_v54 }
0x16b8   :  { %v1194_v20 = vmul.f32 %v2263_v53, %v1193_v56 }
0x16ba   :  { %v1195_v34 = vadd.f32 %v2263_v53, %v1194_v20 }
0x16bc   :  { %v1199_v57 = vsel %vm1198_vm5, %v2263_v53, %v1195_v34 }
0x16bd   :  { %v1204_v33 = vsel %vm1201_vm6, %v1203_v59, %v1199_v57 }
0x16be   :  { %v1207_v43 = vmul.f32 %v1204_v33, %v1152_v29 }
0x171b   :  { %v1210_v52 = vpop.permute.xlu0 %1209 }
0x171c   :  { %v1212_v36 = vmul.f32 %v1210_v52, %v1204_v33 }
0x171e   :  { %1214 = vrot.lane.b32.xlu1 %v1212_v36, %s2352_s5 }
0x1723   :  { %v630_v58 = vpop.permute.xlu0 %629 }
0x1724   :  { %633 = vst.msk [vmem:[#allocation4] sm:$0xff] %vm632_vm7, %v630_v58 }
0x1725   :  { %636 = vst.msk [vmem:[#allocation4 + $0x48] sm:$0xff] %vm635_vm8, %v630_v58 }
0x1726   :  { %697 = vrot.lane.b32.xlu1 %v2731_v8, %s2353_s21  ;;  %v2171_v8 = vld [vmem:[%s2994_s7 + $0x8] sm:$0xff] }
0x1727   :  { %1306 = vmatpush.bf16.msrb.mxu1 %v2171_v8 }
0x172b   :  { %1307 = vmatpush.bf16.msrb.mxu1 %v2170_v22 }
0x1790   :  { %v1215_v1 = vpop.permute.xlu1 %1214 }
0x1791   :  { %v1217_v60 = vadd.f32 %v1215_v1, %v1207_v43 }
0x1793   :  { %2264 = vtanh.f32 %v1217_v60 }
0x1798   :  { %v698_v61 = vpop.permute.xlu1 %697 }
0x1799   :  { %v2265_v63 = vpop.eup %2264  ;;  %701 = vst.msk [vmem:[#allocation4 + $0x8] sm:$0xff] %vm632_vm7, %v698_v61 }
0x179a   :  { %703 = vst.msk [vmem:[#allocation4 + $0x40] sm:$0xff] %vm635_vm8, %v698_v61  ;;  %1220 = vrot.lane.b32.xlu2 %v2265_v63, %s2352_s5 }
0x17a2   :  { %1160 = vrot.lane.b32.xlu2 %v1158_v35, %s2353_s21 }
0x17f4   :  { %v1221_v6 = vpop.permute.xlu2 %1220 }
0x17f5   :  { %v1223_v0 = vmul.f32 %v1221_v6, %v1204_v33 }
0x17f7   :  { %1225 = vrot.lane.b32.xlu0 %v1223_v0, %s2353_s21 }
0x17fc   :  { %v1161_v10 = vpop.permute.xlu2 %1160 }
0x17fd   :  { %1163 = vst.msk [vmem:[#allocation4 + $0x40] sm:$0xff] %vm632_vm7, %v1161_v10 }
0x17fe   :  { %1164 = vst.msk [vmem:[#allocation4 + $0x8] sm:$0xff] %vm635_vm8, %v1161_v10 }
0x1805   :  { %v1231_v13 = vld [vmem:[#allocation4 + $0x8] sm:$0xff] }
0x1806   :  { %v1251_v19 = vadd.f32 %v1241_v16, %v1231_v13 }
0x1869   :  { %v1226_v11 = vpop.permute.xlu0 %1225 }
0x186a   :  { %1228 = vst.msk [vmem:[#allocation4 + $0x48] sm:$0xff] %vm632_vm7, %v1226_v11 }
0x186b   :  { %1229 = vst.msk [vmem:[#allocation4] sm:$0xff] %vm635_vm8, %v1226_v11 }
0x1872   :  { %v1230_v14 = vld [vmem:[#allocation4] sm:$0xff] }
0x1873   :  { %v1250_v18 = vadd.f32 %v1240_v15, %v1230_v14 }
0x1875   :  { %v1260_v21 = vpack.c.bf16 %v1251_v19, %v1250_v18 }
0x1877   :  { %2131 = vmatmul.msk.bf16.vlgmr.msrb.gmra.mxu1 %vm393_vm12, %v1260_v21 }
0x18f4   :  { %v1309_v24 = vpop.f32.mrf.mxu1 }
0x18f5   :  { %v1310_v25 = vadd.f32 %v2862_v23, %v1309_v24 }
0x18f7   :  { %v1374_v49 = vadd.f32 %v1370_v12, %v1310_v25 }
0x18f9   :  { %2266 = vtanh.f32 %v1374_v49  ;;  %v2144_v55 = vmul.f32 -1.442695, %v1374_v49 }
0x18fb   :  { %2268 = vpow2.f32 %v2144_v55  ;;  %v1243_v55 = vld [vmem:[#allocation2 + $0x18] sm:$0xff] }
0x18fc   :  { %v1311_v46 = vpop.f32.mrf.mxu1 }
0x18fd   :  { %v1312_v32 = vadd.f32 %v2862_v23, %v1311_v46 }
0x18ff   :  { %v2267_v26 = vpop.eup %2266 }
0x1900   :  { %1397 = vrot.lane.b32.xlu1 %v2267_v26, %s2352_s5  ;;  %v1242_v26 = vld [vmem:[#allocation2 + $0x10] sm:$0xff] }
0x1901   :  { %v2269_v4 = vpop.eup %2268 }
0x1902   :  { %v1378_v62 = vadd.f32 1.0, %v2269_v4 }
0x1904   :  { %2270 = vrcp.f32 %v1378_v62  ;;  %v1390_v35 = vand.u32 2147483648, %v1378_v62  ;;  %vm1384_vm10 = vweird.f32 %v1378_v62  ;;  %v1388_v37 = vand.u32 2147483647, %v1378_v62 }
0x1906   :  { %v1391_v42 = vor.u32 1.1754944e-38, %v1390_v35  ;;  %vm1389_vm13 = vcmp.eq.f32.partialorder %v1388_v37, 8.507059e+37 }
0x190a   :  { %v2271_v27 = vpop.eup %2270 }
0x190b   :  { %v1380_v28 = vmul.f32 %v2271_v27, %v1378_v62  ;;  %vm1385_vm9 = vweird.f32 %v2271_v27 }
0x190c   :  { %vm1386_vm11 = vmor %vm1384_vm10, %vm1385_vm9 }
0x190d   :  { %v1381_v29 = vsub.f32 1.0, %v1380_v28 }
0x190f   :  { %v1382_v30 = vmul.f32 %v2271_v27, %v1381_v29 }
0x1911   :  { %v1383_v31 = vadd.f32 %v2271_v27, %v1382_v30 }
0x1913   :  { %v1387_v39 = vsel %vm1386_vm11, %v2271_v27, %v1383_v31 }
0x1914   :  { %v1392_v45 = vsel %vm1389_vm13, %v1391_v42, %v1387_v39 }
0x1915   :  { %v1395_v48 = vmul.f32 0.0, %v1392_v45 }
0x1972   :  { %v1398_v44 = vpop.permute.xlu1 %1397 }
0x1973   :  { %v1400_v47 = vmul.f32 %v1398_v44, %v1392_v45 }
0x1975   :  { %1402 = vrot.lane.b32.xlu2 %v1400_v47, %s2352_s5 }
0x19cf   :  { %v1403_v50 = vpop.permute.xlu2 %1402 }
0x19d0   :  { %v1405_v51 = vadd.f32 %v1403_v50, %v1395_v48 }
0x19d2   :  { %2272 = vtanh.f32 %v1405_v51 }
0x19d8   :  { %v2273_v53 = vpop.eup %2272 }
0x19d9   :  { %1408 = vrot.lane.b32.xlu0 %v2273_v53, %s2352_s5 }
0x1a4b   :  { %v1409_v54 = vpop.permute.xlu0 %1408 }
0x1a4c   :  { %v2868_v56 = vmul.f32 %v1409_v54, %v1392_v45 }
0x1a4e   :  { %v1413_v20 = vpack.c.bf16 %v2868_v56, %v2868_v56 }
0x1a50   :  { %1415 = vrot.lane.b32.xlu1 %v1413_v20, %s2353_s21 }
0x1ac2   :  { %v1416_v34 = vpop.permute.xlu1 %1415 }
0x1ac3   :  { %2145 = vmatmul.msk.bf16.vlgmr.msrb.gmra.mxu3 %vm393_vm12, %v1416_v34 }
0x1ac4   :  { %1786 = vmatpush.bf16.msrb.mxu3 %v2825_v2 }
0x1ac8   :  { %1787 = vmatpush.bf16.msrb.mxu3 %v2834_v3 }
0x1b46   :  { %v1429_v57 = vpop.f32.mrf.mxu3 }
0x1b47   :  { %v1433_v59 = vadd.f32 %v1429_v57, %v1312_v32 }
0x1b49   :  { %2274 = vtanh.f32 %v1433_v59  ;;  %v2146_v36 = vmul.f32 -1.442695, %v1433_v59 }
0x1b4b   :  { %2276 = vpow2.f32 %v2146_v36 }
0x1b4e   :  { %v1431_v52 = vpop.f32.mrf.mxu3 }
0x1b4f   :  { %v2275_v33 = vpop.eup %2274 }
0x1b50   :  { %1456 = vrot.lane.b32.xlu2 %v2275_v33, %s2352_s5 }
0x1b51   :  { %v2277_v58 = vpop.eup %2276 }
0x1b52   :  { %v1437_v43 = vadd.f32 1.0, %v2277_v58 }
0x1b54   :  { %2278 = vrcp.f32 %v1437_v43  ;;  %v1449_v6 = vand.u32 2147483648, %v1437_v43  ;;  %vm1443_vm15 = vweird.f32 %v1437_v43  ;;  %v1447_v0 = vand.u32 2147483647, %v1437_v43 }
0x1b56   :  { %vm1448_vm1 = vcmp.eq.f32.partialorder %v1447_v0, 8.507059e+37 }
0x1b58   :  { %764 = vrot.lane.b32.xlu2 %v2743_v40, %s2353_s21  ;;  %v1450_v40 = vor.u32 1.1754944e-38, %v1449_v6 }
0x1b5a   :  { %v2279_v1 = vpop.eup %2278 }
0x1b5b   :  { %v1439_v60 = vmul.f32 %v2279_v1, %v1437_v43  ;;  %vm1444_vm14 = vweird.f32 %v2279_v1 }
0x1b5c   :  { %vm1445_vm0 = vmor %vm1443_vm15, %vm1444_vm14 }
0x1b5d   :  { %v1440_v61 = vsub.f32 1.0, %v1439_v60 }
0x1b5f   :  { %v1441_v63 = vmul.f32 %v2279_v1, %v1440_v61 }
0x1b60   :  { %1095 = vrot.lane.b32.xlu2 %v2797_v5, %s2353_s21 }
0x1b61   :  { %v1442_v8 = vadd.f32 %v2279_v1, %v1441_v63 }
0x1b63   :  { %v1446_v10 = vsel %vm1445_vm0, %v2279_v1, %v1442_v8 }
0x1b64   :  { %v1451_v5 = vsel %vm1448_vm1, %v1450_v40, %v1446_v10 }
0x1b65   :  { %v1454_v14 = vmul.f32 %v1451_v5, %v1405_v51 }
0x1baa   :  { %v1457_v22 = vpop.permute.xlu2 %1456 }
0x1bab   :  { %v1459_v11 = vmul.f32 %v1457_v22, %v1451_v5 }
0x1bad   :  { %1461 = vrot.lane.b32.xlu0 %v1459_v11, %s2352_s5 }
0x1bb2   :  { %v765_v12 = vpop.permute.xlu2 %764 }
0x1bb3   :  { %768 = vst.msk [vmem:[#allocation4 + $0x10] sm:$0xff] %vm632_vm7, %v765_v12 }
0x1bb4   :  { %770 = vst.msk [vmem:[#allocation4 + $0x38] sm:$0xff] %vm635_vm8, %v765_v12 }
0x1bb5   :  { %831 = vrot.lane.b32.xlu0 %v2757_v9, %s2353_s21 }
0x1bba   :  { %v1096_v13 = vpop.permute.xlu2 %1095 }
0x1bbb   :  { %1098 = vst.msk [vmem:[#allocation4 + $0x38] sm:$0xff] %vm632_vm7, %v1096_v13 }
0x1bbc   :  { %1099 = vst.msk [vmem:[#allocation4 + $0x10] sm:$0xff] %vm635_vm8, %v1096_v13 }
0x1bc3   :  { %v1232_v25 = vld [vmem:[#allocation4 + $0x10] sm:$0xff] }
0x1bc4   :  { %v1252_v4 = vadd.f32 %v1242_v26, %v1232_v25 }
0x1c1f   :  { %v1462_v15 = vpop.permute.xlu0 %1461 }
0x1c20   :  { %v1464_v16 = vadd.f32 %v1462_v15, %v1454_v14 }
0x1c22   :  { %2280 = vtanh.f32 %v1464_v16 }
0x1c27   :  { %v832_v17 = vpop.permute.xlu0 %831 }
0x1c28   :  { %v2281_v18 = vpop.eup %2280  ;;  %835 = vst.msk [vmem:[#allocation4 + $0x18] sm:$0xff] %vm632_vm7, %v832_v17 }
0x1c29   :  { %837 = vst.msk [vmem:[#allocation4 + $0x30] sm:$0xff] %vm635_vm8, %v832_v17  ;;  %1467 = vrot.lane.b32.xlu1 %v2281_v18, %s2352_s5 }
0x1c31   :  { %1030 = vrot.lane.b32.xlu1 %v2787_v38, %s2353_s21 }
0x1c9b   :  { %v1468_v9 = vpop.permute.xlu1 %1467 }
0x1c9c   :  { %v1470_v19 = vmul.f32 %v1468_v9, %v1451_v5 }
0x1c9e   :  { %v1473_v21 = vpack.c.bf16 %v1470_v19, %v1470_v19  ;;  %v1471_v43 = vmax.f32 %v2868_v56, %v1470_v19 }
0x1ca0   :  { %1475 = vrot.lane.b32.xlu0 %v1473_v21, %s2353_s21 }
0x1ca3   :  { %v1031_v24 = vpop.permute.xlu1 %1030 }
0x1ca4   :  { %1033 = vst.msk [vmem:[#allocation4 + $0x30] sm:$0xff] %vm632_vm7, %v1031_v24 }
0x1ca5   :  { %1034 = vst.msk [vmem:[#allocation4 + $0x18] sm:$0xff] %vm635_vm8, %v1031_v24 }
0x1cac   :  { %v1233_v49 = vld [vmem:[#allocation4 + $0x18] sm:$0xff] }
0x1cad   :  { %v1253_v62 = vadd.f32 %v1243_v55, %v1233_v49 }
0x1caf   :  { %v1261_v27 = vpack.c.bf16 %v1253_v62, %v1252_v4  ;;  %v1245_v62 = vld [vmem:[#allocation2 + $0x28] sm:$0xff] }
0x1cb1   :  { %2132 = vmatmul.msk.bf16.gmra.mxu1 %vm393_vm12, %v1261_v27 }
0x1d12   :  { %v1476_v38 = vpop.permute.xlu0 %1475 }
0x1d13   :  { %2147 = vmatmul.msk.bf16.vlgmr.msrb.gmra.mxu0 %vm393_vm12, %v1476_v38  ;;  %v1244_v38 = vld [vmem:[#allocation2 + $0x20] sm:$0xff] }
0x1d14   :  { %1846 = vmatpush.bf16.msrb.mxu0 %v2825_v2 }
0x1d18   :  { %1847 = vmatpush.bf16.msrb.mxu0 %v2834_v3 }
0x1d2e   :  { %v1314_v28 = vpop.f32.mrf.mxu1 }
0x1d2f   :  { %v1315_v29 = vadd.f32 %v2862_v23, %v1314_v28 }
0x1d36   :  { %v1316_v8 = vpop.f32.mrf.mxu1 }
0x1d37   :  { %v1317_v6 = vadd.f32 %v2862_v23, %v1316_v8 }
0x1d90   :  { %v1489_v30 = vpop.f32.mrf.mxu0 }
0x1d91   :  { %v1493_v31 = vadd.f32 %v1489_v30, %v1315_v29  ;;  %v1236_v30 = vld [vmem:[#allocation4 + $0x30] sm:$0xff] }
0x1d93   :  { %2282 = vtanh.f32 %v1493_v31  ;;  %v2148_v39 = vmul.f32 -1.442695, %v1493_v31  ;;  %v1237_v31 = vld [vmem:[#allocation4 + $0x38] sm:$0xff] }
0x1d95   :  { %2284 = vpow2.f32 %v2148_v39  ;;  %v1247_v39 = vld [vmem:[#allocation2 + $0x38] sm:$0xff] }
0x1d98   :  { %v1491_v35 = vpop.f32.mrf.mxu0 }
0x1d99   :  { %v2283_v37 = vpop.eup %2282  ;;  %v1246_v35 = vld [vmem:[#allocation2 + $0x30] sm:$0xff] }
0x1d9a   :  { %1516 = vrot.lane.b32.xlu1 %v2283_v37, %s2352_s5  ;;  %v1256_v37 = vadd.f32 %v1246_v35, %v1236_v30 }
0x1d9b   :  { %v2285_v42 = vpop.eup %2284 }
0x1d9c   :  { %v1497_v44 = vadd.f32 1.0, %v2285_v42  ;;  %v1257_v42 = vadd.f32 %v1247_v39, %v1237_v31 }
0x1d9e   :  { %2286 = vrcp.f32 %v1497_v44  ;;  %v1509_v53 = vand.u32 2147483648, %v1497_v44  ;;  %vm1503_vm3 = vweird.f32 %v1497_v44  ;;  %v1507_v54 = vand.u32 2147483647, %v1497_v44 }
0x1da0   :  { %v1510_v34 = vor.u32 1.1754944e-38, %v1509_v53  ;;  %vm1508_vm5 = vcmp.eq.f32.partialorder %v1507_v54, 8.507059e+37 }
0x1da4   :  { %v2287_v45 = vpop.eup %2286 }
0x1da5   :  { %v1499_v47 = vmul.f32 %v2287_v45, %v1497_v44  ;;  %vm1504_vm2 = vweird.f32 %v2287_v45  ;;  %v1263_v44 = vpack.c.bf16 %v1257_v42, %v1256_v37 }
0x1da6   :  { %vm1505_vm4 = vmor %vm1503_vm3, %vm1504_vm2 }
0x1da7   :  { %v1500_v48 = vsub.f32 1.0, %v1499_v47  ;;  %v1238_v47 = vld [vmem:[#allocation4 + $0x40] sm:$0xff] }
0x1da9   :  { %v1501_v50 = vmul.f32 %v2287_v45, %v1500_v48  ;;  %v1249_v48 = vld [vmem:[#allocation2 + $0x48] sm:$0xff] }
0x1dab   :  { %v1502_v51 = vadd.f32 %v2287_v45, %v1501_v50 }
0x1dad   :  { %v1506_v20 = vsel %vm1505_vm4, %v2287_v45, %v1502_v51  ;;  %v1239_v45 = vld [vmem:[#allocation4 + $0x48] sm:$0xff]  ;;  %v1248_v51 = vld [vmem:[#allocation2 + $0x40] sm:$0xff] }
0x1dae   :  { %v1511_v32 = vsel %vm1508_vm5, %v1510_v34, %v1506_v20  ;;  %v1259_v50 = vadd.f32 %v1249_v48, %v1239_v45  ;;  %v1258_v53 = vadd.f32 %v1248_v51, %v1238_v47 }
0x1daf   :  { %v1514_v59 = vmul.f32 %v1511_v32, %v1464_v16 }
0x1db0   :  { %v1264_v54 = vpack.c.bf16 %v1259_v50, %v1258_v53 }
0x1e0c   :  { %v1517_v46 = vpop.permute.xlu1 %1516 }
0x1e0d   :  { %v1519_v57 = vmul.f32 %v1517_v46, %v1511_v32 }
0x1e0f   :  { %1521 = vrot.lane.b32.xlu2 %v1519_v57, %s2352_s5 }
0x1e69   :  { %v1522_v52 = vpop.permute.xlu2 %1521 }
0x1e6a   :  { %v1524_v33 = vadd.f32 %v1522_v52, %v1514_v59 }
0x1e6c   :  { %2288 = vtanh.f32 %v1524_v33 }
0x1e72   :  { %v2289_v36 = vpop.eup %2288 }
0x1e73   :  { %1527 = vrot.lane.b32.xlu0 %v2289_v36, %s2352_s5 }
0x1ee5   :  { %v1528_v58 = vpop.permute.xlu0 %1527 }
0x1ee6   :  { %v1530_v1 = vmul.f32 %v1528_v58, %v1511_v32 }
0x1ee8   :  { %v2906_v60 = vmax.f32 %v1471_v43, %v1530_v1  ;;  %v1533_v61 = vpack.c.bf16 %v1530_v1, %v1530_v1 }
0x1eea   :  { %1535 = vrot.lane.b32.xlu1 %v1533_v61, %s2353_s21 }
0x1f5c   :  { %v1536_v63 = vpop.permute.xlu1 %1535 }
0x1f5d   :  { %2149 = vmatmul.msk.bf16.vlgmr.msrb.gmra.mxu2 %vm393_vm12, %v1536_v63 }
0x1f5e   :  { %1906 = vmatpush.bf16.msrb.mxu2 %v2825_v2 }
0x1f62   :  { %1907 = vmatpush.bf16.msrb.mxu2 %v2834_v3 }
0x1fe0   :  { %v1549_v0 = vpop.f32.mrf.mxu2 }
0x1fe1   :  { %v1553_v10 = vadd.f32 %v1549_v0, %v1317_v6 }
0x1fe3   :  { %2290 = vtanh.f32 %v1553_v10  ;;  %v2150_v22 = vmul.f32 -1.442695, %v1553_v10 }
0x1fe5   :  { %2292 = vpow2.f32 %v2150_v22 }
0x1fe8   :  { %v1551_v56 = vpop.f32.mrf.mxu2 }
0x1fe9   :  { %v2291_v40 = vpop.eup %2290 }
0x1fea   :  { %1576 = vrot.lane.b32.xlu2 %v2291_v40, %s2352_s5 }
0x1feb   :  { %v2293_v5 = vpop.eup %2292 }
0x1fec   :  { %v1557_v11 = vadd.f32 1.0, %v2293_v5 }
0x1fee   :  { %2294 = vrcp.f32 %v1557_v11  ;;  %v1569_v15 = vand.u32 2147483648, %v1557_v11  ;;  %vm1563_vm9 = vweird.f32 %v1557_v11  ;;  %v1567_v16 = vand.u32 2147483647, %v1557_v11 }
0x1ff0   :  { %v1570_v18 = vor.u32 1.1754944e-38, %v1569_v15  ;;  %vm1568_vm11 = vcmp.eq.f32.partialorder %v1567_v16, 8.507059e+37 }
0x1ff2   :  { %898 = vrot.lane.b32.xlu2 %v2767_v41, %s2353_s21 }
0x1ff4   :  { %v2295_v2 = vpop.eup %2294 }
0x1ff5   :  { %v1559_v3 = vmul.f32 %v2295_v2, %v1557_v11  ;;  %vm1564_vm6 = vweird.f32 %v2295_v2 }
0x1ff6   :  { %vm1565_vm10 = vmor %vm1563_vm9, %vm1564_vm6 }
0x1ff7   :  { %v1560_v12 = vsub.f32 1.0, %v1559_v3 }
0x1ff9   :  { %v1561_v13 = vmul.f32 %v2295_v2, %v1560_v12 }
0x1ffb   :  { %v1562_v14 = vadd.f32 %v2295_v2, %v1561_v13 }
0x1ffd   :  { %v1566_v17 = vsel %vm1565_vm10, %v2295_v2, %v1562_v14 }
0x1ffe   :  { %v1571_v41 = vsel %vm1568_vm11, %v1570_v18, %v1566_v17 }
0x1fff   :  { %v1574_v24 = vmul.f32 %v1571_v41, %v1524_v33 }
0x2044   :  { %v1577_v9 = vpop.permute.xlu2 %1576 }
0x2045   :  { %v1579_v19 = vmul.f32 %v1577_v9, %v1571_v41 }
0x2047   :  { %1581 = vrot.lane.b32.xlu0 %v1579_v19, %s2352_s5 }
0x204c   :  { %v899_v21 = vpop.permute.xlu2 %898 }
0x204d   :  { %902 = vst.msk [vmem:[#allocation4 + $0x20] sm:$0xff] %vm632_vm7, %v899_v21 }
0x204e   :  { %904 = vst.msk [vmem:[#allocation4 + $0x28] sm:$0xff] %vm635_vm8, %v899_v21 }
0x204f   :  { %965 = vrot.lane.b32.xlu0 %v2777_v7, %s2353_s21 }
0x20b9   :  { %v1582_v25 = vpop.permute.xlu0 %1581 }
0x20ba   :  { %v2921_v49 = vadd.f32 %v1582_v25, %v1574_v24 }
0x20bc   :  { %2296 = vtanh.f32 %v2921_v49 }
0x20c1   :  { %v966_v26 = vpop.permute.xlu0 %965 }
0x20c2   :  { %v2297_v55 = vpop.eup %2296  ;;  %968 = vst.msk [vmem:[#allocation4 + $0x28] sm:$0xff] %vm632_vm7, %v966_v26 }
0x20c3   :  { %969 = vst.msk [vmem:[#allocation4 + $0x20] sm:$0xff] %vm635_vm8, %v966_v26  ;;  %1587 = vrot.lane.b32.xlu1 %v2297_v55, %s2352_s5 }
0x20c9   :  { %v1235_v4 = vld [vmem:[#allocation4 + $0x28] sm:$0xff] }
0x20ca   :  { %v1234_v27 = vld [vmem:[#allocation4 + $0x20] sm:$0xff]  ;;  %v1255_v28 = vadd.f32 %v1245_v62, %v1235_v4 }
0x20cb   :  { %v1254_v7 = vadd.f32 %v1244_v38, %v1234_v27 }
0x20cd   :  { %v1262_v29 = vpack.c.bf16 %v1255_v28, %v1254_v7 }
0x20cf   :  { %2133 = vmatmul.msk.bf16.gmra.mxu1 %vm393_vm12, %v1262_v29 }
0x20df   :  { %2134 = vmatmul.msk.bf16.gmra.mxu1 %vm393_vm12, %v1263_v44 }
0x20ef   :  { %2135 = vmatmul.msk.bf16.gmra.mxu1 %vm393_vm12, %v1264_v54 }
0x2135   :  { %v1588_v20 = vpop.permute.xlu1 %1587 }
0x2136   :  { %v1590_v34 = vmul.f32 %v1588_v20, %v1571_v41 }
0x2138   :  { %v1591_v46 = vmax.f32 %v2906_v60, %v1590_v34  ;;  %v1593_v32 = vpack.c.bf16 %v1590_v34, %v1590_v34 }
0x213a   :  { %1595 = vrot.lane.b32.xlu1 %v1593_v32, %s2353_s21 }
0x214c   :  { %v1319_v59 = vpop.f32.mrf.mxu1 }
0x214d   :  { %v1320_v52 = vadd.f32 %v2862_v23, %v1319_v59 }
0x2154   :  { %v1321_v19 = vpop.f32.mrf.mxu1 }
0x2155   :  { %v1322_v21 = vadd.f32 %v2862_v23, %v1321_v19 }
0x21ac   :  { %v1596_v57 = vpop.permute.xlu1 %1595 }
0x21ad   :  { %2151 = vmatmul.msk.bf16.vlgmr.msra.gmra.mxu3 %vm393_vm12, %v1596_v57 }
0x2230   :  { %v1609_v33 = vpop.f32.mrf.mxu3 }
0x2231   :  { %v1613_v36 = vadd.f32 %v1609_v33, %v1320_v52 }
0x2233   :  { %2298 = vtanh.f32 %v1613_v36  ;;  %v2152_v1 = vmul.f32 -1.442695, %v1613_v36 }
0x2235   :  { %2300 = vpow2.f32 %v2152_v1 }
0x2238   :  { %v1611_v58 = vpop.f32.mrf.mxu3 }
0x2239   :  { %v2299_v43 = vpop.eup %2298 }
0x223a   :  { %1636 = vrot.lane.b32.xlu2 %v2299_v43, %s2352_s5 }
0x223b   :  { %v2301_v61 = vpop.eup %2300 }
0x223c   :  { %v1617_v60 = vadd.f32 1.0, %v2301_v61 }
0x223e   :  { %2302 = vrcp.f32 %v1617_v60  ;;  %v1629_v56 = vand.u32 2147483648, %v1617_v60  ;;  %vm1623_vm8 = vweird.f32 %v1617_v60  ;;  %v1627_v40 = vand.u32 2147483647, %v1617_v60 }
0x2240   :  { %v1630_v5 = vor.u32 1.1754944e-38, %v1629_v56  ;;  %vm1628_vm14 = vcmp.eq.f32.partialorder %v1627_v40, 8.507059e+37 }
0x2244   :  { %v2303_v63 = vpop.eup %2302 }
0x2245   :  { %v1619_v8 = vmul.f32 %v2303_v63, %v1617_v60  ;;  %vm1624_vm7 = vweird.f32 %v2303_v63 }
0x2246   :  { %vm1625_vm13 = vmor %vm1623_vm8, %vm1624_vm7 }
0x2247   :  { %v1620_v6 = vsub.f32 1.0, %v1619_v8 }
0x2249   :  { %v1621_v0 = vmul.f32 %v2303_v63, %v1620_v6 }
0x224b   :  { %v1622_v10 = vadd.f32 %v2303_v63, %v1621_v0 }
0x224d   :  { %v1626_v22 = vsel %vm1625_vm13, %v2303_v63, %v1622_v10 }
0x224e   :  { %v1631_v2 = vsel %vm1628_vm14, %v1630_v5, %v1626_v22 }
0x224f   :  { %v1634_v12 = vmul.f32 %v1631_v2, %v2921_v49 }
0x2294   :  { %v1637_v11 = vpop.permute.xlu2 %1636 }
0x2295   :  { %v1639_v3 = vmul.f32 %v1637_v11, %v1631_v2 }
0x2297   :  { %1641 = vrot.lane.b32.xlu0 %v1639_v3, %s2352_s5 }
0x2309   :  { %v1642_v13 = vpop.permute.xlu0 %1641 }
0x230a   :  { %v1644_v14 = vadd.f32 %v1642_v13, %v1634_v12 }
0x230c   :  { %2304 = vtanh.f32 %v1644_v14 }
0x2312   :  { %v2305_v15 = vpop.eup %2304 }
0x2313   :  { %1647 = vrot.lane.b32.xlu1 %v2305_v15, %s2352_s5 }
0x2385   :  { %v1648_v16 = vpop.permute.xlu1 %1647 }
0x2386   :  { %v1650_v17 = vmul.f32 %v1648_v16, %v1631_v2 }
0x2388   :  { %v2938_v18 = vmax.f32 %v1591_v46, %v1650_v17  ;;  %v1653_v9 = vpack.c.bf16 %v1650_v17, %v1650_v17  ;;  %v1324_v46 = vpop.f32.mrf.mxu1 }
0x2389   :  { %v1325_v32 = vadd.f32 %v2862_v23, %v1324_v46 }
0x238a   :  { %1655 = vrot.lane.b32.xlu2 %v1653_v9, %s2353_s21 }
0x23e4   :  { %v1656_v41 = vpop.permute.xlu2 %1655 }
0x23e5   :  { %2153 = vmatmul.msk.bf16.vlgmr.msra.gmra.mxu0 %vm393_vm12, %v1656_v41 }
0x2462   :  { %v1669_v24 = vpop.f32.mrf.mxu0 }
0x2463   :  { %v1673_v25 = vadd.f32 %v1669_v24, %v1322_v21 }
0x2465   :  { %2306 = vtanh.f32 %v1673_v25  ;;  %v2154_v55 = vmul.f32 -1.442695, %v1673_v25 }
0x2467   :  { %2308 = vpow2.f32 %v2154_v55 }
0x246a   :  { %v1671_v49 = vpop.f32.mrf.mxu0 }
0x246b   :  { %v2307_v26 = vpop.eup %2306 }
0x246c   :  { %1696 = vrot.lane.b32.xlu0 %v2307_v26, %s2352_s5 }
0x246d   :  { %v2309_v4 = vpop.eup %2308 }
0x246e   :  { %v1677_v62 = vadd.f32 1.0, %v2309_v4 }
0x2470   :  { %2310 = vrcp.f32 %v1677_v62  ;;  %v1689_v30 = vand.u32 2147483648, %v1677_v62  ;;  %vm1683_vm0 = vweird.f32 %v1677_v62  ;;  %v1687_v31 = vand.u32 2147483647, %v1677_v62 }
0x2472   :  { %v1690_v37 = vor.u32 1.1754944e-38, %v1689_v30  ;;  %vm1688_vm2 = vcmp.eq.f32.partialorder %v1687_v31, 8.507059e+37 }
0x2476   :  { %v2311_v27 = vpop.eup %2310 }
0x2477   :  { %v1679_v38 = vmul.f32 %v2311_v27, %v1677_v62  ;;  %vm1684_vm15 = vweird.f32 %v2311_v27 }
0x2478   :  { %vm1685_vm1 = vmor %vm1683_vm0, %vm1684_vm15 }
0x2479   :  { %v1680_v28 = vsub.f32 1.0, %v1679_v38 }
0x247b   :  { %v1681_v7 = vmul.f32 %v2311_v27, %v1680_v28 }
0x247d   :  { %v1682_v29 = vadd.f32 %v2311_v27, %v1681_v7 }
0x247f   :  { %v1686_v35 = vsel %vm1685_vm1, %v2311_v27, %v1682_v29 }
0x2480   :  { %v1691_v42 = vsel %vm1688_vm2, %v1690_v37, %v1686_v35 }
0x2481   :  { %v1694_v45 = vmul.f32 %v1691_v42, %v1644_v14 }
0x24de   :  { %v1697_v39 = vpop.permute.xlu0 %1696 }
0x24df   :  { %v1699_v44 = vmul.f32 %v1697_v39, %v1691_v42 }
0x24e1   :  { %1701 = vrot.lane.b32.xlu1 %v1699_v44, %s2352_s5 }
0x2553   :  { %v1702_v47 = vpop.permute.xlu1 %1701 }
0x2554   :  { %v1704_v48 = vadd.f32 %v1702_v47, %v1694_v45 }
0x2556   :  { %2312 = vtanh.f32 %v1704_v48 }
0x255c   :  { %v2313_v50 = vpop.eup %2312 }
0x255d   :  { %1707 = vrot.lane.b32.xlu2 %v2313_v50, %s2352_s5 }
0x25b7   :  { %v1708_v51 = vpop.permute.xlu2 %1707 }
0x25b8   :  { %v1710_v53 = vmul.f32 %v1708_v51, %v1691_v42 }
0x25ba   :  { %v1711_v54 = vmax.f32 %v2938_v18, %v1710_v53  ;;  %v1713_v20 = vpack.c.bf16 %v1710_v53, %v1710_v53  ;;  %v1326_v18 = vpop.f32.mrf.mxu1 }
0x25bb   :  { %v1327_v9 = vadd.f32 %v2862_v23, %v1326_v18 }
0x25bc   :  { %1715 = vrot.lane.b32.xlu0 %v1713_v20, %s2353_s21 }
0x262e   :  { %v1716_v34 = vpop.permute.xlu0 %1715 }
0x262f   :  { %2155 = vmatmul.msk.bf16.vlgmr.msra.gmra.mxu2 %vm393_vm12, %v1716_v34 }
0x26b2   :  { %v1729_v57 = vpop.f32.mrf.mxu2 }
0x26b3   :  { %v1733_v59 = vadd.f32 %v1729_v57, %v1325_v32 }
0x26b5   :  { %2314 = vtanh.f32 %v1733_v59  ;;  %v2156_v36 = vmul.f32 -1.442695, %v1733_v59 }
0x26b7   :  { %2316 = vpow2.f32 %v2156_v36 }
0x26ba   :  { %v1731_v52 = vpop.f32.mrf.mxu2 }
0x26bb   :  { %v2315_v33 = vpop.eup %2314 }
0x26bc   :  { %1756 = vrot.lane.b32.xlu1 %v2315_v33, %s2352_s5 }
0x26bd   :  { %v2317_v58 = vpop.eup %2316 }
0x26be   :  { %v1737_v43 = vadd.f32 1.0, %v2317_v58 }
0x26c0   :  { %2318 = vrcp.f32 %v1737_v43  ;;  %v1749_v6 = vand.u32 2147483648, %v1737_v43  ;;  %vm1743_vm4 = vweird.f32 %v1737_v43  ;;  %v1747_v0 = vand.u32 2147483647, %v1737_v43 }
0x26c2   :  { %v1750_v56 = vor.u32 1.1754944e-38, %v1749_v6  ;;  %vm1748_vm6 = vcmp.eq.f32.partialorder %v1747_v0, 8.507059e+37 }
0x26c6   :  { %v2319_v1 = vpop.eup %2318 }
0x26c7   :  { %v1739_v61 = vmul.f32 %v2319_v1, %v1737_v43  ;;  %vm1744_vm3 = vweird.f32 %v2319_v1 }
0x26c8   :  { %vm1745_vm5 = vmor %vm1743_vm4, %vm1744_vm3 }
0x26c9   :  { %v1740_v60 = vsub.f32 1.0, %v1739_v61 }
0x26cb   :  { %v1741_v63 = vmul.f32 %v2319_v1, %v1740_v60 }
0x26cd   :  { %v1742_v8 = vadd.f32 %v2319_v1, %v1741_v63 }
0x26cf   :  { %v1746_v10 = vsel %vm1745_vm5, %v2319_v1, %v1742_v8 }
0x26d0   :  { %v1751_v22 = vsel %vm1748_vm6, %v1750_v56, %v1746_v10  ;;  %vm1990_vm6 = vcmask 7168  }
0x26d1   :  { %v1754_v11 = vmul.f32 %v1751_v22, %v1704_v48 }
0x272e   :  { %v1757_v40 = vpop.permute.xlu1 %1756 }
0x272f   :  { %v1759_v5 = vmul.f32 %v1757_v40, %v1751_v22 }
0x2731   :  { %1761 = vrot.lane.b32.xlu2 %v1759_v5, %s2352_s5 }
0x278b   :  { %v1762_v2 = vpop.permute.xlu2 %1761 }
0x278c   :  { %v1764_v3 = vadd.f32 %v1762_v2, %v1754_v11 }
0x278e   :  { %2320 = vtanh.f32 %v1764_v3 }
0x2794   :  { %v2321_v12 = vpop.eup %2320 }
0x2795   :  { %1767 = vrot.lane.b32.xlu0 %v2321_v12, %s2352_s5 }
0x2807   :  { %v1768_v13 = vpop.permute.xlu0 %1767 }
0x2808   :  { %v1770_v14 = vmul.f32 %v1768_v13, %v1751_v22 }
0x280a   :  { %v2953_v15 = vmax.f32 %v1711_v54, %v1770_v14  ;;  %v1773_v16 = vpack.c.bf16 %v1770_v14, %v1770_v14  ;;  %v1329_v54 = vpop.f32.mrf.mxu1 }
0x280b   :  { %v1330_v20 = vadd.f32 %v2862_v23, %v1329_v54 }
0x280c   :  { %1775 = vrot.lane.b32.xlu1 %v1773_v16, %s2353_s21 }
0x287e   :  { %v1776_v17 = vpop.permute.xlu1 %1775 }
0x287f   :  { %2157 = vmatmul.msk.bf16.vlgmr.msrb.gmra.mxu3 %vm393_vm12, %v1776_v17 }
0x2902   :  { %v1789_v41 = vpop.f32.mrf.mxu3 }
0x2903   :  { %v1793_v19 = vadd.f32 %v1789_v41, %v1327_v9 }
0x2905   :  { %2322 = vtanh.f32 %v1793_v19  ;;  %v2158_v25 = vmul.f32 -1.442695, %v1793_v19 }
0x2907   :  { %2324 = vpow2.f32 %v2158_v25 }
0x290a   :  { %v1791_v21 = vpop.f32.mrf.mxu3 }
0x290b   :  { %v2323_v24 = vpop.eup %2322 }
0x290c   :  { %1816 = vrot.lane.b32.xlu2 %v2323_v24, %s2352_s5 }
0x290d   :  { %v2325_v49 = vpop.eup %2324 }
0x290e   :  { %v1797_v26 = vadd.f32 1.0, %v2325_v49 }
0x2910   :  { %2326 = vrcp.f32 %v1797_v26  ;;  %v1809_v28 = vand.u32 2147483648, %v1797_v26  ;;  %vm1803_vm10 = vweird.f32 %v1797_v26  ;;  %v1807_v7 = vand.u32 2147483647, %v1797_v26 }
0x2912   :  { %v1810_v30 = vor.u32 1.1754944e-38, %v1809_v28  ;;  %vm1808_vm7 = vcmp.eq.f32.partialorder %v1807_v7, 8.507059e+37 }
0x2916   :  { %v2327_v55 = vpop.eup %2326 }
0x2917   :  { %v1799_v4 = vmul.f32 %v2327_v55, %v1797_v26  ;;  %vm1804_vm9 = vweird.f32 %v2327_v55 }
0x2918   :  { %vm1805_vm11 = vmor %vm1803_vm10, %vm1804_vm9 }
0x2919   :  { %v1800_v62 = vsub.f32 1.0, %v1799_v4 }
0x291b   :  { %v1801_v27 = vmul.f32 %v2327_v55, %v1800_v62 }
0x291d   :  { %v1802_v38 = vadd.f32 %v2327_v55, %v1801_v27 }
0x291f   :  { %v1806_v29 = vsel %vm1805_vm11, %v2327_v55, %v1802_v38 }
0x2920   :  { %v1811_v35 = vsel %vm1808_vm7, %v1810_v30, %v1806_v29  ;;  %v2184_v30 = vld [vmem:[%s2996_s10] ss:$0 sm:$0xff] }
0x2921   :  { %v1814_v39 = vmul.f32 %v1811_v35, %v1764_v3 }
0x2966   :  { %v1817_v31 = vpop.permute.xlu2 %1816 }
0x2967   :  { %v1819_v37 = vmul.f32 %v1817_v31, %v1811_v35 }
0x2969   :  { %1821 = vrot.lane.b32.xlu0 %v1819_v37, %s2352_s5 }
0x29db   :  { %v1822_v42 = vpop.permute.xlu0 %1821 }
0x29dc   :  { %v1824_v44 = vadd.f32 %v1822_v42, %v1814_v39 }
0x29de   :  { %2328 = vtanh.f32 %v1824_v44 }
0x29e4   :  { %v2329_v45 = vpop.eup %2328 }
0x29e5   :  { %1827 = vrot.lane.b32.xlu1 %v2329_v45, %s2352_s5 }
0x2a57   :  { %v1828_v47 = vpop.permute.xlu1 %1827 }
0x2a58   :  { %v1830_v48 = vmul.f32 %v1828_v47, %v1811_v35 }
0x2a5a   :  { %v1831_v50 = vmax.f32 %v2953_v15, %v1830_v48  ;;  %v1833_v51 = vpack.c.bf16 %v1830_v48, %v1830_v48  ;;  %v1331_v15 = vpop.f32.mrf.mxu1 }
0x2a5b   :  { %v1332_v16 = vadd.f32 %v2862_v23, %v1331_v15 }
0x2a5c   :  { %1835 = vrot.lane.b32.xlu2 %v1833_v51, %s2353_s21 }
0x2ab6   :  { %v1836_v53 = vpop.permute.xlu2 %1835 }
0x2ab7   :  { %2159 = vmatmul.msk.bf16.vlgmr.msrb.gmra.mxu0 %vm393_vm12, %v1836_v53 }
0x2b34   :  { %v1849_v34 = vpop.f32.mrf.mxu0 }
0x2b35   :  { %v1853_v46 = vadd.f32 %v1849_v34, %v1330_v20 }
0x2b37   :  { %2330 = vtanh.f32 %v1853_v46  ;;  %v2160_v59 = vmul.f32 -1.442695, %v1853_v46 }
0x2b39   :  { %2332 = vpow2.f32 %v2160_v59 }
0x2b3c   :  { %v1851_v32 = vpop.f32.mrf.mxu0 }
0x2b3d   :  { %v2331_v57 = vpop.eup %2330 }
0x2b3e   :  { %1876 = vrot.lane.b32.xlu0 %v2331_v57, %s2352_s5 }
0x2b3f   :  { %v2333_v52 = vpop.eup %2332 }
0x2b40   :  { %v1857_v33 = vadd.f32 1.0, %v2333_v52 }
0x2b42   :  { %2334 = vrcp.f32 %v1857_v33  ;;  %v1869_v60 = vand.u32 2147483648, %v1857_v33  ;;  %vm1863_vm13 = vweird.f32 %v1857_v33  ;;  %v1867_v63 = vand.u32 2147483647, %v1857_v33 }
0x2b44   :  { %v1870_v6 = vor.u32 1.1754944e-38, %v1869_v60  ;;  %vm1868_vm15 = vcmp.eq.f32.partialorder %v1867_v63, 8.507059e+37 }
0x2b48   :  { %v2335_v36 = vpop.eup %2334 }
0x2b49   :  { %v1859_v58 = vmul.f32 %v2335_v36, %v1857_v33  ;;  %vm1864_vm8 = vweird.f32 %v2335_v36 }
0x2b4a   :  { %vm1865_vm14 = vmor %vm1863_vm13, %vm1864_vm8 }
0x2b4b   :  { %v1860_v43 = vsub.f32 1.0, %v1859_v58 }
0x2b4d   :  { %v1861_v1 = vmul.f32 %v2335_v36, %v1860_v43 }
0x2b4f   :  { %v1862_v61 = vadd.f32 %v2335_v36, %v1861_v1 }
0x2b51   :  { %v1866_v8 = vsel %vm1865_vm14, %v2335_v36, %v1862_v61 }
0x2b52   :  { %v1871_v10 = vsel %vm1868_vm15, %v1870_v6, %v1866_v8 }
0x2b53   :  { %v1874_v40 = vmul.f32 %v1871_v10, %v1824_v44 }
0x2bb0   :  { %v1877_v0 = vpop.permute.xlu0 %1876 }
0x2bb1   :  { %v1879_v56 = vmul.f32 %v1877_v0, %v1871_v10 }
0x2bb3   :  { %1881 = vrot.lane.b32.xlu1 %v1879_v56, %s2352_s5 }
0x2c25   :  { %v1882_v22 = vpop.permute.xlu1 %1881 }
0x2c26   :  { %v1884_v5 = vadd.f32 %v1882_v22, %v1874_v40 }
0x2c28   :  { %2336 = vtanh.f32 %v1884_v5 }
0x2c2e   :  { %v2337_v11 = vpop.eup %2336 }
0x2c2f   :  { %1887 = vrot.lane.b32.xlu2 %v2337_v11, %s2352_s5 }
0x2c89   :  { %v1888_v2 = vpop.permute.xlu2 %1887 }
0x2c8a   :  { %v1890_v3 = vmul.f32 %v1888_v2, %v1871_v10 }
0x2c8c   :  { %v1891_v12 = vmax.f32 %v1831_v50, %v1890_v3  ;;  %v1893_v13 = vpack.c.bf16 %v1890_v3, %v1890_v3  ;;  %v17_v50 = vstv %s2997_s11 }
0x2c8d   :  { %18 = vst [vmem:[#allocation5] sm:$0x1] %v17_v50 }
0x2c8e   :  { %1895 = vrot.lane.b32.xlu0 %v1893_v13, %s2353_s21 }
0x2c94   :  { %v2185_v54 = vld [vmem:[#allocation5] ss:$0 sm:$0xff] }
0x2d00   :  { %v1896_v14 = vpop.permute.xlu0 %1895 }
0x2d01   :  { %2161 = vmatmul.msk.bf16.vlgmr.msrb.gmra.mxu2 %vm393_vm12, %v1896_v14 }
0x2d84   :  { %v1909_v17 = vpop.f32.mrf.mxu2 }
0x2d85   :  { %v1913_v18 = vadd.f32 %v1909_v17, %v1332_v16 }
0x2d87   :  { %2338 = vtanh.f32 %v1913_v18  ;;  %v2162_v19 = vmul.f32 -1.442695, %v1913_v18 }
0x2d89   :  { %2340 = vpow2.f32 %v2162_v19 }
0x2d8c   :  { %v1911_v9 = vpop.f32.mrf.mxu2 }
0x2d8d   :  { %v2339_v41 = vpop.eup %2338 }
0x2d8e   :  { %1936 = vrot.lane.b32.xlu1 %v2339_v41, %s2352_s5 }
0x2d8f   :  { %v2341_v21 = vpop.eup %2340 }
0x2d90   :  { %v1917_v24 = vadd.f32 1.0, %v2341_v21 }
0x2d92   :  { %2342 = vrcp.f32 %v1917_v24  ;;  %v1929_v62 = vand.u32 2147483648, %v1917_v24  ;;  %vm1923_vm1 = vweird.f32 %v1917_v24  ;;  %v1927_v23 = vand.u32 2147483647, %v1917_v24 }
0x2d94   :  { %v1930_v38 = vor.u32 1.1754944e-38, %v1929_v62  ;;  %vm1928_vm3 = vcmp.eq.f32.partialorder %v1927_v23, 8.507059e+37 }
0x2d96   :  { %1955 = vrot.lane.b32.xlu1 %v2184_v30, %s2353_s21 }
0x2d98   :  { %v2343_v25 = vpop.eup %2342 }
0x2d99   :  { %v1919_v49 = vmul.f32 %v2343_v25, %v1917_v24  ;;  %vm1924_vm0 = vweird.f32 %v2343_v25 }
0x2d9a   :  { %vm1925_vm2 = vmor %vm1923_vm1, %vm1924_vm0 }
0x2d9b   :  { %v1920_v26 = vsub.f32 1.0, %v1919_v49 }
0x2d9d   :  { %v1921_v55 = vmul.f32 %v2343_v25, %v1920_v26 }
0x2d9f   :  { %v1922_v4 = vadd.f32 %v2343_v25, %v1921_v55 }
0x2da1   :  { %v1926_v27 = vsel %vm1925_vm2, %v2343_v25, %v1922_v4 }
0x2da2   :  { %v1931_v7 = vsel %vm1928_vm3, %v1930_v38, %v1926_v27 }
0x2da3   :  { %v1934_v31 = vmul.f32 %v1931_v7, %v1884_v5 }
0x2e00   :  { %v1937_v28 = vpop.permute.xlu1 %1936 }
0x2e01   :  { %v1939_v29 = vmul.f32 %v1937_v28, %v1931_v7 }
0x2e03   :  { %1941 = vrot.lane.b32.xlu2 %v1939_v29, %s2352_s5 }
0x2e08   :  { %v1956_v45 = vpop.permute.xlu1 %1955 }
0x2e5d   :  { %v1942_v35 = vpop.permute.xlu2 %1941 }
0x2e5e   :  { %v1944_v37 = vadd.f32 %v1942_v35, %v1934_v31 }
0x2e60   :  { %2344 = vtanh.f32 %v1944_v37 }
0x2e66   :  { %v2345_v39 = vpop.eup %2344 }
0x2e67   :  { %1947 = vrot.lane.b32.xlu0 %v2345_v39, %s2352_s5 }
0x2ed9   :  { %v1948_v42 = vpop.permute.xlu0 %1947 }
0x2eda   :  { %v1950_v44 = vmul.f32 %v1948_v42, %v1931_v7 }
0x2edc   :  { %v1951_v47 = vmax.f32 %v1891_v12, %v1950_v44 }
0x2ede   :  { %v1958_v48 = vmul.f32 %v1956_v45, %v1951_v47 }
0x2ee0   :  { %1960 = vrot.lane.b32.xlu2 %v1958_v48, %s2353_s21 }
0x2f3a   :  { %v1961_v51 = vpop.permute.xlu2 %1960 }
0x2f3b   :  { %v1963_v53 = vsel %vm393_vm12, %v1961_v51, 0.0 }
0x2f3c   :  { %1964 = vadd.xlane.f32.xlu0 %v1963_v53 }
0x2faf   :  { %v1965_v20 = vpop.xlane.xlu0 %1964 }
0x2fb0   :  { %v1970_v34 = vadd.f32 %v2185_v54, %v1965_v20 }
0x2fb2   :  { %v2163_v46 = vmul.f32 -1.442695, %v1970_v34 }
0x2fb4   :  { %2346 = vpow2.f32 %v2163_v46 }
0x2fba   :  { %v2347_v32 = vpop.eup %2346 }
0x2fbb   :  { %v1974_v57 = vadd.f32 1.0, %v2347_v32 }
0x2fbd   :  { %2348 = vrcp.f32 %v1974_v57  ;;  %v1986_v36 = vand.u32 2147483648, %v1974_v57  ;;  %v1984_v43 = vand.u32 2147483647, %v1974_v57  ;;  %vm1980_vm5 = vweird.f32 %v1974_v57 }
0x2fbf   :  { %v1987_v61 = vor.u32 1.1754944e-38, %v1986_v36  ;;  %vm1985_vm9 = vcmp.eq.f32.partialorder %v1984_v43, 8.507059e+37 }
0x2fc3   :  { %v2349_v59 = vpop.eup %2348 }
0x2fc4   :  { %v1976_v52 = vmul.f32 %v2349_v59, %v1974_v57  ;;  %vm1981_vm4 = vweird.f32 %v2349_v59 }
0x2fc5   :  { %vm1982_vm12 = vmor %vm1980_vm5, %vm1981_vm4 }
0x2fc6   :  { %v1977_v33 = vsub.f32 1.0, %v1976_v52 }
0x2fc8   :  { %v1978_v58 = vmul.f32 %v2349_v59, %v1977_v33 }
0x2fca   :  { %v1979_v1 = vadd.f32 %v2349_v59, %v1978_v58 }
0x2fcc   :  { %v1983_v60 = vsel %vm1982_vm12, %v2349_v59, %v1979_v1 }
0x2fcd   :  { %v1988_v63 = vsel %vm1985_vm9, %v1987_v61, %v1983_v60 }
0x2fce   :  { %1991 = vst.msk [vmem:[%s2998_s12] sm:$0xff] %vm1990_vm6, %v1988_v63 }

</bundles_post_ra>
